<compile_context>
chip_gen: v7x
topology: tpu7x:2x2x1
jax: 0.10.0
libtpu: 0.0.40
codegen_flags: <defaults>
</compile_context>

<pallas_src>
import numpy as np

import jax
import jax.numpy as jnp
from jax.experimental import pallas as pl
from jax.experimental.pallas import tpu as pltpu


def _conv_out(size, k, s):
    return (size - k) // s + 1


# ----------------------------------------------------------------------------
# Host-side (one-time) folding of each conv layer into matmul operands.
# ----------------------------------------------------------------------------
def _fold_conv(w_hwio, b, h_in, w_in, stride, batch_tile):
    """Fold a VALID conv (+bias) into per-kernel-row matmul operands.

    w_hwio : (kh, kw, cin, cout), b : (cout,) (any shape that flattens to cout)

    Returns (R, M, b_tiled, h_out, w_out) such that, for an activation held in
    the 2-D layout x2d[(n*h_in + h), (w*cin + c)] = x[n, h, w, c],
        relu( sum_di  R[di] @ x2d @ M[di]  + b_tiled )
    equals the conv+bias+ReLU output in the same 2-D layout
    out2d[(n*h_out + ho), (wo*cout + co)].
    """
    w_hwio = np.asarray(w_hwio, np.float32)
    b = np.asarray(b, np.float32).reshape(-1)
    kh, kw, cin, cout = w_hwio.shape
    h_out = _conv_out(h_in, kh, stride)
    w_out = _conv_out(w_in, kw, stride)

    # Weight folded over (kw, cin):  (kh, w_in*cin, w_out*cout)
    m = np.zeros((kh, w_in * cin, w_out * cout), np.float32)
    for di in range(kh):
        for wo in range(w_out):
            for dj in range(kw):
                col = stride * wo + dj
                m[di, col * cin:(col + 1) * cin,
                  wo * cout:(wo + 1) * cout] = w_hwio[di, dj]

    # 0/1 row selection, block-diagonal over the batch tile:
    # picks source row (n*h_in + stride*ho + di) for output row (n*h_out + ho).
    r = np.zeros((kh, batch_tile * h_out, batch_tile * h_in), np.float32)
    for di in range(kh):
        for n in range(batch_tile):
            for ho in range(h_out):
                r[di, n * h_out + ho, n * h_in + stride * ho + di] = 1.0

    b_tiled = np.tile(b, w_out).reshape(1, w_out * cout)
    return (jnp.asarray(r), jnp.asarray(m), jnp.asarray(b_tiled), h_out, w_out)


# ----------------------------------------------------------------------------
# The single fused Pallas kernel: conv1..conv3 + flatten + fc1 + fc2.
# Everything is 2-D matmul / add / relu on VMEM-resident operands; only the
# final (batch_tile, 1) value is stored to HBM.
# ----------------------------------------------------------------------------
def _pong_critic_kernel(x_ref,
                        r1_ref, m1_ref, b1_ref,
                        r2_ref, m2_ref, b2_ref,
                        r3_ref, m3_ref, b3_ref,
                        w4_ref, b4_ref, w5_ref, b5_ref,
                        o_ref):
    def conv_relu(x, r_ref, m_ref, b_ref):
        acc = None
        for di in range(r_ref.shape[0]):          # static unroll over kernel rows
            rows = jnp.dot(r_ref[di], x, preferred_element_type=jnp.float32)
            part = jnp.dot(rows, m_ref[di], preferred_element_type=jnp.float32)
            acc = part if acc is None else acc + part
        return jnp.maximum(acc + b_ref[...], 0.0)

    a1 = conv_relu(x_ref[...], r1_ref, m1_ref, b1_ref)   # (TB*H1, W1*32)
    a2 = conv_relu(a1, r2_ref, m2_ref, b2_ref)           # (TB*H2, W2*64)
    a3 = conv_relu(a2, r3_ref, m3_ref, b3_ref)           # (TB*H3, W3*64)

    tb = o_ref.shape[0]
    # NHWC flatten.  For the 36x36 frame H3 == 1 so this is already (TB, feat).
    feats = a3 if a3.shape[0] == tb else a3.reshape(tb, -1)

    h = jnp.maximum(
        jnp.dot(feats, w4_ref[...], preferred_element_type=jnp.float32) + b4_ref[...],
        0.0)
    val = jnp.dot(h, w5_ref[...], preferred_element_type=jnp.float32) + b5_ref[...]
    o_ref[...] = val.astype(o_ref.dtype)          # only narrow store in the net


# ----------------------------------------------------------------------------
# Builder: folds params once, returns a jitted forward(observation_nchw).
# ----------------------------------------------------------------------------
def make_pong_critic_forward(params, frame, hidden_size, batch_tile=8):
    c_in, h0, w0 = frame
    r1, m1, b1, h1, w1 = _fold_conv(params["conv1_w"], params["conv1_b"], h0, w0, 4, batch_tile)
    r2, m2, b2, h2, w2 = _fold_conv(params["conv2_w"], params["conv2_b"], h1, w1, 2, batch_tile)
    r3, m3, b3, h3, w3 = _fold_conv(params["conv3_w"], params["conv3_b"], h2, w2, 1, batch_tile)
    feature_size = h3 * w3 * 64
    assert params["fc1_w"].shape == (feature_size, hidden_size)

    w4 = jnp.asarray(params["fc1_w"], jnp.float32)
    b4 = jnp.asarray(params["fc1_b"], jnp.float32).reshape(1, hidden_size)
    w5 = jnp.asarray(params["fc2_w"], jnp.float32)
    b5 = jnp.asarray(params["fc2_b"], jnp.float32).reshape(1, 1)

    consts = (r1, m1, b1, r2, m2, b2, r3, m3, b3, w4, b4, w5, b5)
    const_bytes = sum(int(np.prod(c.shape)) * 4 for c in consts)

    def _per_tile_flops():
        f = 0
        for (r, m) in ((r1, m1), (r2, m2), (r3, m3)):
            kh, rows_out, rows_in = r.shape
            cols_in, cols_out = m.shape[1], m.shape[2]
            f += kh * 2 * rows_out * rows_in * cols_in      # R[di] @ x
            f += kh * 2 * rows_out * cols_in * cols_out     # (.) @ M[di]
        f += 2 * batch_tile * feature_size * hidden_size     # fc1
        f += 2 * batch_tile * hidden_size                    # fc2
        return f

    tb = batch_tile
    blk_x = (tb * h0, w0 * c_in)

    def _const_spec(arr):
        nd = arr.ndim
        # Full-array block with a constant index map -> DMA'd once, resident.
        return pl.BlockSpec(tuple(arr.shape), lambda i, _nd=nd: (0,) * _nd)

    @jax.jit
    def forward(observation_nchw):
        obs = observation_nchw
        if obs.ndim == 3:
            obs = obs[None]                       # unsqueeze(0), like torch
        n = obs.shape[0]

        # NCHW -> NHWC -> (N*H, W*C) 2-D layout expected by the kernel.
        x = jnp.transpose(obs, (0, 2, 3, 1)).astype(jnp.float32)
        x2 = x.reshape(n * h0, w0 * c_in)

        n_pad = -(-n // tb) * tb
        if n_pad != n:
            x2 = jnp.concatenate(
                [x2, jnp.zeros(((n_pad - n) * h0, w0 * c_in), jnp.float32)], axis=0)
        grid_n = n_pad // tb
        if grid_n > 1:
            # keeps every block's sublane dim a multiple of 8 when gridded
            assert tb % 8 == 0, "use batch_tile % 8 == 0 for batches > batch_tile"

        cost = pl.CostEstimate(
            flops=int(grid_n * _per_tile_flops()),
            transcendentals=0,
            bytes_accessed=int(x2.size * 4 + n_pad * 4 + const_bytes))

        out = pl.pallas_call(
            _pong_critic_kernel,
            out_shape=jax.ShapeDtypeStruct((n_pad, 1), jnp.float32),
            grid=(grid_n,),
            in_specs=[pl.BlockSpec(blk_x, lambda i: (i, 0))]
                     + [_const_spec(c) for c in consts],
            out_specs=pl.BlockSpec((tb, 1), lambda i: (i, 0)),
            compiler_params=pltpu.CompilerParams(
                dimension_semantics=("parallel",),      # shard tiles over v7x's 2 TCs
                vmem_limit_bytes=32 * 1024 * 1024),     # safe on v5e/v6e/v7x
            cost_estimate=cost,
        )(x2, *consts)
        return out[:n]                                   # drop batch padding

    return forward


# ----------------------------------------------------------------------------
# Parameter init (synthetic, deterministic).  Shapes follow the nn.Module.
# fc1_w rows are in NHWC-flatten order (h, w, c); loading a torch checkpoint
# would need a one-time row permutation from NCHW order (identical numerics).
# ----------------------------------------------------------------------------
def init_params(frame, hidden_size, key):
    c_in, h, w = frame
    h1, w1 = _conv_out(h, 8, 4), _conv_out(w, 8, 4)
    h2, w2 = _conv_out(h1, 4, 2), _conv_out(w1, 4, 2)
    h3, w3 = _conv_out(h2, 3, 1), _conv_out(w2, 3, 1)
    feature_size = 64 * h3 * w3

    ks = jax.random.split(key, 10)
    scale = 0.05
    return {
        "conv1_w": scale * jax.random.normal(ks[0], (8, 8, c_in, 32), jnp.float32),
        "conv1_b": scale * jax.random.normal(ks[1], (1, 32), jnp.float32),
        "conv2_w": scale * jax.random.normal(ks[2], (4, 4, 32, 64), jnp.float32),
        "conv2_b": scale * jax.random.normal(ks[3], (1, 64), jnp.float32),
        "conv3_w": scale * jax.random.normal(ks[4], (3, 3, 64, 64), jnp.float32),
        "conv3_b": scale * jax.random.normal(ks[5], (1, 64), jnp.float32),
        "fc1_w": scale * jax.random.normal(ks[6], (feature_size, hidden_size), jnp.float32),
        "fc1_b": scale * jax.random.normal(ks[7], (1, hidden_size), jnp.float32),
        "fc2_w": scale * jax.random.normal(ks[8], (hidden_size, 1), jnp.float32),
        "fc2_b": scale * jax.random.normal(ks[9], (1, 1), jnp.float32),
    }


# ----------------------------------------------------------------------------
# Plain-JAX reference (same parameterization) for a sanity check.
# ----------------------------------------------------------------------------
def reference_forward(params, obs):
    x = obs.astype(jnp.float32)
    if x.ndim == 3:
        x = x[None]
    hi = jax.lax.Precision.HIGHEST

    def conv(x, w, b, s):
        y = jax.lax.conv_general_dilated(
            x, jnp.asarray(w, jnp.float32), (s, s), "VALID",
            dimension_numbers=("NCHW", "HWIO", "NCHW"), precision=hi)
        return jnp.maximum(y + jnp.asarray(b, jnp.float32).reshape(1, -1, 1, 1), 0.0)

    x = conv(x, params["conv1_w"], params["conv1_b"], 4)
    x = conv(x, params["conv2_w"], params["conv2_b"], 2)
    x = conv(x, params["conv3_w"], params["conv3_b"], 1)
    feats = jnp.transpose(x, (0, 2, 3, 1)).reshape(x.shape[0], -1)  # NHWC flatten
    h = jnp.maximum(jnp.dot(feats, params["fc1_w"], precision=hi) + params["fc1_b"], 0.0)
    return jnp.dot(h, params["fc2_w"], precision=hi) + params["fc2_b"]


if __name__ == "__main__":
    # Small shapes consistent with the module: frame = (4, 36, 36)
    #   conv1: 36 -> 8, conv2: 8 -> 3, conv3: 3 -> 1  => feature_size = 64
    frame = (4, 36, 36)
    hidden_size = 32
    batch = 2

    key = jax.random.PRNGKey(0)
    k_param, k_obs = jax.random.split(key)
    params = init_params(frame, hidden_size, k_param)
    obs = jax.random.normal(k_obs, (batch, *frame), jnp.float32)   # NCHW, like PyTorch

    forward = make_pong_critic_forward(params, frame, hidden_size, batch_tile=batch)
    out = jax.block_until_ready(forward(obs))
    assert out.shape == (batch, 1), out.shape

    # Sanity check against the plain-XLA reference.
    ref = jax.block_until_ready(reference_forward(params, obs))
    if not bool(jnp.allclose(out, ref, atol=5e-3, rtol=1e-2)):
        raise AssertionError("fused Pallas forward mismatch vs XLA reference")

    print("KERNEL_OK")
</pallas_src>

<mosaic_0001>
module attributes {stable_mosaic.version = 11 : i64} {
  func.func @_pong_critic_kernel(%arg0: i32, %arg1: memref<72x144xf32, #tpu.memory_space<vmem>>, %arg2: memref<8x16x72xf32, #tpu.memory_space<vmem>>, %arg3: memref<8x144x256xf32, #tpu.memory_space<vmem>>, %arg4: memref<1x256xf32, #tpu.memory_space<vmem>>, %arg5: memref<4x6x16xf32, #tpu.memory_space<vmem>>, %arg6: memref<4x256x192xf32, #tpu.memory_space<vmem>>, %arg7: memref<1x192xf32, #tpu.memory_space<vmem>>, %arg8: memref<3x2x6xf32, #tpu.memory_space<vmem>>, %arg9: memref<3x192x64xf32, #tpu.memory_space<vmem>>, %arg10: memref<1x64xf32, #tpu.memory_space<vmem>>, %arg11: memref<64x32xf32, #tpu.memory_space<vmem>>, %arg12: memref<1x32xf32, #tpu.memory_space<vmem>>, %arg13: memref<32x1xf32, #tpu.memory_space<vmem>>, %arg14: memref<1x1xf32, #tpu.memory_space<vmem>>, %arg15: memref<2x1xf32, #tpu.memory_space<vmem>>) attributes {dimension_semantics = [#tpu.dimension_semantics<parallel>], iteration_bounds = array<i64: 1>, scalar_prefetch = 0 : i64, scratch_operands = 0 : i64, tpu.core_type = #tpu.core_type<tc>, window_params = [{transform_indices = @transform_0, window_bounds = array<i64: 72, 144>}, {pipeline_mode = #tpu.pipeline_mode<synchronous>, transform_indices = @transform_1, window_bounds = array<i64: 8, 16, 72>}, {pipeline_mode = #tpu.pipeline_mode<synchronous>, transform_indices = @transform_2, window_bounds = array<i64: 8, 144, 256>}, {pipeline_mode = #tpu.pipeline_mode<synchronous>, transform_indices = @transform_3, window_bounds = array<i64: 1, 256>}, {pipeline_mode = #tpu.pipeline_mode<synchronous>, transform_indices = @transform_4, window_bounds = array<i64: 4, 6, 16>}, {pipeline_mode = #tpu.pipeline_mode<synchronous>, transform_indices = @transform_5, window_bounds = array<i64: 4, 256, 192>}, {pipeline_mode = #tpu.pipeline_mode<synchronous>, transform_indices = @transform_6, window_bounds = array<i64: 1, 192>}, {pipeline_mode = #tpu.pipeline_mode<synchronous>, transform_indices = @transform_7, window_bounds = array<i64: 3, 2, 6>}, {pipeline_mode = #tpu.pipeline_mode<synchronous>, transform_indices = @transform_8, window_bounds = array<i64: 3, 192, 64>}, {pipeline_mode = #tpu.pipeline_mode<synchronous>, transform_indices = @transform_9, window_bounds = array<i64: 1, 64>}, {pipeline_mode = #tpu.pipeline_mode<synchronous>, transform_indices = @transform_10, window_bounds = array<i64: 64, 32>}, {pipeline_mode = #tpu.pipeline_mode<synchronous>, transform_indices = @transform_11, window_bounds = array<i64: 1, 32>}, {pipeline_mode = #tpu.pipeline_mode<synchronous>, transform_indices = @transform_12, window_bounds = array<i64: 32, 1>}, {pipeline_mode = #tpu.pipeline_mode<synchronous>, transform_indices = @transform_13, window_bounds = array<i64: 1, 1>}, {transform_indices = @transform_14, window_bounds = array<i64: 2, 1>}]} {
    %c0 = arith.constant 0 : index
    %c0_0 = arith.constant 0 : index
    %0 = vector.load %arg1[%c0, %c0_0] : memref<72x144xf32, #tpu.memory_space<vmem>>, vector<72x144xf32>
    %c0_1 = arith.constant 0 : index
    %c0_2 = arith.constant 0 : index
    %c0_3 = arith.constant 0 : index
    %1 = vector.load %arg2[%c0_1, %c0_2, %c0_3] : memref<8x16x72xf32, #tpu.memory_space<vmem>>, vector<1x16x72xf32>
    %2 = vector.shape_cast %1 : vector<1x16x72xf32> to vector<16x72xf32>
    %cst = arith.constant dense<0.000000e+00> : vector<16x144xf32>
    %3 = tpu.matmul %2, %0, %cst {dimension_numbers = #tpu.dot_dimension_numbers<[1], [0], [0], [1], [0, 0, 1, 1], [], []>} : vector<16x72xf32>, vector<72x144xf32>, vector<16x144xf32> -> vector<16x144xf32>
    %c0_4 = arith.constant 0 : index
    %c0_5 = arith.constant 0 : index
    %c0_6 = arith.constant 0 : index
    %4 = vector.load %arg3[%c0_4, %c0_5, %c0_6] : memref<8x144x256xf32, #tpu.memory_space<vmem>>, vector<1x144x256xf32>
    %5 = vector.shape_cast %4 : vector<1x144x256xf32> to vector<144x256xf32>
    %cst_7 = arith.constant dense<0.000000e+00> : vector<16x256xf32>
    %6 = tpu.matmul %3, %5, %cst_7 {dimension_numbers = #tpu.dot_dimension_numbers<[1], [0], [0], [1], [0, 0, 1, 1], [], []>} : vector<16x144xf32>, vector<144x256xf32>, vector<16x256xf32> -> vector<16x256xf32>
    %c1 = arith.constant 1 : index
    %c0_8 = arith.constant 0 : index
    %c0_9 = arith.constant 0 : index
    %7 = vector.load %arg2[%c1, %c0_8, %c0_9] : memref<8x16x72xf32, #tpu.memory_space<vmem>>, vector<1x16x72xf32>
    %8 = vector.shape_cast %7 : vector<1x16x72xf32> to vector<16x72xf32>
    %cst_10 = arith.constant dense<0.000000e+00> : vector<16x144xf32>
    %9 = tpu.matmul %8, %0, %cst_10 {dimension_numbers = #tpu.dot_dimension_numbers<[1], [0], [0], [1], [0, 0, 1, 1], [], []>} : vector<16x72xf32>, vector<72x144xf32>, vector<16x144xf32> -> vector<16x144xf32>
    %c1_11 = arith.constant 1 : index
    %c0_12 = arith.constant 0 : index
    %c0_13 = arith.constant 0 : index
    %10 = vector.load %arg3[%c1_11, %c0_12, %c0_13] : memref<8x144x256xf32, #tpu.memory_space<vmem>>, vector<1x144x256xf32>
    %11 = vector.shape_cast %10 : vector<1x144x256xf32> to vector<144x256xf32>
    %cst_14 = arith.constant dense<0.000000e+00> : vector<16x256xf32>
    %12 = tpu.matmul %9, %11, %cst_14 {dimension_numbers = #tpu.dot_dimension_numbers<[1], [0], [0], [1], [0, 0, 1, 1], [], []>} : vector<16x144xf32>, vector<144x256xf32>, vector<16x256xf32> -> vector<16x256xf32>
    %13 = arith.addf %6, %12 : vector<16x256xf32>
    %c2 = arith.constant 2 : index
    %c0_15 = arith.constant 0 : index
    %c0_16 = arith.constant 0 : index
    %14 = vector.load %arg2[%c2, %c0_15, %c0_16] : memref<8x16x72xf32, #tpu.memory_space<vmem>>, vector<1x16x72xf32>
    %15 = vector.shape_cast %14 : vector<1x16x72xf32> to vector<16x72xf32>
    %cst_17 = arith.constant dense<0.000000e+00> : vector<16x144xf32>
    %16 = tpu.matmul %15, %0, %cst_17 {dimension_numbers = #tpu.dot_dimension_numbers<[1], [0], [0], [1], [0, 0, 1, 1], [], []>} : vector<16x72xf32>, vector<72x144xf32>, vector<16x144xf32> -> vector<16x144xf32>
    %c2_18 = arith.constant 2 : index
    %c0_19 = arith.constant 0 : index
    %c0_20 = arith.constant 0 : index
    %17 = vector.load %arg3[%c2_18, %c0_19, %c0_20] : memref<8x144x256xf32, #tpu.memory_space<vmem>>, vector<1x144x256xf32>
    %18 = vector.shape_cast %17 : vector<1x144x256xf32> to vector<144x256xf32>
    %cst_21 = arith.constant dense<0.000000e+00> : vector<16x256xf32>
    %19 = tpu.matmul %16, %18, %cst_21 {dimension_numbers = #tpu.dot_dimension_numbers<[1], [0], [0], [1], [0, 0, 1, 1], [], []>} : vector<16x144xf32>, vector<144x256xf32>, vector<16x256xf32> -> vector<16x256xf32>
    %20 = arith.addf %13, %19 : vector<16x256xf32>
    %c3 = arith.constant 3 : index
    %c0_22 = arith.constant 0 : index
    %c0_23 = arith.constant 0 : index
    %21 = vector.load %arg2[%c3, %c0_22, %c0_23] : memref<8x16x72xf32, #tpu.memory_space<vmem>>, vector<1x16x72xf32>
    %22 = vector.shape_cast %21 : vector<1x16x72xf32> to vector<16x72xf32>
    %cst_24 = arith.constant dense<0.000000e+00> : vector<16x144xf32>
    %23 = tpu.matmul %22, %0, %cst_24 {dimension_numbers = #tpu.dot_dimension_numbers<[1], [0], [0], [1], [0, 0, 1, 1], [], []>} : vector<16x72xf32>, vector<72x144xf32>, vector<16x144xf32> -> vector<16x144xf32>
    %c3_25 = arith.constant 3 : index
    %c0_26 = arith.constant 0 : index
    %c0_27 = arith.constant 0 : index
    %24 = vector.load %arg3[%c3_25, %c0_26, %c0_27] : memref<8x144x256xf32, #tpu.memory_space<vmem>>, vector<1x144x256xf32>
    %25 = vector.shape_cast %24 : vector<1x144x256xf32> to vector<144x256xf32>
    %cst_28 = arith.constant dense<0.000000e+00> : vector<16x256xf32>
    %26 = tpu.matmul %23, %25, %cst_28 {dimension_numbers = #tpu.dot_dimension_numbers<[1], [0], [0], [1], [0, 0, 1, 1], [], []>} : vector<16x144xf32>, vector<144x256xf32>, vector<16x256xf32> -> vector<16x256xf32>
    %27 = arith.addf %20, %26 : vector<16x256xf32>
    %c4 = arith.constant 4 : index
    %c0_29 = arith.constant 0 : index
    %c0_30 = arith.constant 0 : index
    %28 = vector.load %arg2[%c4, %c0_29, %c0_30] : memref<8x16x72xf32, #tpu.memory_space<vmem>>, vector<1x16x72xf32>
    %29 = vector.shape_cast %28 : vector<1x16x72xf32> to vector<16x72xf32>
    %cst_31 = arith.constant dense<0.000000e+00> : vector<16x144xf32>
    %30 = tpu.matmul %29, %0, %cst_31 {dimension_numbers = #tpu.dot_dimension_numbers<[1], [0], [0], [1], [0, 0, 1, 1], [], []>} : vector<16x72xf32>, vector<72x144xf32>, vector<16x144xf32> -> vector<16x144xf32>
    %c4_32 = arith.constant 4 : index
    %c0_33 = arith.constant 0 : index
    %c0_34 = arith.constant 0 : index
    %31 = vector.load %arg3[%c4_32, %c0_33, %c0_34] : memref<8x144x256xf32, #tpu.memory_space<vmem>>, vector<1x144x256xf32>
    %32 = vector.shape_cast %31 : vector<1x144x256xf32> to vector<144x256xf32>
    %cst_35 = arith.constant dense<0.000000e+00> : vector<16x256xf32>
    %33 = tpu.matmul %30, %32, %cst_35 {dimension_numbers = #tpu.dot_dimension_numbers<[1], [0], [0], [1], [0, 0, 1, 1], [], []>} : vector<16x144xf32>, vector<144x256xf32>, vector<16x256xf32> -> vector<16x256xf32>
    %34 = arith.addf %27, %33 : vector<16x256xf32>
    %c5 = arith.constant 5 : index
    %c0_36 = arith.constant 0 : index
    %c0_37 = arith.constant 0 : index
    %35 = vector.load %arg2[%c5, %c0_36, %c0_37] : memref<8x16x72xf32, #tpu.memory_space<vmem>>, vector<1x16x72xf32>
    %36 = vector.shape_cast %35 : vector<1x16x72xf32> to vector<16x72xf32>
    %cst_38 = arith.constant dense<0.000000e+00> : vector<16x144xf32>
    %37 = tpu.matmul %36, %0, %cst_38 {dimension_numbers = #tpu.dot_dimension_numbers<[1], [0], [0], [1], [0, 0, 1, 1], [], []>} : vector<16x72xf32>, vector<72x144xf32>, vector<16x144xf32> -> vector<16x144xf32>
    %c5_39 = arith.constant 5 : index
    %c0_40 = arith.constant 0 : index
    %c0_41 = arith.constant 0 : index
    %38 = vector.load %arg3[%c5_39, %c0_40, %c0_41] : memref<8x144x256xf32, #tpu.memory_space<vmem>>, vector<1x144x256xf32>
    %39 = vector.shape_cast %38 : vector<1x144x256xf32> to vector<144x256xf32>
    %cst_42 = arith.constant dense<0.000000e+00> : vector<16x256xf32>
    %40 = tpu.matmul %37, %39, %cst_42 {dimension_numbers = #tpu.dot_dimension_numbers<[1], [0], [0], [1], [0, 0, 1, 1], [], []>} : vector<16x144xf32>, vector<144x256xf32>, vector<16x256xf32> -> vector<16x256xf32>
    %41 = arith.addf %34, %40 : vector<16x256xf32>
    %c6 = arith.constant 6 : index
    %c0_43 = arith.constant 0 : index
    %c0_44 = arith.constant 0 : index
    %42 = vector.load %arg2[%c6, %c0_43, %c0_44] : memref<8x16x72xf32, #tpu.memory_space<vmem>>, vector<1x16x72xf32>
    %43 = vector.shape_cast %42 : vector<1x16x72xf32> to vector<16x72xf32>
    %cst_45 = arith.constant dense<0.000000e+00> : vector<16x144xf32>
    %44 = tpu.matmul %43, %0, %cst_45 {dimension_numbers = #tpu.dot_dimension_numbers<[1], [0], [0], [1], [0, 0, 1, 1], [], []>} : vector<16x72xf32>, vector<72x144xf32>, vector<16x144xf32> -> vector<16x144xf32>
    %c6_46 = arith.constant 6 : index
    %c0_47 = arith.constant 0 : index
    %c0_48 = arith.constant 0 : index
    %45 = vector.load %arg3[%c6_46, %c0_47, %c0_48] : memref<8x144x256xf32, #tpu.memory_space<vmem>>, vector<1x144x256xf32>
    %46 = vector.shape_cast %45 : vector<1x144x256xf32> to vector<144x256xf32>
    %cst_49 = arith.constant dense<0.000000e+00> : vector<16x256xf32>
    %47 = tpu.matmul %44, %46, %cst_49 {dimension_numbers = #tpu.dot_dimension_numbers<[1], [0], [0], [1], [0, 0, 1, 1], [], []>} : vector<16x144xf32>, vector<144x256xf32>, vector<16x256xf32> -> vector<16x256xf32>
    %48 = arith.addf %41, %47 : vector<16x256xf32>
    %c7 = arith.constant 7 : index
    %c0_50 = arith.constant 0 : index
    %c0_51 = arith.constant 0 : index
    %49 = vector.load %arg2[%c7, %c0_50, %c0_51] : memref<8x16x72xf32, #tpu.memory_space<vmem>>, vector<1x16x72xf32>
    %50 = vector.shape_cast %49 : vector<1x16x72xf32> to vector<16x72xf32>
    %cst_52 = arith.constant dense<0.000000e+00> : vector<16x144xf32>
    %51 = tpu.matmul %50, %0, %cst_52 {dimension_numbers = #tpu.dot_dimension_numbers<[1], [0], [0], [1], [0, 0, 1, 1], [], []>} : vector<16x72xf32>, vector<72x144xf32>, vector<16x144xf32> -> vector<16x144xf32>
    %c7_53 = arith.constant 7 : index
    %c0_54 = arith.constant 0 : index
    %c0_55 = arith.constant 0 : index
    %52 = vector.load %arg3[%c7_53, %c0_54, %c0_55] : memref<8x144x256xf32, #tpu.memory_space<vmem>>, vector<1x144x256xf32>
    %53 = vector.shape_cast %52 : vector<1x144x256xf32> to vector<144x256xf32>
    %cst_56 = arith.constant dense<0.000000e+00> : vector<16x256xf32>
    %54 = tpu.matmul %51, %53, %cst_56 {dimension_numbers = #tpu.dot_dimension_numbers<[1], [0], [0], [1], [0, 0, 1, 1], [], []>} : vector<16x144xf32>, vector<144x256xf32>, vector<16x256xf32> -> vector<16x256xf32>
    %55 = arith.addf %48, %54 : vector<16x256xf32>
    %c0_57 = arith.constant 0 : index
    %c0_58 = arith.constant 0 : index
    %56 = vector.load %arg4[%c0_57, %c0_58] : memref<1x256xf32, #tpu.memory_space<vmem>>, vector<1x256xf32>
    %57 = vector.broadcast %56 : vector<1x256xf32> to vector<16x256xf32>
    %58 = arith.addf %55, %57 : vector<16x256xf32>
    %cst_59 = arith.constant 0.000000e+00 : f32
    %59 = vector.broadcast %cst_59 : f32 to vector<16x256xf32>
    %60 = arith.maximumf %58, %59 : vector<16x256xf32>
    %c0_60 = arith.constant 0 : index
    %c0_61 = arith.constant 0 : index
    %c0_62 = arith.constant 0 : index
    %61 = vector.load %arg5[%c0_60, %c0_61, %c0_62] : memref<4x6x16xf32, #tpu.memory_space<vmem>>, vector<1x6x16xf32>
    %62 = vector.shape_cast %61 : vector<1x6x16xf32> to vector<6x16xf32>
    %cst_63 = arith.constant dense<0.000000e+00> : vector<6x256xf32>
    %63 = tpu.matmul %62, %60, %cst_63 {dimension_numbers = #tpu.dot_dimension_numbers<[1], [0], [0], [1], [0, 0, 1, 1], [], []>} : vector<6x16xf32>, vector<16x256xf32>, vector<6x256xf32> -> vector<6x256xf32>
    %c0_64 = arith.constant 0 : index
    %c0_65 = arith.constant 0 : index
    %c0_66 = arith.constant 0 : index
    %64 = vector.load %arg6[%c0_64, %c0_65, %c0_66] : memref<4x256x192xf32, #tpu.memory_space<vmem>>, vector<1x256x192xf32>
    %65 = vector.shape_cast %64 : vector<1x256x192xf32> to vector<256x192xf32>
    %cst_67 = arith.constant dense<0.000000e+00> : vector<6x192xf32>
    %66 = tpu.matmul %63, %65, %cst_67 {dimension_numbers = #tpu.dot_dimension_numbers<[1], [0], [0], [1], [0, 0, 1, 1], [], []>} : vector<6x256xf32>, vector<256x192xf32>, vector<6x192xf32> -> vector<6x192xf32>
    %c1_68 = arith.constant 1 : index
    %c0_69 = arith.constant 0 : index
    %c0_70 = arith.constant 0 : index
    %67 = vector.load %arg5[%c1_68, %c0_69, %c0_70] : memref<4x6x16xf32, #tpu.memory_space<vmem>>, vector<1x6x16xf32>
    %68 = vector.shape_cast %67 : vector<1x6x16xf32> to vector<6x16xf32>
    %cst_71 = arith.constant dense<0.000000e+00> : vector<6x256xf32>
    %69 = tpu.matmul %68, %60, %cst_71 {dimension_numbers = #tpu.dot_dimension_numbers<[1], [0], [0], [1], [0, 0, 1, 1], [], []>} : vector<6x16xf32>, vector<16x256xf32>, vector<6x256xf32> -> vector<6x256xf32>
    %c1_72 = arith.constant 1 : index
    %c0_73 = arith.constant 0 : index
    %c0_74 = arith.constant 0 : index
    %70 = vector.load %arg6[%c1_72, %c0_73, %c0_74] : memref<4x256x192xf32, #tpu.memory_space<vmem>>, vector<1x256x192xf32>
    %71 = vector.shape_cast %70 : vector<1x256x192xf32> to vector<256x192xf32>
    %cst_75 = arith.constant dense<0.000000e+00> : vector<6x192xf32>
    %72 = tpu.matmul %69, %71, %cst_75 {dimension_numbers = #tpu.dot_dimension_numbers<[1], [0], [0], [1], [0, 0, 1, 1], [], []>} : vector<6x256xf32>, vector<256x192xf32>, vector<6x192xf32> -> vector<6x192xf32>
    %73 = arith.addf %66, %72 : vector<6x192xf32>
    %c2_76 = arith.constant 2 : index
    %c0_77 = arith.constant 0 : index
    %c0_78 = arith.constant 0 : index
    %74 = vector.load %arg5[%c2_76, %c0_77, %c0_78] : memref<4x6x16xf32, #tpu.memory_space<vmem>>, vector<1x6x16xf32>
    %75 = vector.shape_cast %74 : vector<1x6x16xf32> to vector<6x16xf32>
    %cst_79 = arith.constant dense<0.000000e+00> : vector<6x256xf32>
    %76 = tpu.matmul %75, %60, %cst_79 {dimension_numbers = #tpu.dot_dimension_numbers<[1], [0], [0], [1], [0, 0, 1, 1], [], []>} : vector<6x16xf32>, vector<16x256xf32>, vector<6x256xf32> -> vector<6x256xf32>
    %c2_80 = arith.constant 2 : index
    %c0_81 = arith.constant 0 : index
    %c0_82 = arith.constant 0 : index
    %77 = vector.load %arg6[%c2_80, %c0_81, %c0_82] : memref<4x256x192xf32, #tpu.memory_space<vmem>>, vector<1x256x192xf32>
    %78 = vector.shape_cast %77 : vector<1x256x192xf32> to vector<256x192xf32>
    %cst_83 = arith.constant dense<0.000000e+00> : vector<6x192xf32>
    %79 = tpu.matmul %76, %78, %cst_83 {dimension_numbers = #tpu.dot_dimension_numbers<[1], [0], [0], [1], [0, 0, 1, 1], [], []>} : vector<6x256xf32>, vector<256x192xf32>, vector<6x192xf32> -> vector<6x192xf32>
    %80 = arith.addf %73, %79 : vector<6x192xf32>
    %c3_84 = arith.constant 3 : index
    %c0_85 = arith.constant 0 : index
    %c0_86 = arith.constant 0 : index
    %81 = vector.load %arg5[%c3_84, %c0_85, %c0_86] : memref<4x6x16xf32, #tpu.memory_space<vmem>>, vector<1x6x16xf32>
    %82 = vector.shape_cast %81 : vector<1x6x16xf32> to vector<6x16xf32>
    %cst_87 = arith.constant dense<0.000000e+00> : vector<6x256xf32>
    %83 = tpu.matmul %82, %60, %cst_87 {dimension_numbers = #tpu.dot_dimension_numbers<[1], [0], [0], [1], [0, 0, 1, 1], [], []>} : vector<6x16xf32>, vector<16x256xf32>, vector<6x256xf32> -> vector<6x256xf32>
    %c3_88 = arith.constant 3 : index
    %c0_89 = arith.constant 0 : index
    %c0_90 = arith.constant 0 : index
    %84 = vector.load %arg6[%c3_88, %c0_89, %c0_90] : memref<4x256x192xf32, #tpu.memory_space<vmem>>, vector<1x256x192xf32>
    %85 = vector.shape_cast %84 : vector<1x256x192xf32> to vector<256x192xf32>
    %cst_91 = arith.constant dense<0.000000e+00> : vector<6x192xf32>
    %86 = tpu.matmul %83, %85, %cst_91 {dimension_numbers = #tpu.dot_dimension_numbers<[1], [0], [0], [1], [0, 0, 1, 1], [], []>} : vector<6x256xf32>, vector<256x192xf32>, vector<6x192xf32> -> vector<6x192xf32>
    %87 = arith.addf %80, %86 : vector<6x192xf32>
    %c0_92 = arith.constant 0 : index
    %c0_93 = arith.constant 0 : index
    %88 = vector.load %arg7[%c0_92, %c0_93] : memref<1x192xf32, #tpu.memory_space<vmem>>, vector<1x192xf32>
    %89 = vector.broadcast %88 : vector<1x192xf32> to vector<6x192xf32>
    %90 = arith.addf %87, %89 : vector<6x192xf32>
    %cst_94 = arith.constant 0.000000e+00 : f32
    %91 = vector.broadcast %cst_94 : f32 to vector<6x192xf32>
    %92 = arith.maximumf %90, %91 : vector<6x192xf32>
    %c0_95 = arith.constant 0 : index
    %c0_96 = arith.constant 0 : index
    %c0_97 = arith.constant 0 : index
    %93 = vector.load %arg8[%c0_95, %c0_96, %c0_97] : memref<3x2x6xf32, #tpu.memory_space<vmem>>, vector<1x2x6xf32>
    %94 = vector.shape_cast %93 : vector<1x2x6xf32> to vector<2x6xf32>
    %cst_98 = arith.constant dense<0.000000e+00> : vector<2x192xf32>
    %95 = tpu.matmul %94, %92, %cst_98 {dimension_numbers = #tpu.dot_dimension_numbers<[1], [0], [0], [1], [0, 0, 1, 1], [], []>} : vector<2x6xf32>, vector<6x192xf32>, vector<2x192xf32> -> vector<2x192xf32>
    %c0_99 = arith.constant 0 : index
    %c0_100 = arith.constant 0 : index
    %c0_101 = arith.constant 0 : index
    %96 = vector.load %arg9[%c0_99, %c0_100, %c0_101] : memref<3x192x64xf32, #tpu.memory_space<vmem>>, vector<1x192x64xf32>
    %97 = vector.shape_cast %96 : vector<1x192x64xf32> to vector<192x64xf32>
    %cst_102 = arith.constant dense<0.000000e+00> : vector<2x64xf32>
    %98 = tpu.matmul %95, %97, %cst_102 {dimension_numbers = #tpu.dot_dimension_numbers<[1], [0], [0], [1], [0, 0, 1, 1], [], []>} : vector<2x192xf32>, vector<192x64xf32>, vector<2x64xf32> -> vector<2x64xf32>
    %c1_103 = arith.constant 1 : index
    %c0_104 = arith.constant 0 : index
    %c0_105 = arith.constant 0 : index
    %99 = vector.load %arg8[%c1_103, %c0_104, %c0_105] : memref<3x2x6xf32, #tpu.memory_space<vmem>>, vector<1x2x6xf32>
    %100 = vector.shape_cast %99 : vector<1x2x6xf32> to vector<2x6xf32>
    %cst_106 = arith.constant dense<0.000000e+00> : vector<2x192xf32>
    %101 = tpu.matmul %100, %92, %cst_106 {dimension_numbers = #tpu.dot_dimension_numbers<[1], [0], [0], [1], [0, 0, 1, 1], [], []>} : vector<2x6xf32>, vector<6x192xf32>, vector<2x192xf32> -> vector<2x192xf32>
    %c1_107 = arith.constant 1 : index
    %c0_108 = arith.constant 0 : index
    %c0_109 = arith.constant 0 : index
    %102 = vector.load %arg9[%c1_107, %c0_108, %c0_109] : memref<3x192x64xf32, #tpu.memory_space<vmem>>, vector<1x192x64xf32>
    %103 = vector.shape_cast %102 : vector<1x192x64xf32> to vector<192x64xf32>
    %cst_110 = arith.constant dense<0.000000e+00> : vector<2x64xf32>
    %104 = tpu.matmul %101, %103, %cst_110 {dimension_numbers = #tpu.dot_dimension_numbers<[1], [0], [0], [1], [0, 0, 1, 1], [], []>} : vector<2x192xf32>, vector<192x64xf32>, vector<2x64xf32> -> vector<2x64xf32>
    %105 = arith.addf %98, %104 : vector<2x64xf32>
    %c2_111 = arith.constant 2 : index
    %c0_112 = arith.constant 0 : index
    %c0_113 = arith.constant 0 : index
    %106 = vector.load %arg8[%c2_111, %c0_112, %c0_113] : memref<3x2x6xf32, #tpu.memory_space<vmem>>, vector<1x2x6xf32>
    %107 = vector.shape_cast %106 : vector<1x2x6xf32> to vector<2x6xf32>
    %cst_114 = arith.constant dense<0.000000e+00> : vector<2x192xf32>
    %108 = tpu.matmul %107, %92, %cst_114 {dimension_numbers = #tpu.dot_dimension_numbers<[1], [0], [0], [1], [0, 0, 1, 1], [], []>} : vector<2x6xf32>, vector<6x192xf32>, vector<2x192xf32> -> vector<2x192xf32>
    %c2_115 = arith.constant 2 : index
    %c0_116 = arith.constant 0 : index
    %c0_117 = arith.constant 0 : index
    %109 = vector.load %arg9[%c2_115, %c0_116, %c0_117] : memref<3x192x64xf32, #tpu.memory_space<vmem>>, vector<1x192x64xf32>
    %110 = vector.shape_cast %109 : vector<1x192x64xf32> to vector<192x64xf32>
    %cst_118 = arith.constant dense<0.000000e+00> : vector<2x64xf32>
    %111 = tpu.matmul %108, %110, %cst_118 {dimension_numbers = #tpu.dot_dimension_numbers<[1], [0], [0], [1], [0, 0, 1, 1], [], []>} : vector<2x192xf32>, vector<192x64xf32>, vector<2x64xf32> -> vector<2x64xf32>
    %112 = arith.addf %105, %111 : vector<2x64xf32>
    %c0_119 = arith.constant 0 : index
    %c0_120 = arith.constant 0 : index
    %113 = vector.load %arg10[%c0_119, %c0_120] : memref<1x64xf32, #tpu.memory_space<vmem>>, vector<1x64xf32>
    %114 = vector.broadcast %113 : vector<1x64xf32> to vector<2x64xf32>
    %115 = arith.addf %112, %114 : vector<2x64xf32>
    %cst_121 = arith.constant 0.000000e+00 : f32
    %116 = vector.broadcast %cst_121 : f32 to vector<2x64xf32>
    %117 = arith.maximumf %115, %116 : vector<2x64xf32>
    %c0_122 = arith.constant 0 : index
    %c0_123 = arith.constant 0 : index
    %118 = vector.load %arg11[%c0_122, %c0_123] : memref<64x32xf32, #tpu.memory_space<vmem>>, vector<64x32xf32>
    %cst_124 = arith.constant dense<0.000000e+00> : vector<2x32xf32>
    %119 = tpu.matmul %117, %118, %cst_124 {dimension_numbers = #tpu.dot_dimension_numbers<[1], [0], [0], [1], [0, 0, 1, 1], [], []>} : vector<2x64xf32>, vector<64x32xf32>, vector<2x32xf32> -> vector<2x32xf32>
    %c0_125 = arith.constant 0 : index
    %c0_126 = arith.constant 0 : index
    %120 = vector.load %arg12[%c0_125, %c0_126] : memref<1x32xf32, #tpu.memory_space<vmem>>, vector<1x32xf32>
    %121 = vector.broadcast %120 : vector<1x32xf32> to vector<2x32xf32>
    %122 = arith.addf %119, %121 : vector<2x32xf32>
    %cst_127 = arith.constant 0.000000e+00 : f32
    %123 = vector.broadcast %cst_127 : f32 to vector<2x32xf32>
    %124 = arith.maximumf %122, %123 : vector<2x32xf32>
    %c0_128 = arith.constant 0 : index
    %c0_129 = arith.constant 0 : index
    %125 = vector.load %arg13[%c0_128, %c0_129] : memref<32x1xf32, #tpu.memory_space<vmem>>, vector<32x1xf32>
    %cst_130 = arith.constant dense<0.000000e+00> : vector<2x1xf32>
    %126 = tpu.matmul %124, %125, %cst_130 {dimension_numbers = #tpu.dot_dimension_numbers<[1], [0], [0], [1], [0, 0, 1, 1], [], []>} : vector<2x32xf32>, vector<32x1xf32>, vector<2x1xf32> -> vector<2x1xf32>
    %c0_131 = arith.constant 0 : index
    %c0_132 = arith.constant 0 : index
    %127 = vector.load %arg14[%c0_131, %c0_132] : memref<1x1xf32, #tpu.memory_space<vmem>>, vector<1x1xf32>
    %128 = vector.broadcast %127 : vector<1x1xf32> to vector<2x1xf32>
    %129 = arith.addf %126, %128 : vector<2x1xf32>
    %c0_133 = arith.constant 0 : index
    %c0_134 = arith.constant 0 : index
    %130 = vector.load %arg15[%c0_133, %c0_134] : memref<2x1xf32, #tpu.memory_space<vmem>>, vector<2x1xf32>
    tpu.vector_store %arg15[%c0_133, %c0_134], %129 {strides = array<i32>} : memref<2x1xf32, #tpu.memory_space<vmem>>, vector<2x1xf32>,
    return
  }
  func.func @transform_0(%arg0: i32) -> (i32, i32) {
    %c0_i32 = arith.constant 0 : i32
    %c0_i32_0 = arith.constant 0 : i32
    return %arg0, %c0_i32 : i32, i32
  }
  func.func @transform_1(%arg0: i32) -> (i32, i32, i32) {
    %c0_i32 = arith.constant 0 : i32
    %c0_i32_0 = arith.constant 0 : i32
    %c0_i32_1 = arith.constant 0 : i32
    %c0_i32_2 = arith.constant 0 : i32
    return %c0_i32, %c0_i32_0, %c0_i32_1 : i32, i32, i32
  }
  func.func @transform_2(%arg0: i32) -> (i32, i32, i32) {
    %c0_i32 = arith.constant 0 : i32
    %c0_i32_0 = arith.constant 0 : i32
    %c0_i32_1 = arith.constant 0 : i32
    %c0_i32_2 = arith.constant 0 : i32
    return %c0_i32, %c0_i32_0, %c0_i32_1 : i32, i32, i32
  }
  func.func @transform_3(%arg0: i32) -> (i32, i32) {
    %c0_i32 = arith.constant 0 : i32
    %c0_i32_0 = arith.constant 0 : i32
    %c0_i32_1 = arith.constant 0 : i32
    return %c0_i32, %c0_i32_0 : i32, i32
  }
  func.func @transform_4(%arg0: i32) -> (i32, i32, i32) {
    %c0_i32 = arith.constant 0 : i32
    %c0_i32_0 = arith.constant 0 : i32
    %c0_i32_1 = arith.constant 0 : i32
    %c0_i32_2 = arith.constant 0 : i32
    return %c0_i32, %c0_i32_0, %c0_i32_1 : i32, i32, i32
  }
  func.func @transform_5(%arg0: i32) -> (i32, i32, i32) {
    %c0_i32 = arith.constant 0 : i32
    %c0_i32_0 = arith.constant 0 : i32
    %c0_i32_1 = arith.constant 0 : i32
    %c0_i32_2 = arith.constant 0 : i32
    return %c0_i32, %c0_i32_0, %c0_i32_1 : i32, i32, i32
  }
  func.func @transform_6(%arg0: i32) -> (i32, i32) {
    %c0_i32 = arith.constant 0 : i32
    %c0_i32_0 = arith.constant 0 : i32
    %c0_i32_1 = arith.constant 0 : i32
    return %c0_i32, %c0_i32_0 : i32, i32
  }
  func.func @transform_7(%arg0: i32) -> (i32, i32, i32) {
    %c0_i32 = arith.constant 0 : i32
    %c0_i32_0 = arith.constant 0 : i32
    %c0_i32_1 = arith.constant 0 : i32
    %c0_i32_2 = arith.constant 0 : i32
    return %c0_i32, %c0_i32_0, %c0_i32_1 : i32, i32, i32
  }
  func.func @transform_8(%arg0: i32) -> (i32, i32, i32) {
    %c0_i32 = arith.constant 0 : i32
    %c0_i32_0 = arith.constant 0 : i32
    %c0_i32_1 = arith.constant 0 : i32
    %c0_i32_2 = arith.constant 0 : i32
    return %c0_i32, %c0_i32_0, %c0_i32_1 : i32, i32, i32
  }
  func.func @transform_9(%arg0: i32) -> (i32, i32) {
    %c0_i32 = arith.constant 0 : i32
    %c0_i32_0 = arith.constant 0 : i32
    %c0_i32_1 = arith.constant 0 : i32
    return %c0_i32, %c0_i32_0 : i32, i32
  }
  func.func @transform_10(%arg0: i32) -> (i32, i32) {
    %c0_i32 = arith.constant 0 : i32
    %c0_i32_0 = arith.constant 0 : i32
    %c0_i32_1 = arith.constant 0 : i32
    return %c0_i32, %c0_i32_0 : i32, i32
  }
  func.func @transform_11(%arg0: i32) -> (i32, i32) {
    %c0_i32 = arith.constant 0 : i32
    %c0_i32_0 = arith.constant 0 : i32
    %c0_i32_1 = arith.constant 0 : i32
    return %c0_i32, %c0_i32_0 : i32, i32
  }
  func.func @transform_12(%arg0: i32) -> (i32, i32) {
    %c0_i32 = arith.constant 0 : i32
    %c0_i32_0 = arith.constant 0 : i32
    %c0_i32_1 = arith.constant 0 : i32
    return %c0_i32, %c0_i32_0 : i32, i32
  }
  func.func @transform_13(%arg0: i32) -> (i32, i32) {
    %c0_i32 = arith.constant 0 : i32
    %c0_i32_0 = arith.constant 0 : i32
    %c0_i32_1 = arith.constant 0 : i32
    return %c0_i32, %c0_i32_0 : i32, i32
  }
  func.func @transform_14(%arg0: i32) -> (i32, i32) {
    %c0_i32 = arith.constant 0 : i32
    %c0_i32_0 = arith.constant 0 : i32
    return %arg0, %c0_i32 : i32, i32
  }
}

</mosaic_0001>

<bundles_post_ra>
// kernel: forward.1
= control target key start
LH: loop header
LB: loop body
LE: loop exit
PB: predicated region body
PF: predicated region fallthrough
CT: control target
= control target key end

     0   :  { %s5394_s0 = inlined_call_operand.vmem [shape: f32[72,144], index: 0, kind: input, shape index: {}]   ;;  %s5395_s1 = inlined_call_operand.hbm [shape: f32[8,16,72], index: 1, kind: input, shape index: {}]   ;;  %s5396_s2 = inlined_call_operand.hbm [shape: f32[8,144,256], index: 2, kind: input, shape index: {}]   ;;  %s5397_s3 = inlined_call_operand.hbm [shape: f32[1,256], index: 3, kind: input, shape index: {}]   ;;  %s5398_s4 = inlined_call_operand.hbm [shape: f32[4,6,16], index: 4, kind: input, shape index: {}]   ;;  %s5399_s5 = inlined_call_operand.hbm [shape: f32[4,256,192], index: 5, kind: input, shape index: {}]   ;;  %s5400_s6 = inlined_call_operand.hbm [shape: f32[1,192], index: 6, kind: input, shape index: {}]   ;;  %s5401_s7 = inlined_call_operand.hbm [shape: f32[3,2,6], index: 7, kind: input, shape index: {}]   ;;  %s5402_s8 = inlined_call_operand.hbm [shape: f32[3,192,64], index: 8, kind: input, shape index: {}]   ;;  %s5403_s9 = inlined_call_operand.hbm [shape: f32[1,64], index: 9, kind: input, shape index: {}]   ;;  %s5404_s10 = inlined_call_operand.hbm [shape: f32[64,32], index: 10, kind: input, shape index: {}]   ;;  %s5405_s11 = inlined_call_operand.hbm [shape: f32[1,32], index: 11, kind: input, shape index: {}]   ;;  %s5406_s12 = inlined_call_operand.hbm [shape: f32[32,1], index: 12, kind: input, shape index: {}]   ;;  %s5407_s13 = inlined_call_operand.<no memory space> [shape: f32[1,1], index: 13, kind: input, shape index: {}]   ;;  %s5408_s14 = inlined_call_operand.vmem [shape: f32[2,1], index: 14, kind: output, shape index: {}]  }
   0x1   :  { %v19_v0 = vstv %s5407_s13 }
   0x2   :  { %20 = vst [vmem:[#allocation2] sm:$0x1] %v19_v0 }
   0x3   :  { %21 = vsyncpa [#allocation4], 0 }
   0x4   :  { %22 = vsyncpa [#allocation6], 0 }
   0x5   :  { %23 = vsyncpa [#allocation9], 0 }
   0x6   :  { %24 = vsyncpa [#allocation12], 0 }
   0x7   :  { %25 = vsyncpa [#allocation15], 0 }
   0x8   :  { %26 = vsyncpa [#allocation18], 0 }
   0x9   :  { %27 = vsyncpa [#allocation21], 0  ;;  %s4750_s15 = smov [#allocation5]   ;;  %s4472_s19 = scalar_lea.hbm %s5396_s2, 36864 }
   0xa   :  { %s47_s16 = sshll.u32 %s4750_s15, 4  ;;  %p4473_p0 = scmp.ne.s32.totalorder %s5396_s2, %s4472_s19  ;;  %s48_s16 = int_to_ptr.vmem [resolvable:$true] %s47_s16 }
   0xb   :  { %p4476_p1 = scmp.lt.u32.totalorder %s4472_s19, %s5396_s2 }
   0xd   :  { %p4478_p2 = pnand %p4476_p1, %p4473_p0 }
   0xf   :  { %4481 = shalt.err (!%p4478_p2)
}
  0x10   :  { %s4482_s23 = scalar_lea.vmem %s48_s16, 36864  ;;  %p4487_p4 = scmp.lt.s32.totalorder %s48_s16, %s48_s16 }
  0x11   :  { %p4483_p3 = scmp.ne.s32.totalorder %s48_s16, %s4482_s23  ;;  %p4488_p5 = scmp.lt.s32.totalorder %s4482_s23, %s4482_s23 }
  0x13   :  { %p4489_p6 = por %p4488_p5, %p4487_p4 }
  0x15   :  { %p4490_p7 = pnand %p4489_p6, %p4483_p3 }
  0x17   :  { %4493 = shalt.err (!%p4490_p7)
}
  0x18   :  { %s4751_s24 = smov 256   ;;  %s4752_s25 = smov 16  }
  0x19   :  { %53 = dma.hbm_to_vmem [thread:$0]  %s5396_s2, 36864, %s48_s16, [#allocation6], %s4751_s24, %s4751_s24, %s4752_s25  }
  0x1a   :  { %s4753_s28 = smov [#allocation8]   ;;  %s4754_s30 = smov [#allocation11]  }
  0x1b   :  { %s69_s29 = sshll.u32 %s4753_s28, 4  ;;  %s94_s15 = sshll.u32 %s4754_s30, 4  ;;  %s70_s29 = int_to_ptr.vmem [resolvable:$true] %s69_s29  ;;  %s95_s15 = int_to_ptr.vmem [resolvable:$true] %s94_s15 }
  0x1c   :  { %s4494_s19 = scalar_lea.hbm %s5398_s4, 512 }
  0x1d   :  { %p4495_p8 = scmp.ne.s32.totalorder %s5398_s4, %s4494_s19  ;;  %p4498_p9 = scmp.lt.u32.totalorder %s4494_s19, %s5398_s4 }
  0x1f   :  { %p4500_p10 = pnand %p4498_p9, %p4495_p8 }
  0x21   :  { %4503 = shalt.err (!%p4500_p10)
}
  0x22   :  { %s4504_s2 = scalar_lea.vmem %s70_s29, 512  ;;  %p4509_p12 = scmp.lt.s32.totalorder %s70_s29, %s70_s29 }
  0x23   :  { %p4505_p11 = scmp.ne.s32.totalorder %s70_s29, %s4504_s2  ;;  %p4510_p13 = scmp.lt.s32.totalorder %s4504_s2, %s4504_s2 }
  0x25   :  { %p4511_p0 = por %p4510_p13, %p4509_p12 }
  0x27   :  { %p4512_p1 = pnand %p4511_p0, %p4505_p11 }
  0x29   :  { %4515 = shalt.err (!%p4512_p1)
}
  0x2a   :  { %s4755_s16 = smov 128   ;;  %s4756_s23 = smov 8  }
  0x2b   :  { %75 = dma.hbm_to_vmem [thread:$0]  %s5398_s4, 512, %s70_s29, [#allocation9], %s4755_s16, %s4755_s16, %s4756_s23  }
  0x2c   :  { %s4516_s17 = scalar_lea.hbm %s5400_s6, 32 }
  0x2d   :  { %p4517_p2 = scmp.ne.s32.totalorder %s5400_s6, %s4516_s17  ;;  %p4520_p3 = scmp.lt.u32.totalorder %s4516_s17, %s5400_s6 }
  0x2f   :  { %p4522_p4 = pnand %p4520_p3, %p4517_p2 }
  0x31   :  { %4525 = shalt.err (!%p4522_p4)
}
  0x32   :  { %s4526_s13 = scalar_lea.vmem %s95_s15, 32  ;;  %p4531_p6 = scmp.lt.s32.totalorder %s95_s15, %s95_s15 }
  0x33   :  { %p4527_p5 = scmp.ne.s32.totalorder %s95_s15, %s4526_s13  ;;  %p4532_p7 = scmp.lt.s32.totalorder %s4526_s13, %s4526_s13 }
  0x35   :  { %p4533_p8 = por %p4532_p7, %p4531_p6 }
  0x37   :  { %p4534_p9 = pnand %p4533_p8, %p4527_p5 }
  0x39   :  { %4537 = shalt.err (!%p4534_p9)
}
  0x3a   :  { %97 = dma.hbm_to_vmem [thread:$0]  %s5400_s6, 32, %s95_s15, [#allocation12]  }
  0x3b   :  { %s4757_s22 = smov [#allocation14]   ;;  %s4758_s26 = smov [#allocation17]  }
  0x3c   :  { %s115_s2 = sshll.u32 %s4757_s22, 4  ;;  %s137_s27 = sshll.u32 %s4758_s26, 4  ;;  %s116_s2 = int_to_ptr.vmem [resolvable:$true] %s115_s2  ;;  %s138_s27 = int_to_ptr.vmem [resolvable:$true] %s137_s27 }
  0x3d   :  { %s4538_s17 = scalar_lea.hbm %s5402_s8, 9216 }
  0x3e   :  { %p4539_p10 = scmp.ne.s32.totalorder %s5402_s8, %s4538_s17  ;;  %p4542_p11 = scmp.lt.u32.totalorder %s4538_s17, %s5402_s8 }
  0x40   :  { %p4544_p12 = pnand %p4542_p11, %p4539_p10 }
  0x42   :  { %4547 = shalt.err (!%p4544_p12)
}
  0x43   :  { %s4548_s6 = scalar_lea.vmem %s116_s2, 9216  ;;  %p4553_p0 = scmp.lt.s32.totalorder %s116_s2, %s116_s2 }
  0x44   :  { %p4549_p13 = scmp.ne.s32.totalorder %s116_s2, %s4548_s6  ;;  %p4554_p1 = scmp.lt.s32.totalorder %s4548_s6, %s4548_s6 }
  0x46   :  { %p4555_p2 = por %p4554_p1, %p4553_p0 }
  0x48   :  { %p4556_p3 = pnand %p4555_p2, %p4549_p13 }
  0x4a   :  { %4559 = shalt.err (!%p4556_p3)
}
  0x4b   :  { %121 = dma.hbm_to_vmem [thread:$0]  %s5402_s8, 9216, %s116_s2, [#allocation15], %s4755_s16, %s4755_s16, %s4756_s23  }
  0x4c   :  { %s4560_s22 = scalar_lea.hbm %s5404_s10, 1024 }
  0x4d   :  { %p4561_p4 = scmp.ne.s32.totalorder %s5404_s10, %s4560_s22  ;;  %p4564_p5 = scmp.lt.u32.totalorder %s4560_s22, %s5404_s10 }
  0x4f   :  { %p4566_p6 = pnand %p4564_p5, %p4561_p4 }
  0x51   :  { %4569 = shalt.err (!%p4566_p6)
}
  0x52   :  { %s4570_s18 = scalar_lea.vmem %s138_s27, 1024  ;;  %p4575_p8 = scmp.lt.s32.totalorder %s138_s27, %s138_s27 }
  0x53   :  { %p4571_p7 = scmp.ne.s32.totalorder %s138_s27, %s4570_s18  ;;  %p4576_p9 = scmp.lt.s32.totalorder %s4570_s18, %s4570_s18 }
  0x55   :  { %p4577_p10 = por %p4576_p9, %p4575_p8 }
  0x57   :  { %p4578_p11 = pnand %p4577_p10, %p4571_p7 }
  0x59   :  { %4581 = shalt.err (!%p4578_p11)
}
  0x5a   :  { %143 = dma.hbm_to_vmem [thread:$0]  %s5404_s10, 1024, %s138_s27, [#allocation18], %s4755_s16, %s4755_s16, %s4756_s23  }
  0x5b   :  { %s4759_s19 = smov [#allocation3]   ;;  %s4760_s21 = smov [#allocation7]  }
  0x5c   :  { %s35_s20 = sshll.u32 %s4759_s19, 4  ;;  %s60_s6 = sshll.u32 %s4760_s21, 4  ;;  %s36_s20 = int_to_ptr.vmem [resolvable:$true] %s35_s20  ;;  %s61_s6 = int_to_ptr.vmem [resolvable:$true] %s60_s6 }
  0x5d   :  { %s4582_s4 = scalar_lea.hbm %s5395_s1, 2048 }
  0x5e   :  { %p4583_p12 = scmp.ne.s32.totalorder %s5395_s1, %s4582_s4  ;;  %p4586_p13 = scmp.lt.u32.totalorder %s4582_s4, %s5395_s1 }
  0x60   :  { %p4588_p0 = pnand %p4586_p13, %p4583_p12 }
  0x62   :  { %4591 = shalt.err (!%p4588_p0)
}
  0x63   :  { %s4592_s10 = scalar_lea.vmem %s36_s20, 2048  ;;  %p4597_p2 = scmp.lt.s32.totalorder %s36_s20, %s36_s20 }
  0x64   :  { %p4593_p1 = scmp.ne.s32.totalorder %s36_s20, %s4592_s10  ;;  %p4598_p3 = scmp.lt.s32.totalorder %s4592_s10, %s4592_s10 }
  0x66   :  { %p4599_p4 = por %p4598_p3, %p4597_p2 }
  0x68   :  { %p4600_p5 = pnand %p4599_p4, %p4593_p1 }
  0x6a   :  { %4603 = shalt.err (!%p4600_p5)
}
  0x6b   :  { %41 = dma.hbm_to_vmem [thread:$0]  %s5395_s1, 2048, %s36_s20, [#allocation4], %s4755_s16, %s4755_s16, %s4756_s23  }
  0x6c   :  { %s4604_s8 = scalar_lea.hbm %s5397_s3, 32 }
  0x6d   :  { %p4605_p6 = scmp.ne.s32.totalorder %s5397_s3, %s4604_s8  ;;  %p4608_p7 = scmp.lt.u32.totalorder %s4604_s8, %s5397_s3 }
  0x6f   :  { %p4610_p8 = pnand %p4608_p7, %p4605_p6 }
  0x71   :  { %4613 = shalt.err (!%p4610_p8)
}
  0x72   :  { %s4614_s13 = scalar_lea.vmem %s61_s6, 32  ;;  %p4619_p10 = scmp.lt.s32.totalorder %s61_s6, %s61_s6 }
  0x73   :  { %p4615_p9 = scmp.ne.s32.totalorder %s61_s6, %s4614_s13  ;;  %p4620_p11 = scmp.lt.s32.totalorder %s4614_s13, %s4614_s13 }
  0x75   :  { %p4621_p12 = por %p4620_p11, %p4619_p10 }
  0x77   :  { %p4622_p13 = pnand %p4621_p12, %p4615_p9 }
  0x79   :  { %4625 = shalt.err (!%p4622_p13)
}
  0x7a   :  { %63 = dma.hbm_to_vmem [thread:$0]  %s5397_s3, 32, %s61_s6, [#allocation6]  }
  0x7b   :  { %s4761_s4 = smov [#allocation10]   ;;  %s4762_s22 = smov [#allocation13]  }
  0x7c   :  { %s81_s29 = sshll.u32 %s4761_s4, 4  ;;  %s103_s26 = sshll.u32 %s4762_s22, 4  ;;  %s82_s29 = int_to_ptr.vmem [resolvable:$true] %s81_s29  ;;  %s104_s26 = int_to_ptr.vmem [resolvable:$true] %s103_s26 }
  0x7d   :  { %s4626_s27 = scalar_lea.hbm %s5399_s5, 32768 }
  0x7e   :  { %p4627_p0 = scmp.ne.s32.totalorder %s5399_s5, %s4626_s27  ;;  %p4630_p1 = scmp.lt.u32.totalorder %s4626_s27, %s5399_s5 }
  0x80   :  { %p4632_p2 = pnand %p4630_p1, %p4627_p0 }
  0x82   :  { %4635 = shalt.err (!%p4632_p2)
}
  0x83   :  { %s4636_s3 = scalar_lea.vmem %s82_s29, 32768  ;;  %p4641_p4 = scmp.lt.s32.totalorder %s82_s29, %s82_s29 }
  0x84   :  { %p4637_p3 = scmp.ne.s32.totalorder %s82_s29, %s4636_s3  ;;  %p4642_p5 = scmp.lt.s32.totalorder %s4636_s3, %s4636_s3 }
  0x86   :  { %p4643_p6 = por %p4642_p5, %p4641_p4 }
  0x88   :  { %p4644_p7 = pnand %p4643_p6, %p4637_p3 }
  0x8a   :  { %4647 = shalt.err (!%p4644_p7)
}
  0x8b   :  { %87 = dma.hbm_to_vmem [thread:$0]  %s5399_s5, 32768, %s82_s29, [#allocation9], %s4751_s24, %s4751_s24, %s4752_s25  }
  0x8c   :  { %s4648_s15 = scalar_lea.hbm %s5401_s7, 96 }
  0x8d   :  { %p4649_p8 = scmp.ne.s32.totalorder %s5401_s7, %s4648_s15  ;;  %p4652_p9 = scmp.lt.u32.totalorder %s4648_s15, %s5401_s7 }
  0x8f   :  { %p4654_p10 = pnand %p4652_p9, %p4649_p8 }
  0x91   :  { %4657 = shalt.err (!%p4654_p10)
}
  0x92   :  { %s4658_s22 = scalar_lea.vmem %s104_s26, 96  ;;  %p4663_p12 = scmp.lt.s32.totalorder %s104_s26, %s104_s26 }
  0x93   :  { %p4659_p11 = scmp.ne.s32.totalorder %s104_s26, %s4658_s22  ;;  %p4664_p13 = scmp.lt.s32.totalorder %s4658_s22, %s4658_s22 }
  0x95   :  { %p4665_p0 = por %p4664_p13, %p4663_p12 }
  0x97   :  { %p4666_p1 = pnand %p4665_p0, %p4659_p11 }
  0x99   :  { %4669 = shalt.err (!%p4666_p1)
}
  0x9a   :  { %s4763_s5 = smov 32   ;;  %s4764_s24 = smov 2  }
  0x9b   :  { %109 = dma.hbm_to_vmem [thread:$0]  %s5401_s7, 96, %s104_s26, [#allocation12], %s4763_s5, %s4763_s5, %s4764_s24  }
  0x9c   :  { %s4765_s28 = smov [#allocation16]   ;;  %s4766_s27 = smov [#allocation19]  }
  0x9d   :  { %s128_s10 = sshll.u32 %s4765_s28, 4  ;;  %s150_s30 = sshll.u32 %s4766_s27, 4  ;;  %s129_s10 = int_to_ptr.vmem [resolvable:$true] %s128_s10  ;;  %s151_s30 = int_to_ptr.vmem [resolvable:$true] %s150_s30 }
  0x9e   :  { %s4670_s8 = scalar_lea.hbm %s5403_s9, 16 }
  0x9f   :  { %p4671_p2 = scmp.ne.s32.totalorder %s5403_s9, %s4670_s8  ;;  %p4674_p3 = scmp.lt.u32.totalorder %s4670_s8, %s5403_s9 }
  0xa1   :  { %p4676_p4 = pnand %p4674_p3, %p4671_p2 }
  0xa3   :  { %4679 = shalt.err (!%p4676_p4)
}
  0xa4   :  { %s4680_s7 = scalar_lea.vmem %s129_s10, 16  ;;  %s4684_s26 = scalar_lea.vmem %s129_s10, 32 }
  0xa5   :  { %p4681_p5 = scmp.ne.s32.totalorder %s129_s10, %s4680_s7  ;;  %p4685_p6 = scmp.lt.s32.totalorder %s129_s10, %s129_s10 }
  0xa6   :  { %p4686_p7 = scmp.lt.s32.totalorder %s4684_s26, %s4680_s7 }
  0xa8   :  { %p4687_p8 = por %p4686_p7, %p4685_p6 }
  0xaa   :  { %p4688_p9 = pnand %p4687_p8, %p4681_p5 }
  0xac   :  { %4691 = shalt.err (!%p4688_p9)
}
  0xad   :  { %131 = dma.hbm_to_vmem [thread:$0]  %s5403_s9, 16, %s129_s10, [#allocation15]  }
  0xae   :  { %s4692_s20 = scalar_lea.hbm %s5405_s11, 16 }
  0xaf   :  { %p4693_p10 = scmp.ne.s32.totalorder %s5405_s11, %s4692_s20  ;;  %p4696_p11 = scmp.lt.u32.totalorder %s4692_s20, %s5405_s11 }
  0xb1   :  { %p4698_p12 = pnand %p4696_p11, %p4693_p10 }
  0xb3   :  { %4701 = shalt.err (!%p4698_p12)
}
  0xb4   :  { %s4702_s25 = scalar_lea.vmem %s151_s30, 16  ;;  %s4706_s29 = scalar_lea.vmem %s151_s30, 32 }
  0xb5   :  { %p4703_p13 = scmp.ne.s32.totalorder %s151_s30, %s4702_s25  ;;  %p4707_p0 = scmp.lt.s32.totalorder %s151_s30, %s151_s30 }
  0xb6   :  { %p4708_p1 = scmp.lt.s32.totalorder %s4706_s29, %s4702_s25 }
  0xb8   :  { %p4709_p2 = por %p4708_p1, %p4707_p0 }
  0xba   :  { %p4710_p3 = pnand %p4709_p2, %p4703_p13 }
  0xbc   :  { %4713 = shalt.err (!%p4710_p3)
}
  0xbd   :  { %153 = dma.hbm_to_vmem [thread:$0]  %s5405_s11, 16, %s151_s30, [#allocation18]  }
  0xbe   :  { %s4767_s10 = smov [#allocation20]   ;;  %s4714_s8 = scalar_lea.hbm %s5406_s12, 512 }
  0xbf   :  { %s159_s27 = sshll.u32 %s4767_s10, 4  ;;  %p4715_p4 = scmp.ne.s32.totalorder %s5406_s12, %s4714_s8  ;;  %s160_s27 = int_to_ptr.vmem [resolvable:$true] %s159_s27 }
  0xc0   :  { %p4718_p5 = scmp.lt.u32.totalorder %s4714_s8, %s5406_s12 }
  0xc2   :  { %p4720_p6 = pnand %p4718_p5, %p4715_p4 }
  0xc4   :  { %4723 = shalt.err (!%p4720_p6)
}
  0xc5   :  { %s4724_s7 = scalar_lea.vmem %s160_s27, 512  ;;  %p4729_p8 = scmp.lt.s32.totalorder %s160_s27, %s160_s27 }
  0xc6   :  { %p4725_p7 = scmp.ne.s32.totalorder %s160_s27, %s4724_s7  ;;  %p4730_p9 = scmp.lt.s32.totalorder %s4724_s7, %s4724_s7 }
  0xc8   :  { %p4731_p10 = por %p4730_p9, %p4729_p8 }
  0xca   :  { %p4732_p11 = pnand %p4731_p10, %p4725_p7 }
  0xcc   :  { %4735 = shalt.err (!%p4732_p11)
}
  0xcd   :  { %165 = dma.hbm_to_vmem [thread:$0]  %s5406_s12, 512, %s160_s27, [#allocation21], %s4755_s16, %s4755_s16, %s4756_s23  }
  0xce   :  { %4736 = dma.done.wait [#allocation4], 2048  }
  0xcf   :  { %4737 = vsyncadd [#allocation4], 4294965248 }
  0xd0   :  { %4738 = dma.done.wait [#allocation6], 36896  }
  0xd1   :  { %4739 = vsyncadd [#allocation6], 4294930400 }
  0xd2   :  { %4740 = dma.done.wait [#allocation9], 33280  }
  0xd3   :  { %4741 = vsyncadd [#allocation9], 4294934016 }
  0xd4   :  { %4742 = dma.done.wait [#allocation12], 128  }
  0xd5   :  { %4743 = vsyncadd [#allocation12], 4294967168 }
  0xd6   :  { %4744 = dma.done.wait [#allocation15], 9232  }
  0xd7   :  { %4745 = vsyncadd [#allocation15], 4294958064 }
  0xd8   :  { %4746 = dma.done.wait [#allocation18], 1040  }
  0xd9   :  { %4747 = vsyncadd [#allocation18], 4294966256 }
  0xda   :  { %4748 = dma.done.wait [#allocation21], 512  }
  0xdb   :  { %4749 = vsyncadd [#allocation21], 4294966784  ;;  %v4768_v1 = vmov 0.0   ;;  %v205_v2 = vld [vmem:[%s5394_s0 + $0x8] sm:$0xff]  ;;  %v207_v3 = vld [vmem:[%s5394_s0 + $0x18] sm:$0xff]  ;;  %vm224_vm0 = vcmask 588800  }
  0xdc   :  { %417 = vmatprep.mubr.f32.mxu1 %v4768_v1  ;;  %295 = vmatprep.mubr.f32.mxu0 %v4768_v1  ;;  %v204_v4 = vld [vmem:[%s5394_s0] sm:$0xff]  ;;  %v5025_v5 = vpack.c.bf16 %v207_v3, %v205_v2  ;;  %v206_v6 = vld [vmem:[%s5394_s0 + $0x10] sm:$0xff]  ;;  %v209_v7 = vld [vmem:[%s5394_s0 + $0x28] sm:$0xff]  ;;  %vm467_vm1 = vcmask 130048   ;;  %vm2785_vm2 = vcmask 1045504   ;;  %vm2781_vm3 = vcmask 48128  }
  0xdd   :  { %v211_v8 = vld [vmem:[%s5394_s0 + $0x38] sm:$0xff]  ;;  %v5036_v9 = vpack.c.bf16 %v206_v6, %v204_v4  ;;  %v208_v11 = vld [vmem:[%s5394_s0 + $0x20] sm:$0xff]  ;;  %v210_v12 = vld [vmem:[%s5394_s0 + $0x30] sm:$0xff]  ;;  %vm2988_vm4 = vcmask 523264   ;;  %vm4770_vm5 = vmmov 0   ;;  %vm3419_vm6 = vcmask 261120  }
  0xde   :  { %v5038_v10 = vpack.c.bf16 %v211_v8, %v209_v7  ;;  %v213_v13 = vld [vmem:[%s5394_s0 + $0x48] sm:$0xff]  ;;  %3620 = vmatprep.subr.bf16.mxu1 %v5025_v5  ;;  %v215_v14 = vld [vmem:[%s5394_s0 + $0x58] sm:$0xff]  ;;  %3604 = vmatprep.subr.bf16.mxu0 %v5025_v5  ;;  %v5055_v15 = vpack.c.bf16 %v210_v12, %v208_v11  ;;  %v212_v17 = vld [vmem:[%s5394_s0 + $0x40] sm:$0xff]  ;;  %vm3493_vm7 = vcmask 1024  }
  0xdf   :  { %3622 = vmatpush1.bf16.msra.mxu1 %v5036_v9  ;;  %3606 = vmatpush1.bf16.msra.mxu0 %v5036_v9  ;;  %v5059_v16 = vpack.c.bf16 %v215_v14, %v213_v13  ;;  %v214_v18 = vld [vmem:[%s5394_s0 + $0x50] sm:$0xff]  ;;  %v217_v19 = vld [vmem:[%s5394_s0 + $0x68] sm:$0xff]  ;;  %v219_v20 = vld [vmem:[%s5394_s0 + $0x78] sm:$0xff] }
  0xe0   :  { %3624 = vmatprep.subr.bf16.mxu1 %v5038_v10  ;;  %3608 = vmatprep.subr.bf16.mxu0 %v5038_v10  ;;  %v5075_v21 = vpack.c.bf16 %v214_v18, %v212_v17  ;;  %v5079_v22 = vpack.c.bf16 %v219_v20, %v217_v19  ;;  %v216_v23 = vld [vmem:[%s5394_s0 + $0x60] sm:$0xff]  ;;  %v218_v24 = vld [vmem:[%s5394_s0 + $0x70] sm:$0xff]  ;;  %v5097_v26 = vld [vmem:[%s5394_s0 + $0x88] sm:$0xff] }
  0xe1   :  { %v5089_v25 = vpack.c.bf16 %v218_v24, %v216_v23  ;;  %v5105_v27 = vld [vmem:[%s5394_s0 + $0x80] sm:$0xff]  ;;  %v432_v28 = vld [vmem:[#allocation5 + $0x128] sm:$0xff]  ;;  %v345_v30 = vld [vmem:[#allocation3 + $0x10] sm:$0xff] }
  0xe2   :  { %v434_v29 = vld [vmem:[#allocation5 + $0x138] sm:$0xff]  ;;  %v222_v31 = vld [vmem:[#allocation3] sm:$0xff]  ;;  %v433_v33 = vld [vmem:[#allocation5 + $0x130] sm:$0xff] }
  0xe3   :  { %3626 = vmatpush1.bf16.msra.mxu1 %v5055_v15  ;;  %3610 = vmatpush1.bf16.msra.mxu0 %v5055_v15  ;;  %v431_v32 = vld [vmem:[#allocation5 + $0x120] sm:$0xff]  ;;  %v3635_v34 = vpack.c.bf16 %v434_v29, %v432_v28  ;;  %v436_v35 = vld [vmem:[#allocation5 + $0x148] sm:$0xff]  ;;  %v438_v36 = vld [vmem:[#allocation5 + $0x158] sm:$0xff] }
  0xe4   :  { %3628 = vmatprep.subr.bf16.mxu1 %v5059_v16  ;;  %3612 = vmatprep.subr.bf16.mxu0 %v5059_v16  ;;  %v346_v37 = vld [vmem:[#allocation3 + $0x18] sm:$0xff]  ;;  %v223_v38 = vld [vmem:[#allocation3 + $0x8] sm:$0xff]  ;;  %v3637_v39 = vpack.c.bf16 %v433_v33, %v431_v32  ;;  %v3639_v40 = vpack.c.bf16 %v438_v36, %v436_v35  ;;  %v435_v41 = vld [vmem:[#allocation5 + $0x140] sm:$0xff] }
  0xe5   :  { %v437_v42 = vld [vmem:[#allocation5 + $0x150] sm:$0xff]  ;;  %v440_v43 = vld [vmem:[#allocation5 + $0x168] sm:$0xff]  ;;  %v442_v44 = vld [vmem:[#allocation5 + $0x178] sm:$0xff] }
  0xe6   :  { %v3641_v45 = vpack.c.bf16 %v437_v42, %v435_v41  ;;  %v3643_v46 = vpack.c.bf16 %v442_v44, %v440_v43  ;;  %v439_v47 = vld [vmem:[#allocation5 + $0x160] sm:$0xff]  ;;  %v441_v48 = vld [vmem:[#allocation5 + $0x170] sm:$0xff]  ;;  %v444_v49 = vld [vmem:[#allocation5 + $0x188] sm:$0xff] }
  0xe7   :  { %3630 = vmatpush1.bf16.msra.mxu1 %v5075_v21  ;;  %3614 = vmatpush1.bf16.msra.mxu0 %v5075_v21  ;;  %v446_v50 = vld [vmem:[#allocation5 + $0x198] sm:$0xff]  ;;  %v3645_v51 = vpack.c.bf16 %v441_v48, %v439_v47  ;;  %v443_v53 = vld [vmem:[#allocation5 + $0x180] sm:$0xff]  ;;  %v445_v54 = vld [vmem:[#allocation5 + $0x190] sm:$0xff] }
  0xe8   :  { %3632 = vmatprep.subr.bf16.mxu1 %v5079_v22  ;;  %3616 = vmatprep.subr.bf16.mxu0 %v5079_v22  ;;  %v3647_v52 = vpack.c.bf16 %v446_v50, %v444_v49  ;;  %v448_v55 = vld [vmem:[#allocation5 + $0x1a8] sm:$0xff]  ;;  %v450_v56 = vld [vmem:[#allocation5 + $0x1b8] sm:$0xff]  ;;  %v3649_v57 = vpack.c.bf16 %v445_v54, %v443_v53  ;;  %v447_v59 = vld [vmem:[#allocation5 + $0x1a0] sm:$0xff] }
  0xe9   :  { %v3651_v58 = vpack.c.bf16 %v450_v56, %v448_v55  ;;  %v449_v60 = vld [vmem:[#allocation5 + $0x1b0] sm:$0xff]  ;;  %v452_v61 = vld [vmem:[#allocation5 + $0x1c8] sm:$0xff]  ;;  %v454_v62 = vld [vmem:[#allocation5 + $0x1d8] sm:$0xff] }
  0xea   :  { %v635_v63 = vld [vmem:[#allocation3 + $0x20] sm:$0xff]  ;;  %v3653_v0 = vpack.c.bf16 %v449_v60, %v447_v59  ;;  %v3655_v2 = vpack.c.bf16 %v454_v62, %v452_v61  ;;  %v453_v4 = vld [vmem:[#allocation5 + $0x1d0] sm:$0xff]  ;;  %v456_v6 = vld [vmem:[#allocation5 + $0x1e8] sm:$0xff] }
  0xeb   :  { %3634 = vmatpush1.bf16.msra.mxu1 %v5089_v25  ;;  %3618 = vmatpush1.bf16.msra.mxu0 %v5089_v25  ;;  %v451_v3 = vld [vmem:[#allocation5 + $0x1c0] sm:$0xff]  ;;  %v458_v7 = vld [vmem:[#allocation5 + $0x1f8] sm:$0xff]  ;;  %v636_v8 = vld [vmem:[#allocation3 + $0x28] sm:$0xff] }
  0xec   :  { %369 = vmatprep.subr.mxu1 %v5097_v26  ;;  %247 = vmatprep.subr.mxu0 %v5097_v26  ;;  %v3657_v11 = vpack.c.bf16 %v453_v4, %v451_v3  ;;  %v3659_v12 = vpack.c.bf16 %v458_v7, %v456_v6  ;;  %v455_v13 = vld [vmem:[#allocation5 + $0x1e0] sm:$0xff]  ;;  %v457_v14 = vld [vmem:[#allocation5 + $0x1f0] sm:$0xff]  ;;  %v460_v17 = vld [vmem:[#allocation5 + $0x208] sm:$0xff] }
  0xed   :  { %v462_v18 = vld [vmem:[#allocation5 + $0x218] sm:$0xff]  ;;  %v3661_v19 = vpack.c.bf16 %v457_v14, %v455_v13  ;;  %v459_v23 = vld [vmem:[#allocation5 + $0x200] sm:$0xff]  ;;  %v461_v24 = vld [vmem:[#allocation5 + $0x210] sm:$0xff] }
  0xee   :  { %v3663_v20 = vpack.c.bf16 %v462_v18, %v460_v17  ;;  %v464_v28 = vld [vmem:[#allocation5 + $0x228] sm:$0xff]  ;;  %v466_v29 = vld [vmem:[#allocation5 + $0x238] sm:$0xff]  ;;  %v463_v32 = vld [vmem:[#allocation5 + $0x220] sm:$0xff] }
  0xef   :  { %370 = vmatpush1.msra.mxu1 %v5105_v27  ;;  %248 = vmatpush1.msra.mxu0 %v5105_v27  ;;  %v465_v33 = vld [vmem:[#allocation5 + $0x230] sm:$0xff]  ;;  %v846_v36 = vld [vmem:[#allocation3 + $0x38] sm:$0xff]  ;;  %v309_v41 = vld [vmem:[#allocation5 + $0x8] sm:$0xff] }
  0xf0   :  { %3508 = vmatmul.mubr.msk.f32.vlgmr.msra.gmra.mrb[0].mxu1 %vm224_vm0, %v345_v30  ;;  %3506 = vmatmul.mubr.msk.f32.vlgmr.msra.gmra.mrb[0].mxu0 %vm224_vm0, %v222_v31  ;;  %v3665_v30 = vpack.c.bf16 %v461_v24, %v459_v23  ;;  %v3667_v31 = vpack.c.bf16 %v466_v29, %v464_v28  ;;  %v3669_v35 = vpack.c.bf16 %v465_v33, %v463_v32  ;;  %v311_v42 = vld [vmem:[#allocation5 + $0x18] sm:$0xff]  ;;  %v1475_v44 = vld [vmem:[#allocation3 + $0x60] sm:$0xff]  ;;  %v314_v48 = vld [vmem:[#allocation5 + $0x30] sm:$0xff] }
  0xf1   :  { %423 = vmatprep.mubr.f32.mxu1 %v4768_v1  ;;  %3708 = vmatprep.subr.bf16.mxu1 %v5025_v5  ;;  %v3671_v43 = vpack.c.bf16 %v311_v42, %v309_v41  ;;  %v312_v47 = vld [vmem:[#allocation5 + $0x20] sm:$0xff]  ;;  %v317_v50 = vld [vmem:[#allocation5 + $0x48] sm:$0xff]  ;;  %v323_v61 = vld [vmem:[#allocation5 + $0x78] sm:$0xff] }
  0xf2   :  { %3710 = vmatpush1.bf16.msra.mxu1 %v5036_v9  ;;  %301 = vmatprep.mubr.f32.mxu0 %v4768_v1  ;;  %v316_v56 = vld [vmem:[#allocation5 + $0x40] sm:$0xff]  ;;  %v321_v60 = vld [vmem:[#allocation5 + $0x68] sm:$0xff]  ;;  %v327_v4 = vld [vmem:[#allocation5 + $0x98] sm:$0xff] }
  0xf3   :  { %3712 = vmatprep.subr.bf16.mxu1 %v5038_v10  ;;  %3636 = vmatprep.subr.bf16.mxu0 %v3635_v34  ;;  %v845_v34 = vld [vmem:[#allocation3 + $0x30] sm:$0xff]  ;;  %v325_v3 = vld [vmem:[#allocation5 + $0x88] sm:$0xff]  ;;  %v331_v13 = vld [vmem:[#allocation5 + $0xb8] sm:$0xff] }
  0xf4   :  { %3509 = vmatmul.mubr.msk.f32.gmra.mrb[2].mxu1 %vm224_vm0, %v346_v37  ;;  %3507 = vmatmul.mubr.msk.f32.gmra.mrb[2].mxu0 %vm224_vm0, %v223_v38  ;;  %v1055_v37 = vld [vmem:[#allocation3 + $0x40] sm:$0xff]  ;;  %v1056_v38 = vld [vmem:[#allocation3 + $0x48] sm:$0xff]  ;;  %v3687_v7 = vpack.c.bf16 %v327_v4, %v325_v3  ;;  %v335_v23 = vld [vmem:[#allocation5 + $0xd8] sm:$0xff] }
  0xf5   :  { %707 = vmatprep.mubr.f32.mxu1 %v4768_v1  ;;  %3638 = vmatpush1.bf16.msra.mxu0 %v3637_v39  ;;  %v1265_v39 = vld [vmem:[#allocation3 + $0x50] sm:$0xff]  ;;  %v328_v18 = vld [vmem:[#allocation5 + $0xa0] sm:$0xff]  ;;  %v337_v33 = vld [vmem:[#allocation5 + $0xe8] sm:$0xff] }
  0xf6   :  { %3714 = vmatpush1.bf16.msra.mxu1 %v5055_v15  ;;  %3640 = vmatprep.subr.bf16.mxu0 %v3639_v40  ;;  %v1266_v40 = vld [vmem:[#allocation3 + $0x58] sm:$0xff]  ;;  %v334_v32 = vld [vmem:[#allocation5 + $0xd0] sm:$0xff]  ;;  %v341_v41 = vld [vmem:[#allocation5 + $0x108] sm:$0xff] }
  0xf7   :  { %3716 = vmatprep.subr.bf16.mxu1 %v5059_v16  ;;  %v343_v42 = vld [vmem:[#allocation5 + $0x118] sm:$0xff]  ;;  %v738_v3 = vld [vmem:[#allocation5 + $0x2c8] sm:$0xff] }
  0xf8   :  { %v740_v4 = vld [vmem:[#allocation5 + $0x2d8] sm:$0xff] }
  0xf9   :  { %3642 = vmatpush1.bf16.msra.mxu0 %v3641_v45 }
  0xfa   :  { %3718 = vmatpush1.bf16.msra.mxu1 %v5075_v21  ;;  %3644 = vmatprep.subr.bf16.mxu0 %v3643_v46 }
  0xfb   :  { %3720 = vmatprep.subr.bf16.mxu1 %v5079_v22 }
  0xfd   :  { %3646 = vmatpush1.bf16.msra.mxu0 %v3645_v51  ;;  %v319_v51 = vld [vmem:[#allocation5 + $0x58] sm:$0xff] }
  0xfe   :  { %3722 = vmatpush1.bf16.msra.mxu1 %v5089_v25  ;;  %3648 = vmatprep.subr.bf16.mxu0 %v3647_v52  ;;  %v3677_v52 = vpack.c.bf16 %v314_v48, %v312_v47  ;;  %v3679_v55 = vpack.c.bf16 %v319_v51, %v317_v50  ;;  %v725_v48 = vld [vmem:[#allocation5 + $0x260] sm:$0xff]  ;;  %v730_v51 = vld [vmem:[#allocation5 + $0x288] sm:$0xff] }
  0xff   :  { %659 = vmatprep.subr.mxu1 %v5097_v26 }
 0x101   :  { %3650 = vmatpush1.bf16.msra.mxu0 %v3649_v57  ;;  %v318_v57 = vld [vmem:[#allocation5 + $0x50] sm:$0xff] }
 0x102   :  { %660 = vmatpush1.msra.mxu1 %v5105_v27  ;;  %3652 = vmatprep.subr.bf16.mxu0 %v3651_v58  ;;  %v3681_v62 = vpack.c.bf16 %v318_v57, %v316_v56  ;;  %v729_v57 = vld [vmem:[#allocation5 + $0x280] sm:$0xff] }
 0x103   :  { %3514 = vmatmul.mubr.msk.f32.vlgmr.msra.gmra.mrb[4].mxu1 %vm224_vm0, %v635_v63  ;;  %3760 = vmatprep.subr.bf16.mxu1 %v5025_v5  ;;  %v3683_v63 = vpack.c.bf16 %v323_v61, %v321_v60  ;;  %v734_v61 = vld [vmem:[#allocation5 + $0x2a8] sm:$0xff] }
 0x104   :  { %3762 = vmatpush1.bf16.msra.mxu1 %v5036_v9  ;;  %713 = vmatprep.mubr.f32.mxu1 %v4768_v1 }
 0x105   :  { %3764 = vmatprep.subr.bf16.mxu1 %v5038_v10  ;;  %3654 = vmatpush1.bf16.msra.mxu0 %v3653_v0  ;;  %v320_v0 = vld [vmem:[#allocation5 + $0x60] sm:$0xff] }
 0x106   :  { %3656 = vmatprep.subr.bf16.mxu0 %v3655_v2  ;;  %v322_v2 = vld [vmem:[#allocation5 + $0x70] sm:$0xff] }
 0x107   :  { %3515 = vmatmul.mubr.msk.f32.gmra.mrb[6].mxu1 %vm224_vm0, %v636_v8  ;;  %v3685_v6 = vpack.c.bf16 %v322_v2, %v320_v0  ;;  %v324_v8 = vld [vmem:[#allocation5 + $0x80] sm:$0xff] }
 0x108   :  { %3766 = vmatpush1.bf16.msra.mxu1 %v5055_v15  ;;  %917 = vmatprep.mubr.f32.mxu1 %v4768_v1  ;;  %v733_v2 = vld [vmem:[#allocation5 + $0x2a0] sm:$0xff] }
 0x109   :  { %3768 = vmatprep.subr.bf16.mxu1 %v5059_v16  ;;  %3658 = vmatpush1.bf16.msra.mxu0 %v3657_v11  ;;  %v326_v11 = vld [vmem:[#allocation5 + $0x90] sm:$0xff] }
 0x10a   :  { %3660 = vmatprep.subr.bf16.mxu0 %v3659_v12  ;;  %v329_v12 = vld [vmem:[#allocation5 + $0xa8] sm:$0xff]  ;;  %v3689_v14 = vpack.c.bf16 %v326_v11, %v324_v8  ;;  %v737_v8 = vld [vmem:[#allocation5 + $0x2c0] sm:$0xff]  ;;  %v739_v11 = vld [vmem:[#allocation5 + $0x2d0] sm:$0xff] }
 0x10b   :  { %v3691_v17 = vpack.c.bf16 %v331_v13, %v329_v12  ;;  %v742_v12 = vld [vmem:[#allocation5 + $0x2e8] sm:$0xff]  ;;  %v744_v13 = vld [vmem:[#allocation5 + $0x2f8] sm:$0xff] }
 0x10c   :  { %3770 = vmatpush1.bf16.msra.mxu1 %v5075_v21 }
 0x10d   :  { %3772 = vmatprep.subr.bf16.mxu1 %v5079_v22  ;;  %3662 = vmatpush1.bf16.msra.mxu0 %v3661_v19  ;;  %v330_v19 = vld [vmem:[#allocation5 + $0xb0] sm:$0xff] }
 0x10e   :  { %3664 = vmatprep.subr.bf16.mxu0 %v3663_v20  ;;  %v333_v20 = vld [vmem:[#allocation5 + $0xc8] sm:$0xff]  ;;  %v3693_v28 = vpack.c.bf16 %v330_v19, %v328_v18  ;;  %v743_v18 = vld [vmem:[#allocation5 + $0x2f0] sm:$0xff] }
 0x10f   :  { %v746_v19 = vld [vmem:[#allocation5 + $0x308] sm:$0xff] }
 0x110   :  { %3774 = vmatpush1.bf16.msra.mxu1 %v5089_v25 }
 0x111   :  { %869 = vmatprep.subr.mxu1 %v5097_v26  ;;  %3666 = vmatpush1.bf16.msra.mxu0 %v3665_v30  ;;  %v3695_v30 = vpack.c.bf16 %v335_v23, %v333_v20  ;;  %v748_v20 = vld [vmem:[#allocation5 + $0x318] sm:$0xff] }
 0x112   :  { %3668 = vmatprep.subr.bf16.mxu0 %v3667_v31  ;;  %v332_v31 = vld [vmem:[#allocation5 + $0xc0] sm:$0xff] }
 0x114   :  { %870 = vmatpush1.msra.mxu1 %v5105_v27 }
 0x115   :  { %3518 = vmatmul.mubr.msk.f32.vlgmr.msra.gmra.mrb[8].mxu1 %vm224_vm0, %v845_v34  ;;  %3812 = vmatprep.subr.bf16.mxu1 %v5025_v5  ;;  %v339_v34 = vld [vmem:[#allocation5 + $0xf8] sm:$0xff] }
 0x116   :  { %3814 = vmatpush1.bf16.msra.mxu1 %v5036_v9  ;;  %923 = vmatprep.mubr.f32.mxu1 %v4768_v1 }
 0x117   :  { %3816 = vmatprep.subr.bf16.mxu1 %v5038_v10  ;;  %3670 = vmatpush1.bf16.msra.mxu0 %v3669_v35 }
 0x118   :  { %3672 = vmatprep.subr.bf16.mxu0 %v3671_v43 }
 0x119   :  { %3519 = vmatmul.mubr.msk.f32.gmra.mrb[10].mxu1 %vm224_vm0, %v846_v36  ;;  %v3697_v36 = vpack.c.bf16 %v334_v32, %v332_v31  ;;  %v745_v31 = vld [vmem:[#allocation5 + $0x300] sm:$0xff]  ;;  %v747_v32 = vld [vmem:[#allocation5 + $0x310] sm:$0xff] }
 0x11a   :  { %3818 = vmatpush1.bf16.msra.mxu1 %v5055_v15  ;;  %1127 = vmatprep.mubr.f32.mxu1 %v4768_v1 }
 0x11b   :  { %3820 = vmatprep.subr.bf16.mxu1 %v5059_v16 }
 0x11e   :  { %3822 = vmatpush1.bf16.msra.mxu1 %v5075_v21 }
 0x11f   :  { %3824 = vmatprep.subr.bf16.mxu1 %v5079_v22 }
 0x122   :  { %3826 = vmatpush1.bf16.msra.mxu1 %v5089_v25 }
 0x123   :  { %1079 = vmatprep.subr.mxu1 %v5097_v26 }
 0x126   :  { %1080 = vmatpush1.msra.mxu1 %v5105_v27 }
 0x127   :  { %3522 = vmatmul.mubr.msk.f32.vlgmr.msra.gmra.mrb[12].mxu1 %vm224_vm0, %v1055_v37  ;;  %3864 = vmatprep.subr.bf16.mxu1 %v5025_v5 }
 0x128   :  { %3866 = vmatpush1.bf16.msra.mxu1 %v5036_v9  ;;  %1133 = vmatprep.mubr.f32.mxu1 %v4768_v1 }
 0x129   :  { %3868 = vmatprep.subr.bf16.mxu1 %v5038_v10 }
 0x12b   :  { %3523 = vmatmul.mubr.msk.f32.gmra.mrb[14].mxu1 %vm224_vm0, %v1056_v38  ;;  %v3699_v38 = vpack.c.bf16 %v339_v34, %v337_v33  ;;  %v750_v33 = vld [vmem:[#allocation5 + $0x328] sm:$0xff]  ;;  %v752_v34 = vld [vmem:[#allocation5 + $0x338] sm:$0xff] }
 0x12c   :  { %3870 = vmatpush1.bf16.msra.mxu1 %v5055_v15  ;;  %1337 = vmatprep.mubr.f32.mxu1 %v4768_v1 }
 0x12d   :  { %3872 = vmatprep.subr.bf16.mxu1 %v5059_v16 }
 0x130   :  { %3874 = vmatpush1.bf16.msra.mxu1 %v5075_v21 }
 0x131   :  { %3876 = vmatprep.subr.bf16.mxu1 %v5079_v22 }
 0x134   :  { %3878 = vmatpush1.bf16.msra.mxu1 %v5089_v25 }
 0x135   :  { %1289 = vmatprep.subr.mxu1 %v5097_v26 }
 0x138   :  { %1290 = vmatpush1.msra.mxu1 %v5105_v27 }
 0x139   :  { %3526 = vmatmul.mubr.msk.f32.vlgmr.msra.gmra.mrb[16].mxu1 %vm224_vm0, %v1265_v39  ;;  %3916 = vmatprep.subr.bf16.mxu1 %v5025_v5  ;;  %v336_v39 = vld [vmem:[#allocation5 + $0xe0] sm:$0xff] }
 0x13a   :  { %3918 = vmatpush1.bf16.msra.mxu1 %v5036_v9  ;;  %1343 = vmatprep.mubr.f32.mxu1 %v4768_v1 }
 0x13b   :  { %3920 = vmatprep.subr.bf16.mxu1 %v5038_v10 }
 0x13d   :  { %3527 = vmatmul.mubr.msk.f32.gmra.mrb[18].mxu1 %vm224_vm0, %v1266_v40  ;;  %v338_v40 = vld [vmem:[#allocation5 + $0xf0] sm:$0xff] }
 0x13e   :  { %3922 = vmatpush1.bf16.msra.mxu1 %v5055_v15  ;;  %1547 = vmatprep.mubr.f32.mxu1 %v4768_v1  ;;  %v3701_v43 = vpack.c.bf16 %v338_v40, %v336_v39  ;;  %v3751_v40 = vpack.c.bf16 %v752_v34, %v750_v33 }
 0x13f   :  { %3924 = vmatprep.subr.bf16.mxu1 %v5059_v16 }
 0x142   :  { %3926 = vmatpush1.bf16.msra.mxu1 %v5075_v21 }
 0x143   :  { %3928 = vmatprep.subr.bf16.mxu1 %v5079_v22 }
 0x146   :  { %3930 = vmatpush1.bf16.msra.mxu1 %v5089_v25 }
 0x147   :  { %1499 = vmatprep.subr.mxu1 %v5097_v26 }
 0x14a   :  { %1500 = vmatpush1.msra.mxu1 %v5105_v27 }
 0x14b   :  { %3530 = vmatmul.mubr.msk.f32.vlgmr.msra.gmra.mrb[20].mxu1 %vm224_vm0, %v1475_v44  ;;  %3968 = vmatprep.subr.bf16.mxu1 %v5025_v5  ;;  %v1476_v5 = vld [vmem:[#allocation3 + $0x68] sm:$0xff]  ;;  %v3703_v44 = vpack.c.bf16 %v343_v42, %v341_v41  ;;  %v749_v41 = vld [vmem:[#allocation5 + $0x320] sm:$0xff]  ;;  %v751_v42 = vld [vmem:[#allocation5 + $0x330] sm:$0xff] }
 0x14c   :  { %3970 = vmatpush1.bf16.msra.mxu1 %v5036_v9  ;;  %1553 = vmatprep.mubr.f32.mxu1 %v4768_v1  ;;  %v1685_v9 = vld [vmem:[#allocation3 + $0x70] sm:$0xff] }
 0x14d   :  { %3972 = vmatprep.subr.bf16.mxu1 %v5038_v10  ;;  %v1686_v10 = vld [vmem:[#allocation3 + $0x78] sm:$0xff] }
 0x14f   :  { %3531 = vmatmul.mubr.msk.f32.gmra.mrb[22].mxu1 %vm224_vm0, %v1476_v5  ;;  %v340_v5 = vld [vmem:[#allocation5 + $0x100] sm:$0xff] }
 0x150   :  { %3974 = vmatpush1.bf16.msra.mxu1 %v5055_v15  ;;  %1757 = vmatprep.mubr.f32.mxu1 %v4768_v1  ;;  %v308_v15 = vld [vmem:[#allocation5] sm:$0xff] }
 0x151   :  { %3976 = vmatprep.subr.bf16.mxu1 %v5059_v16  ;;  %v310_v16 = vld [vmem:[#allocation5 + $0x10] sm:$0xff] }
 0x154   :  { %3978 = vmatpush1.bf16.msra.mxu1 %v5075_v21  ;;  %v313_v21 = vld [vmem:[#allocation5 + $0x28] sm:$0xff] }
 0x155   :  { %3980 = vmatprep.subr.bf16.mxu1 %v5079_v22  ;;  %v315_v22 = vld [vmem:[#allocation5 + $0x38] sm:$0xff] }
 0x156   :  { %v3675_v46 = vpack.c.bf16 %v315_v22, %v313_v21  ;;  %v721_v22 = vld [vmem:[#allocation5 + $0x240] sm:$0xff] }
 0x158   :  { %3982 = vmatpush1.bf16.msra.mxu1 %v5089_v25 }
 0x159   :  { %1709 = vmatprep.subr.mxu1 %v5097_v26  ;;  %v3673_v26 = vpack.c.bf16 %v310_v16, %v308_v15  ;;  %v724_v15 = vld [vmem:[#allocation5 + $0x258] sm:$0xff] }
 0x15c   :  { %1710 = vmatpush1.msra.mxu1 %v5105_v27 }
 0x15d   :  { %3534 = vmatmul.mubr.msk.f32.vlgmr.msra.gmra.mrb[24].mxu1 %vm224_vm0, %v1685_v9  ;;  %v342_v9 = vld [vmem:[#allocation5 + $0x110] sm:$0xff] }
 0x15e   :  { %1763 = vmatprep.mubr.f32.mxu1 %v4768_v1  ;;  %v3705_v16 = vpack.c.bf16 %v342_v9, %v340_v5  ;;  %v3753_v5 = vpack.c.bf16 %v751_v42, %v749_v41  ;;  %v960_v41 = vld [vmem:[#allocation5 + $0x448] sm:$0xff]  ;;  %v962_v42 = vld [vmem:[#allocation5 + $0x458] sm:$0xff] }
 0x161   :  { %3535 = vmatmul.mubr.msk.f32.gmra.mrb[26].mxu1 %vm224_vm0, %v1686_v10  ;;  %v722_v10 = vld [vmem:[#allocation5 + $0x248] sm:$0xff] }
 0x162   :  { %2122 = vmatprep.mubr.f32.mxu1 %v4768_v1  ;;  %v3723_v21 = vpack.c.bf16 %v724_v15, %v722_v10  ;;  %v753_v10 = vld [vmem:[#allocation5 + $0x340] sm:$0xff]  ;;  %v755_v15 = vld [vmem:[#allocation5 + $0x350] sm:$0xff] }
 0x1c3   :  { %v419_v25 = vpop.f32.mrb[0].mxu1  ;;  %v5201_v27 = vpop.f32.mrb[0].mxu0 }
 0x1c4   :  { %v421_v45 = vpop.f32.mrb[1].mxu1  ;;  %v299_v49 = vpop.f32.mrb[1].mxu0 }
 0x1c5   :  { %3510 = vmatprep.mubr.msk.f32.mxu0 %vm467_vm1, %v421_v45  ;;  %v728_v45 = vld [vmem:[#allocation5 + $0x278] sm:$0xff] }
 0x1c6   :  { %539 = vmatmul.mubr.f32.vlgmr.msra.gmra.mrb[4].mxu0 %v419_v25  ;;  %v723_v25 = vld [vmem:[#allocation5 + $0x250] sm:$0xff] }
 0x1c7   :  { %3674 = vmatpush1.bf16.msra.mxu0 %v3673_v26  ;;  %v425_v53 = vpop.f32.mrb[2].mxu1  ;;  %v5204_v54 = vpop.f32.mrb[2].mxu0  ;;  %v726_v26 = vld [vmem:[#allocation5 + $0x268] sm:$0xff] }
 0x1c8   :  { %3676 = vmatprep.subr.bf16.mxu0 %v3675_v46  ;;  %v427_v58 = vpop.f32.mrb[3].mxu1  ;;  %v5206_v59 = vpop.f32.mrb[3].mxu0  ;;  %v3725_v46 = vpack.c.bf16 %v723_v25, %v721_v22  ;;  %v3727_v47 = vpack.c.bf16 %v728_v45, %v726_v26  ;;  %v3757_v22 = vpack.c.bf16 %v755_v15, %v753_v10  ;;  %v931_v26 = vld [vmem:[#allocation5 + $0x360] sm:$0xff]  ;;  %v933_v45 = vld [vmem:[#allocation5 + $0x370] sm:$0xff]  ;;  %v964_v10 = vld [vmem:[#allocation5 + $0x468] sm:$0xff] }
 0x1c9   :  { %3511 = vmatprep.mubr.msk.f32.mxu0 %vm467_vm1, %v427_v58  ;;  %v731_v58 = vld [vmem:[#allocation5 + $0x290] sm:$0xff]  ;;  %v966_v15 = vld [vmem:[#allocation5 + $0x478] sm:$0xff] }
 0x1ca   :  { %545 = vmatmul.mubr.f32.gmra.mrb[6].mxu0 %v425_v53  ;;  %v3733_v0 = vpack.c.bf16 %v731_v58, %v729_v57  ;;  %v942_v57 = vld [vmem:[#allocation5 + $0x3b8] sm:$0xff] }
 0x1cb   :  { %3678 = vmatpush1.bf16.msra.mxu0 %v3677_v52  ;;  %3512 = vmatprep.mubr.msk.f32.mxu0 %vm467_vm1, %v299_v49  ;;  %v727_v49 = vld [vmem:[#allocation5 + $0x270] sm:$0xff]  ;;  %v732_v52 = vld [vmem:[#allocation5 + $0x298] sm:$0xff] }
 0x1cc   :  { %3680 = vmatprep.subr.bf16.mxu0 %v3679_v55  ;;  %v3729_v55 = vpack.c.bf16 %v727_v49, %v725_v48  ;;  %v3731_v56 = vpack.c.bf16 %v732_v52, %v730_v51  ;;  %v3777_v48 = vpack.c.bf16 %v933_v45, %v931_v26  ;;  %v935_v51 = vld [vmem:[#allocation5 + $0x380] sm:$0xff]  ;;  %v937_v52 = vld [vmem:[#allocation5 + $0x390] sm:$0xff]  ;;  %v1142_v26 = vld [vmem:[#allocation5 + $0x488] sm:$0xff] }
 0x1cd   :  { %v1144_v45 = vld [vmem:[#allocation5 + $0x498] sm:$0xff] }
 0x1cf   :  { %3682 = vmatpush1.bf16.msra.mxu0 %v3681_v62  ;;  %v736_v62 = vld [vmem:[#allocation5 + $0x2b8] sm:$0xff] }
 0x1d0   :  { %3684 = vmatprep.subr.bf16.mxu0 %v3683_v63 }
 0x1d3   :  { %3686 = vmatpush1.bf16.msra.mxu0 %v3685_v6 }
 0x1d4   :  { %3688 = vmatprep.subr.bf16.mxu0 %v3687_v7  ;;  %v3739_v7 = vpack.c.bf16 %v740_v4, %v738_v3 }
 0x1d6   :  { %v5210_v24 = vpop.f32.mrb[4].mxu1 }
 0x1d7   :  { %3690 = vmatpush1.bf16.msra.mxu0 %v3689_v14  ;;  %v711_v29 = vpop.f32.mrb[5].mxu1  ;;  %v3743_v14 = vpack.c.bf16 %v744_v13, %v742_v12 }
 0x1d8   :  { %3692 = vmatprep.subr.bf16.mxu0 %v3691_v17  ;;  %v741_v17 = vld [vmem:[#allocation5 + $0x2e0] sm:$0xff] }
 0x1da   :  { %v5212_v35 = vpop.f32.mrb[6].mxu1 }
 0x1db   :  { %3694 = vmatpush1.bf16.msra.mxu0 %v3693_v28  ;;  %v5214_v37 = vpop.f32.mrb[7].mxu1  ;;  %v3745_v28 = vpack.c.bf16 %v743_v18, %v741_v17  ;;  %v954_v17 = vld [vmem:[#allocation5 + $0x418] sm:$0xff] }
 0x1dc   :  { %3696 = vmatprep.subr.bf16.mxu0 %v3695_v30  ;;  %v3747_v30 = vpack.c.bf16 %v748_v20, %v746_v19  ;;  %v951_v19 = vld [vmem:[#allocation5 + $0x400] sm:$0xff]  ;;  %v953_v20 = vld [vmem:[#allocation5 + $0x410] sm:$0xff] }
 0x1df   :  { %3698 = vmatpush1.bf16.msra.mxu0 %v3697_v36 }
 0x1e0   :  { %3700 = vmatprep.subr.bf16.mxu0 %v3699_v38  ;;  %v3749_v38 = vpack.c.bf16 %v747_v32, %v745_v31  ;;  %v3797_v32 = vpack.c.bf16 %v953_v20, %v951_v19  ;;  %v1164_v19 = vld [vmem:[#allocation5 + $0x538] sm:$0xff] }
 0x1e3   :  { %3702 = vmatpush1.bf16.msra.mxu0 %v3701_v43  ;;  %v754_v43 = vld [vmem:[#allocation5 + $0x348] sm:$0xff] }
 0x1e4   :  { %3704 = vmatprep.subr.bf16.mxu0 %v3703_v44  ;;  %v756_v44 = vld [vmem:[#allocation5 + $0x358] sm:$0xff] }
 0x1e5   :  { %v3755_v9 = vpack.c.bf16 %v756_v44, %v754_v43  ;;  %v3803_v44 = vpack.c.bf16 %v962_v42, %v960_v41 }
 0x1e7   :  { %3706 = vmatpush1.bf16.msra.mxu0 %v3705_v16  ;;  %v932_v16 = vld [vmem:[#allocation5 + $0x368] sm:$0xff] }
 0x1e8   :  { %3724 = vmatprep.subr.bf16.mxu0 %v3723_v21  ;;  %v5216_v50 = vpop.f32.mrb[8].mxu1  ;;  %v934_v21 = vld [vmem:[#allocation5 + $0x378] sm:$0xff] }
 0x1e9   :  { %v5218_v53 = vpop.f32.mrb[9].mxu1  ;;  %v3775_v25 = vpack.c.bf16 %v934_v21, %v932_v16  ;;  %v3807_v21 = vpack.c.bf16 %v966_v15, %v964_v10  ;;  %v1170_v10 = vld [vmem:[#allocation5 + $0x568] sm:$0xff]  ;;  %v1172_v15 = vld [vmem:[#allocation5 + $0x578] sm:$0xff] }
 0x1ea   :  { %622 = vmatmul.mubr.f32.vlgmr.msra.gmra.mrb[4].mxu0 %v5201_v27  ;;  %v3735_v27 = vpack.c.bf16 %v736_v62, %v734_v61  ;;  %v3781_v61 = vpack.c.bf16 %v937_v52, %v935_v51  ;;  %v1146_v51 = vld [vmem:[#allocation5 + $0x4a8] sm:$0xff]  ;;  %v1148_v52 = vld [vmem:[#allocation5 + $0x4b8] sm:$0xff] }
 0x1eb   :  { %3726 = vmatpush1.bf16.msra.mxu0 %v3725_v46  ;;  %3513 = vmatprep.mubr.msk.f32.mxu0 %vm467_vm1, %v5206_v59  ;;  %v735_v59 = vld [vmem:[#allocation5 + $0x2b0] sm:$0xff]  ;;  %v936_v46 = vld [vmem:[#allocation5 + $0x388] sm:$0xff] }
 0x1ec   :  { %3728 = vmatprep.subr.bf16.mxu0 %v3727_v47  ;;  %v5223_v60 = vpop.f32.mrb[10].mxu1  ;;  %v3737_v6 = vpack.c.bf16 %v735_v59, %v733_v2  ;;  %v938_v47 = vld [vmem:[#allocation5 + $0x398] sm:$0xff]  ;;  %v944_v2 = vld [vmem:[#allocation5 + $0x3c8] sm:$0xff] }
 0x1ed   :  { %v5225_v63 = vpop.f32.mrb[11].mxu1  ;;  %v3779_v49 = vpack.c.bf16 %v938_v47, %v936_v46  ;;  %v946_v59 = vld [vmem:[#allocation5 + $0x3d8] sm:$0xff]  ;;  %v3827_v47 = vpack.c.bf16 %v1144_v45, %v1142_v26  ;;  %v1174_v26 = vld [vmem:[#allocation5 + $0x588] sm:$0xff] }
 0x1ee   :  { %628 = vmatmul.mubr.f32.gmra.mrb[6].mxu0 %v5204_v54  ;;  %v3741_v54 = vpack.c.bf16 %v739_v11, %v737_v8  ;;  %v948_v8 = vld [vmem:[#allocation5 + $0x3e8] sm:$0xff]  ;;  %v950_v11 = vld [vmem:[#allocation5 + $0x3f8] sm:$0xff] }
 0x1ef   :  { %3730 = vmatpush1.bf16.msra.mxu0 %v3729_v55  ;;  %3516 = vmatprep.mubr.msk.f32.mxu0 %vm467_vm1, %v711_v29  ;;  %v3791_v13 = vpack.c.bf16 %v950_v11, %v948_v8  ;;  %v1153_v11 = vld [vmem:[#allocation5 + $0x4e0] sm:$0xff]  ;;  %v1176_v45 = vld [vmem:[#allocation5 + $0x598] sm:$0xff] }
 0x1f0   :  { %3732 = vmatprep.subr.bf16.mxu0 %v3731_v56  ;;  %v940_v56 = vld [vmem:[#allocation5 + $0x3a8] sm:$0xff] }
 0x1f1   :  { %v3783_v62 = vpack.c.bf16 %v942_v57, %v940_v56  ;;  %v3831_v57 = vpack.c.bf16 %v1148_v52, %v1146_v51  ;;  %v1352_v51 = vld [vmem:[#allocation5 + $0x5a8] sm:$0xff]  ;;  %v1354_v52 = vld [vmem:[#allocation5 + $0x5b8] sm:$0xff] }
 0x1f3   :  { %3734 = vmatpush1.bf16.msra.mxu0 %v3733_v0  ;;  %v939_v0 = vld [vmem:[#allocation5 + $0x3a0] sm:$0xff] }
 0x1f4   :  { %3736 = vmatprep.subr.bf16.mxu0 %v3735_v27  ;;  %v941_v27 = vld [vmem:[#allocation5 + $0x3b0] sm:$0xff] }
 0x1f5   :  { %v3785_v3 = vpack.c.bf16 %v941_v27, %v939_v0  ;;  %v1150_v0 = vld [vmem:[#allocation5 + $0x4c8] sm:$0xff]  ;;  %v1152_v27 = vld [vmem:[#allocation5 + $0x4d8] sm:$0xff] }
 0x1f7   :  { %3738 = vmatpush1.bf16.msra.mxu0 %v3737_v6  ;;  %v943_v6 = vld [vmem:[#allocation5 + $0x3c0] sm:$0xff] }
 0x1f8   :  { %3740 = vmatprep.subr.bf16.mxu0 %v3739_v7  ;;  %v945_v7 = vld [vmem:[#allocation5 + $0x3d0] sm:$0xff] }
 0x1f9   :  { %v3789_v12 = vpack.c.bf16 %v945_v7, %v943_v6  ;;  %v1154_v6 = vld [vmem:[#allocation5 + $0x4e8] sm:$0xff]  ;;  %v1156_v7 = vld [vmem:[#allocation5 + $0x4f8] sm:$0xff] }
 0x1fa   :  { %v5229_v23 = vpop.f32.mrb[12].mxu1 }
 0x1fb   :  { %3742 = vmatpush1.bf16.msra.mxu0 %v3741_v54  ;;  %v5231_v29 = vpop.f32.mrb[13].mxu1  ;;  %v949_v54 = vld [vmem:[#allocation5 + $0x3f0] sm:$0xff] }
 0x1fc   :  { %3744 = vmatprep.subr.bf16.mxu0 %v3743_v14  ;;  %v952_v14 = vld [vmem:[#allocation5 + $0x408] sm:$0xff] }
 0x1fd   :  { %v3795_v18 = vpack.c.bf16 %v954_v17, %v952_v14 }
 0x1fe   :  { %v5233_v36 = vpop.f32.mrb[14].mxu1 }
 0x1ff   :  { %3746 = vmatpush1.bf16.msra.mxu0 %v3745_v28  ;;  %v5235_v39 = vpop.f32.mrb[15].mxu1  ;;  %v956_v28 = vld [vmem:[#allocation5 + $0x428] sm:$0xff] }
 0x200   :  { %3748 = vmatprep.subr.bf16.mxu0 %v3747_v30  ;;  %v958_v30 = vld [vmem:[#allocation5 + $0x438] sm:$0xff] }
 0x201   :  { %v3799_v34 = vpack.c.bf16 %v958_v30, %v956_v28 }
 0x203   :  { %3750 = vmatpush1.bf16.msra.mxu0 %v3749_v38  ;;  %v955_v38 = vld [vmem:[#allocation5 + $0x420] sm:$0xff] }
 0x204   :  { %3752 = vmatprep.subr.bf16.mxu0 %v3751_v40  ;;  %v957_v40 = vld [vmem:[#allocation5 + $0x430] sm:$0xff] }
 0x205   :  { %v3801_v43 = vpack.c.bf16 %v957_v40, %v955_v38  ;;  %v1166_v38 = vld [vmem:[#allocation5 + $0x548] sm:$0xff]  ;;  %v1168_v40 = vld [vmem:[#allocation5 + $0x558] sm:$0xff] }
 0x207   :  { %3754 = vmatpush1.bf16.msra.mxu0 %v3753_v5  ;;  %v959_v5 = vld [vmem:[#allocation5 + $0x440] sm:$0xff] }
 0x208   :  { %3756 = vmatprep.subr.bf16.mxu0 %v3755_v9  ;;  %v961_v9 = vld [vmem:[#allocation5 + $0x450] sm:$0xff] }
 0x209   :  { %v3805_v16 = vpack.c.bf16 %v961_v9, %v959_v5  ;;  %v1165_v5 = vld [vmem:[#allocation5 + $0x540] sm:$0xff]  ;;  %v1167_v9 = vld [vmem:[#allocation5 + $0x550] sm:$0xff] }
 0x20b   :  { %3758 = vmatpush1.bf16.msra.mxu0 %v3757_v22  ;;  %v963_v22 = vld [vmem:[#allocation5 + $0x460] sm:$0xff] }
 0x20c   :  { %3776 = vmatprep.subr.bf16.mxu0 %v3775_v25  ;;  %v5237_v55 = vpop.f32.mrb[16].mxu1  ;;  %v965_v25 = vld [vmem:[#allocation5 + $0x470] sm:$0xff] }
 0x20d   :  { %v5239_v58 = vpop.f32.mrb[17].mxu1  ;;  %v3809_v46 = vpack.c.bf16 %v965_v25, %v963_v22  ;;  %v1169_v22 = vld [vmem:[#allocation5 + $0x560] sm:$0xff]  ;;  %v1171_v25 = vld [vmem:[#allocation5 + $0x570] sm:$0xff] }
 0x20e   :  { %828 = vmatmul.mubr.f32.vlgmr.msra.gmra.mrb[4].mxu0 %v5210_v24  ;;  %v3787_v24 = vpack.c.bf16 %v946_v59, %v944_v2  ;;  %v3835_v59 = vpack.c.bf16 %v1152_v27, %v1150_v0  ;;  %v1356_v0 = vld [vmem:[#allocation5 + $0x5c8] sm:$0xff]  ;;  %v1358_v27 = vld [vmem:[#allocation5 + $0x5d8] sm:$0xff] }
 0x20f   :  { %3778 = vmatpush1.bf16.msra.mxu0 %v3777_v48  ;;  %3517 = vmatprep.mubr.msk.f32.mxu0 %vm467_vm1, %v5214_v37  ;;  %v1141_v48 = vld [vmem:[#allocation5 + $0x480] sm:$0xff] }
 0x210   :  { %3780 = vmatprep.subr.bf16.mxu0 %v3779_v49  ;;  %v5247_v4 = vpop.f32.mrb[18].mxu1  ;;  %v1143_v49 = vld [vmem:[#allocation5 + $0x490] sm:$0xff] }
 0x211   :  { %v5249_v37 = vpop.f32.mrb[19].mxu1  ;;  %v3829_v56 = vpack.c.bf16 %v1143_v49, %v1141_v48  ;;  %v1173_v48 = vld [vmem:[#allocation5 + $0x580] sm:$0xff]  ;;  %v1175_v49 = vld [vmem:[#allocation5 + $0x590] sm:$0xff] }
 0x212   :  { %834 = vmatmul.mubr.f32.gmra.mrb[6].mxu0 %v5212_v35  ;;  %v947_v35 = vld [vmem:[#allocation5 + $0x3e0] sm:$0xff] }
 0x213   :  { %3782 = vmatpush1.bf16.msra.mxu0 %v3781_v61  ;;  %3520 = vmatprep.mubr.msk.f32.mxu0 %vm467_vm1, %v5218_v53  ;;  %v3793_v53 = vpack.c.bf16 %v949_v54, %v947_v35  ;;  %v1145_v61 = vld [vmem:[#allocation5 + $0x4a0] sm:$0xff]  ;;  %v1160_v35 = vld [vmem:[#allocation5 + $0x518] sm:$0xff] }
 0x214   :  { %3784 = vmatprep.subr.bf16.mxu0 %v3783_v62  ;;  %v1147_v62 = vld [vmem:[#allocation5 + $0x4b0] sm:$0xff] }
 0x215   :  { %v3833_v2 = vpack.c.bf16 %v1147_v62, %v1145_v61  ;;  %v1351_v61 = vld [vmem:[#allocation5 + $0x5a0] sm:$0xff]  ;;  %v1353_v62 = vld [vmem:[#allocation5 + $0x5b0] sm:$0xff] }
 0x217   :  { %3786 = vmatpush1.bf16.msra.mxu0 %v3785_v3  ;;  %v1149_v3 = vld [vmem:[#allocation5 + $0x4c0] sm:$0xff] }
 0x218   :  { %3788 = vmatprep.subr.bf16.mxu0 %v3787_v24  ;;  %v1151_v24 = vld [vmem:[#allocation5 + $0x4d0] sm:$0xff] }
 0x219   :  { %v3837_v8 = vpack.c.bf16 %v1151_v24, %v1149_v3  ;;  %v1355_v3 = vld [vmem:[#allocation5 + $0x5c0] sm:$0xff]  ;;  %v1357_v24 = vld [vmem:[#allocation5 + $0x5d0] sm:$0xff] }
 0x21b   :  { %3790 = vmatpush1.bf16.msra.mxu0 %v3789_v12  ;;  %v1155_v12 = vld [vmem:[#allocation5 + $0x4f0] sm:$0xff] }
 0x21c   :  { %3792 = vmatprep.subr.bf16.mxu0 %v3791_v13  ;;  %v3841_v14 = vpack.c.bf16 %v1155_v12, %v1153_v11  ;;  %v1359_v11 = vld [vmem:[#allocation5 + $0x5e0] sm:$0xff]  ;;  %v1361_v12 = vld [vmem:[#allocation5 + $0x5f0] sm:$0xff] }
 0x21e   :  { %v5251_v31 = vpop.f32.mrb[20].mxu1 }
 0x21f   :  { %3794 = vmatpush1.bf16.msra.mxu0 %v3793_v53  ;;  %v5253_v33 = vpop.f32.mrb[21].mxu1  ;;  %v1159_v53 = vld [vmem:[#allocation5 + $0x510] sm:$0xff] }
 0x220   :  { %3796 = vmatprep.subr.bf16.mxu0 %v3795_v18  ;;  %v1162_v18 = vld [vmem:[#allocation5 + $0x528] sm:$0xff] }
 0x221   :  { %v3847_v30 = vpack.c.bf16 %v1164_v19, %v1162_v18  ;;  %v1370_v18 = vld [vmem:[#allocation5 + $0x638] sm:$0xff] }
 0x222   :  { %v5261_v13 = vpop.f32.mrb[22].mxu1 }
 0x223   :  { %3798 = vmatpush1.bf16.msra.mxu0 %v3797_v32  ;;  %v5263_v54 = vpop.f32.mrb[23].mxu1  ;;  %v1161_v32 = vld [vmem:[#allocation5 + $0x520] sm:$0xff] }
 0x224   :  { %3800 = vmatprep.subr.bf16.mxu0 %v3799_v34  ;;  %v1163_v34 = vld [vmem:[#allocation5 + $0x530] sm:$0xff] }
 0x225   :  { %v3849_v42 = vpack.c.bf16 %v1163_v34, %v1161_v32  ;;  %v1372_v32 = vld [vmem:[#allocation5 + $0x648] sm:$0xff]  ;;  %v1374_v34 = vld [vmem:[#allocation5 + $0x658] sm:$0xff] }
 0x227   :  { %3802 = vmatpush1.bf16.msra.mxu0 %v3801_v43 }
 0x228   :  { %3804 = vmatprep.subr.bf16.mxu0 %v3803_v44  ;;  %v3851_v44 = vpack.c.bf16 %v1168_v40, %v1166_v38  ;;  %v3899_v38 = vpack.c.bf16 %v1374_v34, %v1372_v32  ;;  %v1371_v40 = vld [vmem:[#allocation5 + $0x640] sm:$0xff]  ;;  %v1582_v32 = vld [vmem:[#allocation5 + $0x768] sm:$0xff]  ;;  %v1584_v34 = vld [vmem:[#allocation5 + $0x778] sm:$0xff] }
 0x22b   :  { %3806 = vmatpush1.bf16.msra.mxu0 %v3805_v16  ;;  %v3853_v16 = vpack.c.bf16 %v1167_v9, %v1165_v5 }
 0x22c   :  { %3808 = vmatprep.subr.bf16.mxu0 %v3807_v21  ;;  %v3855_v21 = vpack.c.bf16 %v1172_v15, %v1170_v10  ;;  %v1375_v10 = vld [vmem:[#allocation5 + $0x660] sm:$0xff]  ;;  %v1377_v15 = vld [vmem:[#allocation5 + $0x670] sm:$0xff] }
 0x22f   :  { %3810 = vmatpush1.bf16.msra.mxu0 %v3809_v46  ;;  %v3857_v46 = vpack.c.bf16 %v1171_v25, %v1169_v22  ;;  %v3905_v22 = vpack.c.bf16 %v1377_v15, %v1375_v10  ;;  %v1590_v10 = vld [vmem:[#allocation5 + $0x7a8] sm:$0xff]  ;;  %v1592_v15 = vld [vmem:[#allocation5 + $0x7b8] sm:$0xff] }
 0x230   :  { %3828 = vmatprep.subr.bf16.mxu0 %v3827_v47  ;;  %v5265_v20 = vpop.f32.mrb[24].mxu1  ;;  %v3859_v47 = vpack.c.bf16 %v1176_v45, %v1174_v26  ;;  %v1379_v26 = vld [vmem:[#allocation5 + $0x680] sm:$0xff]  ;;  %v1381_v45 = vld [vmem:[#allocation5 + $0x690] sm:$0xff] }
 0x231   :  { %v5267_v28 = vpop.f32.mrb[25].mxu1 }
 0x232   :  { %1038 = vmatmul.mubr.f32.vlgmr.msra.gmra.mrb[4].mxu0 %v5216_v50  ;;  %v3839_v50 = vpack.c.bf16 %v1156_v7, %v1154_v6  ;;  %v1360_v6 = vld [vmem:[#allocation5 + $0x5e8] sm:$0xff]  ;;  %v1362_v7 = vld [vmem:[#allocation5 + $0x5f8] sm:$0xff] }
 0x233   :  { %3830 = vmatpush1.bf16.msra.mxu0 %v3829_v56  ;;  %3521 = vmatprep.mubr.msk.f32.mxu0 %vm467_vm1, %v5225_v63  ;;  %v1158_v63 = vld [vmem:[#allocation5 + $0x508] sm:$0xff]  ;;  %v3861_v56 = vpack.c.bf16 %v1175_v49, %v1173_v48  ;;  %v3909_v48 = vpack.c.bf16 %v1381_v45, %v1379_v26  ;;  %v1596_v45 = vld [vmem:[#allocation5 + $0x7d8] sm:$0xff] }
 0x234   :  { %3832 = vmatprep.subr.bf16.mxu0 %v3831_v57  ;;  %v3843_v17 = vpack.c.bf16 %v1160_v35, %v1158_v63  ;;  %v5269_v41 = vpop.f32.mrb[26].mxu1  ;;  %v3879_v57 = vpack.c.bf16 %v1354_v52, %v1352_v51  ;;  %v1364_v63 = vld [vmem:[#allocation5 + $0x608] sm:$0xff]  ;;  %v1366_v35 = vld [vmem:[#allocation5 + $0x618] sm:$0xff]  ;;  %v1383_v51 = vld [vmem:[#allocation5 + $0x6a0] sm:$0xff] }
 0x235   :  { %v5271_v43 = vpop.f32.mrb[27].mxu1  ;;  %v1385_v52 = vld [vmem:[#allocation5 + $0x6b0] sm:$0xff]  ;;  %v1594_v26 = vld [vmem:[#allocation5 + $0x7c8] sm:$0xff] }
 0x236   :  { %1044 = vmatmul.mubr.f32.gmra.mrb[6].mxu0 %v5223_v60  ;;  %v1157_v60 = vld [vmem:[#allocation5 + $0x500] sm:$0xff] }
 0x237   :  { %3834 = vmatpush1.bf16.msra.mxu0 %v3833_v2  ;;  %3524 = vmatprep.mubr.msk.f32.mxu0 %vm467_vm1, %v5231_v29  ;;  %v3845_v29 = vpack.c.bf16 %v1159_v53, %v1157_v60  ;;  %v3881_v2 = vpack.c.bf16 %v1353_v62, %v1351_v61  ;;  %v1365_v60 = vld [vmem:[#allocation5 + $0x610] sm:$0xff]  ;;  %v1368_v53 = vld [vmem:[#allocation5 + $0x628] sm:$0xff]  ;;  %v3913_v61 = vpack.c.bf16 %v1385_v52, %v1383_v51  ;;  %v1774_v52 = vld [vmem:[#allocation5 + $0x7f8] sm:$0xff] }
 0x238   :  { %3836 = vmatprep.subr.bf16.mxu0 %v3835_v59  ;;  %v3883_v59 = vpack.c.bf16 %v1358_v27, %v1356_v0  ;;  %v3895_v19 = vpack.c.bf16 %v1370_v18, %v1368_v53  ;;  %v1561_v0 = vld [vmem:[#allocation5 + $0x6c0] sm:$0xff]  ;;  %v1563_v27 = vld [vmem:[#allocation5 + $0x6d0] sm:$0xff]  ;;  %v1578_v18 = vld [vmem:[#allocation5 + $0x748] sm:$0xff] }
 0x239   :  { %v1575_v53 = vld [vmem:[#allocation5 + $0x730] sm:$0xff]  ;;  %v1772_v51 = vld [vmem:[#allocation5 + $0x7e8] sm:$0xff] }
 0x23b   :  { %3838 = vmatpush1.bf16.msra.mxu0 %v3837_v8  ;;  %v3885_v8 = vpack.c.bf16 %v1357_v24, %v1355_v3  ;;  %v3933_v3 = vpack.c.bf16 %v1563_v27, %v1561_v0  ;;  %v1776_v0 = vld [vmem:[#allocation5 + $0x808] sm:$0xff]  ;;  %v1778_v27 = vld [vmem:[#allocation5 + $0x818] sm:$0xff] }
 0x23c   :  { %3840 = vmatprep.subr.bf16.mxu0 %v3839_v50  ;;  %v3887_v50 = vpack.c.bf16 %v1362_v7, %v1360_v6  ;;  %v1565_v6 = vld [vmem:[#allocation5 + $0x6e0] sm:$0xff]  ;;  %v1567_v7 = vld [vmem:[#allocation5 + $0x6f0] sm:$0xff] }
 0x23f   :  { %3842 = vmatpush1.bf16.msra.mxu0 %v3841_v14  ;;  %v3889_v14 = vpack.c.bf16 %v1361_v12, %v1359_v11  ;;  %v3937_v11 = vpack.c.bf16 %v1567_v7, %v1565_v6  ;;  %v1780_v6 = vld [vmem:[#allocation5 + $0x828] sm:$0xff]  ;;  %v1782_v7 = vld [vmem:[#allocation5 + $0x838] sm:$0xff] }
 0x240   :  { %3844 = vmatprep.subr.bf16.mxu0 %v3843_v17  ;;  %v1363_v17 = vld [vmem:[#allocation5 + $0x600] sm:$0xff] }
 0x243   :  { %3846 = vmatpush1.bf16.msra.mxu0 %v3845_v29  ;;  %v1367_v29 = vld [vmem:[#allocation5 + $0x620] sm:$0xff] }
 0x244   :  { %3848 = vmatprep.subr.bf16.mxu0 %v3847_v30  ;;  %v1369_v30 = vld [vmem:[#allocation5 + $0x630] sm:$0xff] }
 0x247   :  { %3850 = vmatpush1.bf16.msra.mxu0 %v3849_v42  ;;  %v1376_v42 = vld [vmem:[#allocation5 + $0x668] sm:$0xff] }
 0x248   :  { %3852 = vmatprep.subr.bf16.mxu0 %v3851_v44  ;;  %v1378_v44 = vld [vmem:[#allocation5 + $0x678] sm:$0xff] }
 0x249   :  { %v3903_v9 = vpack.c.bf16 %v1378_v44, %v1376_v42 }
 0x24b   :  { %3854 = vmatpush1.bf16.msra.mxu0 %v3853_v16  ;;  %v1380_v16 = vld [vmem:[#allocation5 + $0x688] sm:$0xff] }
 0x24c   :  { %3856 = vmatprep.subr.bf16.mxu0 %v3855_v21  ;;  %v1382_v21 = vld [vmem:[#allocation5 + $0x698] sm:$0xff] }
 0x24d   :  { %v3907_v25 = vpack.c.bf16 %v1382_v21, %v1380_v16  ;;  %v3959_v21 = vpack.c.bf16 %v1592_v15, %v1590_v10  ;;  %v1804_v10 = vld [vmem:[#allocation5 + $0x8e8] sm:$0xff]  ;;  %v1806_v15 = vld [vmem:[#allocation5 + $0x8f8] sm:$0xff] }
 0x24f   :  { %3858 = vmatpush1.bf16.msra.mxu0 %v3857_v46  ;;  %v1384_v46 = vld [vmem:[#allocation5 + $0x6a8] sm:$0xff] }
 0x250   :  { %3860 = vmatprep.subr.bf16.mxu0 %v3859_v47  ;;  %v1386_v47 = vld [vmem:[#allocation5 + $0x6b8] sm:$0xff] }
 0x251   :  { %v3911_v49 = vpack.c.bf16 %v1386_v47, %v1384_v46  ;;  %v3963_v47 = vpack.c.bf16 %v1596_v45, %v1594_v26  ;;  %v1896_v45 = vlaneseq }
 0x253   :  { %3862 = vmatpush1.bf16.msra.mxu0 %v3861_v56  ;;  %v1562_v56 = vld [vmem:[#allocation5 + $0x6c8] sm:$0xff] }
 0x254   :  { %3880 = vmatprep.subr.bf16.mxu0 %v3879_v57  ;;  %v1564_v57 = vld [vmem:[#allocation5 + $0x6d8] sm:$0xff] }
 0x255   :  { %v3931_v62 = vpack.c.bf16 %v1564_v57, %v1562_v56  ;;  %v3983_v57 = vpack.c.bf16 %v1774_v52, %v1772_v51 }
 0x256   :  { %1248 = vmatmul.mubr.f32.vlgmr.msra.gmra.mrb[4].mxu0 %v5229_v23  ;;  %v3891_v23 = vpack.c.bf16 %v1366_v35, %v1364_v63  ;;  %v1569_v63 = vld [vmem:[#allocation5 + $0x700] sm:$0xff]  ;;  %v1571_v35 = vld [vmem:[#allocation5 + $0x710] sm:$0xff] }
 0x257   :  { %3882 = vmatpush1.bf16.msra.mxu0 %v3881_v2  ;;  %3525 = vmatprep.mubr.msk.f32.mxu0 %vm467_vm1, %v5235_v39  ;;  %v3893_v39 = vpack.c.bf16 %v1365_v60, %v1363_v17  ;;  %v1566_v2 = vld [vmem:[#allocation5 + $0x6e8] sm:$0xff]  ;;  %v3941_v17 = vpack.c.bf16 %v1571_v35, %v1569_v63  ;;  %v1573_v60 = vld [vmem:[#allocation5 + $0x720] sm:$0xff]  ;;  %v1786_v35 = vld [vmem:[#allocation5 + $0x858] sm:$0xff] }
 0x258   :  { %3884 = vmatprep.subr.bf16.mxu0 %v3883_v59  ;;  %v1568_v59 = vld [vmem:[#allocation5 + $0x6f8] sm:$0xff]  ;;  %v1784_v63 = vld [vmem:[#allocation5 + $0x848] sm:$0xff] }
 0x259   :  { %v3935_v24 = vpack.c.bf16 %v1568_v59, %v1566_v2  ;;  %v3987_v59 = vpack.c.bf16 %v1778_v27, %v1776_v0 }
 0x25a   :  { %1254 = vmatmul.mubr.f32.gmra.mrb[6].mxu0 %v5233_v36  ;;  %v3897_v36 = vpack.c.bf16 %v1369_v30, %v1367_v29  ;;  %v1577_v29 = vld [vmem:[#allocation5 + $0x740] sm:$0xff]  ;;  %v1579_v30 = vld [vmem:[#allocation5 + $0x750] sm:$0xff] }
 0x25b   :  { %3886 = vmatpush1.bf16.msra.mxu0 %v3885_v8  ;;  %3528 = vmatprep.mubr.msk.f32.mxu0 %vm467_vm1, %v5239_v58  ;;  %v1373_v58 = vld [vmem:[#allocation5 + $0x650] sm:$0xff]  ;;  %v1570_v8 = vld [vmem:[#allocation5 + $0x708] sm:$0xff] }
 0x25c   :  { %3888 = vmatprep.subr.bf16.mxu0 %v3887_v50  ;;  %v3901_v5 = vpack.c.bf16 %v1373_v58, %v1371_v40  ;;  %v1572_v50 = vld [vmem:[#allocation5 + $0x718] sm:$0xff]  ;;  %v1586_v40 = vld [vmem:[#allocation5 + $0x788] sm:$0xff] }
 0x25d   :  { %v3939_v12 = vpack.c.bf16 %v1572_v50, %v1570_v8  ;;  %v1588_v58 = vld [vmem:[#allocation5 + $0x798] sm:$0xff]  ;;  %v3991_v50 = vpack.c.bf16 %v1782_v7, %v1780_v6 }
 0x25e   :  { %v3955_v44 = vpack.c.bf16 %v1588_v58, %v1586_v40  ;;  %v1800_v40 = vld [vmem:[#allocation5 + $0x8c8] sm:$0xff]  ;;  %v1802_v58 = vld [vmem:[#allocation5 + $0x8d8] sm:$0xff] }
 0x25f   :  { %3890 = vmatpush1.bf16.msra.mxu0 %v3889_v14  ;;  %v1574_v14 = vld [vmem:[#allocation5 + $0x728] sm:$0xff] }
 0x260   :  { %3892 = vmatprep.subr.bf16.mxu0 %v3891_v23  ;;  %v1576_v23 = vld [vmem:[#allocation5 + $0x738] sm:$0xff] }
 0x263   :  { %3894 = vmatpush1.bf16.msra.mxu0 %v3893_v39  ;;  %v1580_v39 = vld [vmem:[#allocation5 + $0x758] sm:$0xff] }
 0x264   :  { %3896 = vmatprep.subr.bf16.mxu0 %v3895_v19  ;;  %v3947_v19 = vpack.c.bf16 %v1580_v39, %v1578_v18  ;;  %v1787_v18 = vld [vmem:[#allocation5 + $0x860] sm:$0xff]  ;;  %v1789_v39 = vld [vmem:[#allocation5 + $0x870] sm:$0xff] }
 0x267   :  { %3898 = vmatpush1.bf16.msra.mxu0 %v3897_v36  ;;  %v3951_v36 = vpack.c.bf16 %v1584_v34, %v1582_v32  ;;  %v1796_v32 = vld [vmem:[#allocation5 + $0x8a8] sm:$0xff]  ;;  %v1798_v34 = vld [vmem:[#allocation5 + $0x8b8] sm:$0xff] }
 0x268   :  { %3900 = vmatprep.subr.bf16.mxu0 %v3899_v38  ;;  %v1581_v38 = vld [vmem:[#allocation5 + $0x760] sm:$0xff] }
 0x26b   :  { %3902 = vmatpush1.bf16.msra.mxu0 %v3901_v5  ;;  %v1585_v5 = vld [vmem:[#allocation5 + $0x780] sm:$0xff] }
 0x26c   :  { %3904 = vmatprep.subr.bf16.mxu0 %v3903_v9  ;;  %v1587_v9 = vld [vmem:[#allocation5 + $0x790] sm:$0xff] }
 0x26d   :  { %v3957_v16 = vpack.c.bf16 %v1587_v9, %v1585_v5  ;;  %v1799_v5 = vld [vmem:[#allocation5 + $0x8c0] sm:$0xff]  ;;  %v1801_v9 = vld [vmem:[#allocation5 + $0x8d0] sm:$0xff] }
 0x26f   :  { %3906 = vmatpush1.bf16.msra.mxu0 %v3905_v22  ;;  %v1589_v22 = vld [vmem:[#allocation5 + $0x7a0] sm:$0xff] }
 0x270   :  { %3908 = vmatprep.subr.bf16.mxu0 %v3907_v25  ;;  %v1591_v25 = vld [vmem:[#allocation5 + $0x7b0] sm:$0xff] }
 0x271   :  { %v3961_v46 = vpack.c.bf16 %v1591_v25, %v1589_v22  ;;  %v1803_v22 = vld [vmem:[#allocation5 + $0x8e0] sm:$0xff]  ;;  %v1805_v25 = vld [vmem:[#allocation5 + $0x8f0] sm:$0xff] }
 0x272   :  { %v4017_v26 = vpack.c.bf16 %v1805_v25, %v1803_v22 }
 0x273   :  { %3910 = vmatpush1.bf16.msra.mxu0 %v3909_v48  ;;  %v1593_v48 = vld [vmem:[#allocation5 + $0x7c0] sm:$0xff] }
 0x274   :  { %3912 = vmatprep.subr.bf16.mxu0 %v3911_v49  ;;  %v1595_v49 = vld [vmem:[#allocation5 + $0x7d0] sm:$0xff] }
 0x275   :  { %v3965_v56 = vpack.c.bf16 %v1595_v49, %v1593_v48  ;;  %v1894_v48 = vld [vmem:[#allocation7] sm:$0x3] }
 0x277   :  { %3914 = vmatpush1.bf16.msra.mxu0 %v3913_v61  ;;  %v1771_v61 = vld [vmem:[#allocation5 + $0x7e0] sm:$0xff] }
 0x278   :  { %3932 = vmatprep.subr.bf16.mxu0 %v3931_v62  ;;  %v1773_v62 = vld [vmem:[#allocation5 + $0x7f0] sm:$0xff] }
 0x279   :  { %v3985_v2 = vpack.c.bf16 %v1773_v62, %v1771_v61 }
 0x27a   :  { %1458 = vmatmul.mubr.f32.vlgmr.msra.gmra.mrb[4].mxu0 %v5237_v55  ;;  %v3943_v55 = vpack.c.bf16 %v1576_v23, %v1574_v14  ;;  %v1783_v23 = vld [vmem:[#allocation5 + $0x840] sm:$0xff] }
 0x27b   :  { %3934 = vmatpush1.bf16.msra.mxu0 %v3933_v3  ;;  %3529 = vmatprep.mubr.msk.f32.mxu0 %vm467_vm1, %v5249_v37  ;;  %v3945_v37 = vpack.c.bf16 %v1575_v53, %v1573_v60  ;;  %v1775_v3 = vld [vmem:[#allocation5 + $0x800] sm:$0xff]  ;;  %v1790_v60 = vld [vmem:[#allocation5 + $0x878] sm:$0xff] }
 0x27c   :  { %3936 = vmatprep.subr.bf16.mxu0 %v3935_v24  ;;  %v1777_v24 = vld [vmem:[#allocation5 + $0x810] sm:$0xff] }
 0x27d   :  { %v3989_v8 = vpack.c.bf16 %v1777_v24, %v1775_v3  ;;  %v2133_v3 = vld [vmem:[#allocation10 + $0x218] sm:$0xff] }
 0x27e   :  { %1464 = vmatmul.mubr.f32.gmra.mrb[6].mxu0 %v5247_v4  ;;  %v3949_v4 = vpack.c.bf16 %v1579_v30, %v1577_v29  ;;  %v1791_v30 = vld [vmem:[#allocation5 + $0x880] sm:$0xff] }
 0x27f   :  { %3938 = vmatpush1.bf16.msra.mxu0 %v3937_v11  ;;  %3532 = vmatprep.mubr.msk.f32.mxu0 %vm467_vm1, %v5253_v33  ;;  %v1583_v33 = vld [vmem:[#allocation5 + $0x770] sm:$0xff]  ;;  %v1779_v11 = vld [vmem:[#allocation5 + $0x820] sm:$0xff] }
 0x280   :  { %3940 = vmatprep.subr.bf16.mxu0 %v3939_v12  ;;  %v3953_v42 = vpack.c.bf16 %v1583_v33, %v1581_v38  ;;  %v1781_v12 = vld [vmem:[#allocation5 + $0x830] sm:$0xff]  ;;  %v1795_v38 = vld [vmem:[#allocation5 + $0x8a0] sm:$0xff] }
 0x281   :  { %v3993_v14 = vpack.c.bf16 %v1781_v12, %v1779_v11  ;;  %v1797_v33 = vld [vmem:[#allocation5 + $0x8b0] sm:$0xff]  ;;  %v2130_v11 = vld [vmem:[#allocation10 + $0x200] sm:$0xff] }
 0x282   :  { %v2132_v12 = vld [vmem:[#allocation10 + $0x210] sm:$0xff] }
 0x283   :  { %3942 = vmatpush1.bf16.msra.mxu0 %v3941_v17  ;;  %v1785_v17 = vld [vmem:[#allocation5 + $0x850] sm:$0xff] }
 0x284   :  { %3944 = vmatprep.subr.bf16.mxu0 %v3943_v55  ;;  %v1788_v55 = vld [vmem:[#allocation5 + $0x868] sm:$0xff] }
 0x285   :  { %v3999_v53 = vpack.c.bf16 %v1790_v60, %v1788_v55  ;;  %v2134_v55 = vld [vmem:[#allocation10 + $0x220] sm:$0xff]  ;;  %v2136_v60 = vld [vmem:[#allocation10 + $0x230] sm:$0xff] }
 0x287   :  { %3946 = vmatpush1.bf16.msra.mxu0 %v3945_v37  ;;  %v1792_v37 = vld [vmem:[#allocation5 + $0x888] sm:$0xff] }
 0x288   :  { %3948 = vmatprep.subr.bf16.mxu0 %v3947_v19  ;;  %v1794_v19 = vld [vmem:[#allocation5 + $0x898] sm:$0xff] }
 0x289   :  { %v4003_v29 = vpack.c.bf16 %v1794_v19, %v1792_v37  ;;  %v2138_v37 = vld [vmem:[#allocation10 + $0x240] sm:$0xff]  ;;  %v2140_v19 = vld [vmem:[#allocation10 + $0x250] sm:$0xff] }
 0x28b   :  { %3950 = vmatpush1.bf16.msra.mxu0 %v3949_v4 }
 0x28c   :  { %3952 = vmatprep.subr.bf16.mxu0 %v3951_v36  ;;  %v4007_v36 = vpack.c.bf16 %v1798_v34, %v1796_v32  ;;  %v2142_v32 = vld [vmem:[#allocation10 + $0x260] sm:$0xff]  ;;  %v2144_v34 = vld [vmem:[#allocation10 + $0x270] sm:$0xff] }
 0x28f   :  { %3954 = vmatpush1.bf16.msra.mxu0 %v3953_v42  ;;  %v4009_v42 = vpack.c.bf16 %v1797_v33, %v1795_v38  ;;  %v4041_v38 = vpack.c.bf16 %v2144_v34, %v2142_v32 }
 0x290   :  { %3956 = vmatprep.subr.bf16.mxu0 %v3955_v44  ;;  %v4011_v44 = vpack.c.bf16 %v1802_v58, %v1800_v40  ;;  %v2146_v40 = vld [vmem:[#allocation10 + $0x280] sm:$0xff]  ;;  %v2148_v58 = vld [vmem:[#allocation10 + $0x290] sm:$0xff] }
 0x293   :  { %3958 = vmatpush1.bf16.msra.mxu0 %v3957_v16  ;;  %v4013_v16 = vpack.c.bf16 %v1801_v9, %v1799_v5  ;;  %v4045_v5 = vpack.c.bf16 %v2148_v58, %v2146_v40 }
 0x294   :  { %3960 = vmatprep.subr.bf16.mxu0 %v3959_v21  ;;  %v4015_v21 = vpack.c.bf16 %v1806_v15, %v1804_v10  ;;  %v2150_v10 = vld [vmem:[#allocation10 + $0x2a0] sm:$0xff]  ;;  %v2152_v15 = vld [vmem:[#allocation10 + $0x2b0] sm:$0xff] }
 0x295   :  { %v4049_v22 = vpack.c.bf16 %v2152_v15, %v2150_v10 }
 0x297   :  { %3962 = vmatpush1.bf16.msra.mxu0 %v3961_v46  ;;  %v5296_v46 = vshrl.u32 %v1896_v45, 7  ;;  %v2156_v45 = vld [vmem:[#allocation10 + $0x2d0] sm:$0xff] }
 0x298   :  { %3964 = vmatprep.subr.bf16.mxu0 %v3963_v47 }
 0x299   :  { %v1898_v47 = vsub.s32 0, %v5296_v46  ;;  %v1902_v49 = vsub.s32 1, %v5296_v46  ;;  %v2888_v46 = vld [vmem:[#allocation13 + $0x2] sm:$0x3] }
 0x29b   :  { %3966 = vmatpush1.bf16.msra.mxu0 %v3965_v56  ;;  %v1899_v51 = vrot.slane %v1894_v48, %v1898_v47 }
 0x29c   :  { %3984 = vmatprep.subr.bf16.mxu0 %v3983_v57 }
 0x29e   :  { %1668 = vmatmul.mubr.f32.vlgmr.msra.gmra.mrb[4].mxu0 %v5251_v31  ;;  %v3995_v31 = vpack.c.bf16 %v1786_v35, %v1784_v63  ;;  %v2135_v63 = vld [vmem:[#allocation10 + $0x228] sm:$0xff]  ;;  %v2137_v35 = vld [vmem:[#allocation10 + $0x238] sm:$0xff] }
 0x29f   :  { %3986 = vmatpush1.bf16.msra.mxu0 %v3985_v2  ;;  %3533 = vmatprep.mubr.msk.f32.mxu0 %vm467_vm1, %v5263_v54  ;;  %v3997_v54 = vpack.c.bf16 %v1785_v17, %v1783_v23  ;;  %v4029_v23 = vpack.c.bf16 %v2132_v12, %v2130_v11  ;;  %v4031_v17 = vpack.c.bf16 %v2137_v35, %v2135_v63  ;;  %v2171_v11 = vld [vmem:[#allocation10 + $0x348] sm:$0xff]  ;;  %v2173_v12 = vld [vmem:[#allocation10 + $0x358] sm:$0xff] }
 0x2a0   :  { %3988 = vmatprep.subr.bf16.mxu0 %v3987_v59  ;;  %v2131_v59 = vld [vmem:[#allocation10 + $0x208] sm:$0xff]  ;;  %v4067_v35 = vpack.c.bf16 %v2173_v12, %v2171_v11  ;;  %v1999_v11 = vld [vmem:[#allocation10 + $0x50] sm:$0xff] }
 0x2a1   :  { %v2002_v12 = vld [vmem:[#allocation10 + $0x68] sm:$0xff] }
 0x2a2   :  { %1674 = vmatmul.mubr.f32.gmra.mrb[6].mxu0 %v5261_v13  ;;  %v4001_v13 = vpack.c.bf16 %v1789_v39, %v1787_v18  ;;  %v4033_v18 = vpack.c.bf16 %v2136_v60, %v2134_v55 }
 0x2a3   :  { %3990 = vmatpush1.bf16.msra.mxu0 %v3989_v8  ;;  %3536 = vmatprep.mubr.msk.f32.mxu0 %vm467_vm1, %v5267_v28  ;;  %v1793_v28 = vld [vmem:[#allocation5 + $0x890] sm:$0xff] }
 0x2a4   :  { %3992 = vmatprep.subr.bf16.mxu0 %v3991_v50  ;;  %v4005_v4 = vpack.c.bf16 %v1793_v28, %v1791_v30  ;;  %v4027_v50 = vpack.c.bf16 %v2133_v3, %v2131_v59  ;;  %v4037_v30 = vpack.c.bf16 %v2140_v19, %v2138_v37  ;;  %v2169_v59 = vld [vmem:[#allocation10 + $0x338] sm:$0xff] }
 0x2a7   :  { %3994 = vmatpush1.bf16.msra.mxu0 %v3993_v14  ;;  %v2054_v14 = vld [vmem:[#allocation8 + $0x8] sm:$0x3f] }
 0x2a8   :  { %3996 = vmatprep.subr.bf16.mxu0 %v3995_v31  ;;  %v1914_v31 = vld [vmem:[#allocation8] sm:$0x3f] }
 0x2ab   :  { %3998 = vmatpush1.bf16.msra.mxu0 %v3997_v54  ;;  %v2139_v54 = vld [vmem:[#allocation10 + $0x248] sm:$0xff] }
 0x2ac   :  { %4000 = vmatprep.subr.bf16.mxu0 %v3999_v53  ;;  %v2141_v53 = vld [vmem:[#allocation10 + $0x258] sm:$0xff] }
 0x2ad   :  { %v4035_v39 = vpack.c.bf16 %v2141_v53, %v2139_v54  ;;  %v2174_v54 = vld [vmem:[#allocation10 + $0x360] sm:$0xff]  ;;  %v2176_v53 = vld [vmem:[#allocation10 + $0x370] sm:$0xff] }
 0x2ae   :  { %v4073_v37 = vpack.c.bf16 %v2176_v53, %v2174_v54  ;;  %v2005_v53 = vld [vmem:[#allocation10 + $0x80] sm:$0xff] }
 0x2af   :  { %4002 = vmatpush1.bf16.msra.mxu0 %v4001_v13  ;;  %v2143_v13 = vld [vmem:[#allocation10 + $0x268] sm:$0xff] }
 0x2b0   :  { %4004 = vmatprep.subr.bf16.mxu0 %v4003_v29  ;;  %v2145_v29 = vld [vmem:[#allocation10 + $0x278] sm:$0xff] }
 0x2b1   :  { %v4039_v28 = vpack.c.bf16 %v2145_v29, %v2143_v13  ;;  %v2178_v13 = vld [vmem:[#allocation10 + $0x380] sm:$0xff]  ;;  %v2180_v29 = vld [vmem:[#allocation10 + $0x390] sm:$0xff] }
 0x2b2   :  { %v4077_v32 = vpack.c.bf16 %v2180_v29, %v2178_v13  ;;  %v2009_v29 = vld [vmem:[#allocation10 + $0xa0] sm:$0xff] }
 0x2b3   :  { %4006 = vmatpush1.bf16.msra.mxu0 %v4005_v4  ;;  %v2147_v4 = vld [vmem:[#allocation10 + $0x288] sm:$0xff] }
 0x2b4   :  { %4008 = vmatprep.subr.bf16.mxu0 %v4007_v36  ;;  %v2149_v36 = vld [vmem:[#allocation10 + $0x298] sm:$0xff] }
 0x2b5   :  { %v4043_v33 = vpack.c.bf16 %v2149_v36, %v2147_v4  ;;  %v2182_v4 = vld [vmem:[#allocation10 + $0x3a0] sm:$0xff]  ;;  %v2184_v36 = vld [vmem:[#allocation10 + $0x3b0] sm:$0xff] }
 0x2b6   :  { %v4081_v40 = vpack.c.bf16 %v2184_v36, %v2182_v4  ;;  %v2013_v36 = vld [vmem:[#allocation10 + $0xc0] sm:$0xff] }
 0x2b7   :  { %4010 = vmatpush1.bf16.msra.mxu0 %v4009_v42  ;;  %v2151_v42 = vld [vmem:[#allocation10 + $0x2a8] sm:$0xff] }
 0x2b8   :  { %4012 = vmatprep.subr.bf16.mxu0 %v4011_v44  ;;  %v2153_v44 = vld [vmem:[#allocation10 + $0x2b8] sm:$0xff] }
 0x2b9   :  { %v4047_v9 = vpack.c.bf16 %v2153_v44, %v2151_v42  ;;  %v2186_v42 = vld [vmem:[#allocation10 + $0x3c0] sm:$0xff]  ;;  %v2188_v44 = vld [vmem:[#allocation10 + $0x3d0] sm:$0xff] }
 0x2ba   :  { %v4085_v10 = vpack.c.bf16 %v2188_v44, %v2186_v42  ;;  %v2017_v44 = vld [vmem:[#allocation10 + $0xe0] sm:$0xff] }
 0x2bb   :  { %4014 = vmatpush1.bf16.msra.mxu0 %v4013_v16  ;;  %v2155_v16 = vld [vmem:[#allocation10 + $0x2c8] sm:$0xff] }
 0x2bc   :  { %4016 = vmatprep.subr.bf16.mxu0 %v4015_v21  ;;  %v2157_v21 = vld [vmem:[#allocation10 + $0x2d8] sm:$0xff] }
 0x2bd   :  { %v4051_v25 = vpack.c.bf16 %v2157_v21, %v2155_v16  ;;  %v2190_v16 = vld [vmem:[#allocation10 + $0x3e0] sm:$0xff]  ;;  %v2192_v21 = vld [vmem:[#allocation10 + $0x3f0] sm:$0xff] }
 0x2bf   :  { %4018 = vmatpush1.bf16.msra.mxu0 %v4017_v26  ;;  %v2154_v26 = vld [vmem:[#allocation10 + $0x2c0] sm:$0xff] }
 0x2c2   :  { %1878 = vmatmul.mubr.f32.vlgmr.msra.gmra.mrb[4].mxu0 %v5265_v20  ;;  %v1903_v20 = vrot.slane %v1894_v48, %v1902_v49  ;;  %v2159_v48 = vld [vmem:[#allocation10 + $0x2e8] sm:$0xff] }
 0x2c3   :  { %3537 = vmatprep.mubr.msk.f32.mxu0 %vm467_vm1, %v5271_v43 }
 0x2c6   :  { %1884 = vmatmul.mubr.f32.gmra.mrb[6].mxu0 %v5269_v41 }
 0x2c7   :  { %1982 = vmatprep.mubr.f32.mxu0 %v4768_v1 }
 0x395   :  { %v1879_v52 = vpop.f32.mrb[4].mxu0 }
 0x396   :  { %v1881_v43 = vpop.f32.mrb[5].mxu0  ;;  %v1906_v56 = vadd.f32 %v1899_v51, %v1879_v52  ;;  %v4053_v52 = vpack.c.bf16 %v2156_v45, %v2154_v26  ;;  %v1992_v26 = vld [vmem:[#allocation10 + $0x18] sm:$0xff] }
 0x397   :  { %v1907_v41 = vadd.f32 %v1903_v20, %v1881_v43  ;;  %v2158_v43 = vld [vmem:[#allocation10 + $0x2e0] sm:$0xff] }
 0x398   :  { %v1910_v27 = vmax.f32 %v1906_v56, 0.0  ;;  %v2160_v56 = vld [vmem:[#allocation10 + $0x2f0] sm:$0xff] }
 0x399   :  { %v1885_v57 = vpop.f32.mrb[6].mxu0  ;;  %v1911_v24 = vmax.f32 %v1907_v41, 0.0  ;;  %v2163_v41 = vld [vmem:[#allocation10 + $0x308] sm:$0xff] }
 0x39a   :  { %v1908_v61 = vadd.f32 %v1899_v51, %v1885_v57  ;;  %v1887_v62 = vpop.f32.mrb[7].mxu0  ;;  %v2161_v51 = vld [vmem:[#allocation10 + $0x2f8] sm:$0xff] }
 0x39b   :  { %v1909_v0 = vadd.f32 %v1903_v20, %v1887_v62  ;;  %v4055_v20 = vpack.c.bf16 %v2161_v51, %v2159_v48  ;;  %v2165_v57 = vld [vmem:[#allocation10 + $0x318] sm:$0xff]  ;;  %v1989_v51 = vld [vmem:[#allocation10] sm:$0xff] }
 0x39c   :  { %v1912_v2 = vmax.f32 %v1908_v61, 0.0  ;;  %v4057_v61 = vpack.c.bf16 %v2160_v56, %v2158_v43  ;;  %v4059_v62 = vpack.c.bf16 %v2165_v57, %v2163_v41  ;;  %v2551_v48 = vld [vmem:[#allocation8 + $0x18] sm:$0x3f] }
 0x39d   :  { %v1913_v6 = vmax.f32 %v1909_v0, 0.0  ;;  %v2162_v0 = vld [vmem:[#allocation10 + $0x300] sm:$0xff]  ;;  %v1996_v43 = vld [vmem:[#allocation10 + $0x38] sm:$0xff] }
 0x39e   :  { %v5304_v7 = vpack.c.bf16 %v1912_v2, %v1910_v27  ;;  %v2164_v27 = vld [vmem:[#allocation10 + $0x310] sm:$0xff]  ;;  %v2167_v2 = vld [vmem:[#allocation10 + $0x328] sm:$0xff] }
 0x39f   :  { %v5306_v8 = vpack.c.bf16 %v1913_v6, %v1911_v24  ;;  %v4061_v3 = vpack.c.bf16 %v2164_v27, %v2162_v0  ;;  %v4063_v24 = vpack.c.bf16 %v2169_v59, %v2167_v2  ;;  %v2166_v6 = vld [vmem:[#allocation10 + $0x320] sm:$0xff]  ;;  %v1995_v27 = vld [vmem:[#allocation10 + $0x30] sm:$0xff]  ;;  %v1998_v59 = vld [vmem:[#allocation10 + $0x48] sm:$0xff] }
 0x3a0   :  { %v1993_v0 = vld [vmem:[#allocation10 + $0x20] sm:$0xff] }
 0x3a1   :  { %4020 = vmatprep.subr.bf16.mxu0 %v5306_v8  ;;  %4024 = vmatprep.subr.bf16.mxu1 %v5306_v8 }
 0x3a2   :  { %4022 = vmatpush1.bf16.msra.mxu0 %v5304_v7  ;;  %4026 = vmatpush1.bf16.msra.mxu1 %v5304_v7 }
 0x3a3   :  { %4224 = vmatprep.subr.bf16.mxu0 %v5306_v8  ;;  %4028 = vmatprep.subr.bf16.mxu1 %v4027_v50  ;;  %v2168_v50 = vld [vmem:[#allocation10 + $0x330] sm:$0xff] }
 0x3a4   :  { %v4065_v63 = vpack.c.bf16 %v2168_v50, %v2166_v6  ;;  %v1997_v50 = vld [vmem:[#allocation10 + $0x40] sm:$0xff] }
 0x3a5   :  { %3539 = vmatmul.mubr.msk.f32.vlgmr.msra.gmra.mrb[28].mxu1 %vm467_vm1, %v2054_v14  ;;  %3538 = vmatmul.mubr.msk.f32.vlgmr.msra.gmra.mrb[8].mxu0 %vm467_vm1, %v1914_v31  ;;  %v2170_v14 = vld [vmem:[#allocation10 + $0x340] sm:$0xff]  ;;  %v2172_v31 = vld [vmem:[#allocation10 + $0x350] sm:$0xff] }
 0x3a6   :  { %4226 = vmatpush1.bf16.msra.mxu0 %v5304_v7  ;;  %4030 = vmatpush1.bf16.msra.mxu1 %v4029_v23  ;;  %v2175_v23 = vld [vmem:[#allocation10 + $0x368] sm:$0xff]  ;;  %v4069_v55 = vpack.c.bf16 %v2172_v31, %v2170_v14  ;;  %v2001_v31 = vld [vmem:[#allocation10 + $0x60] sm:$0xff] }
 0x3a7   :  { %4032 = vmatprep.subr.bf16.mxu1 %v4031_v17  ;;  %2619 = vmatprep.mubr.f32.mxu0 %v4768_v1  ;;  %v2177_v17 = vld [vmem:[#allocation10 + $0x378] sm:$0xff] }
 0x3a8   :  { %v4071_v60 = vpack.c.bf16 %v2177_v17, %v2175_v23  ;;  %v2003_v23 = vld [vmem:[#allocation10 + $0x70] sm:$0xff]  ;;  %v2006_v17 = vld [vmem:[#allocation10 + $0x88] sm:$0xff] }
 0x3a9   :  { %3541 = vmatmul.mubr.msk.f32.vlgmr.msra.gmra.mrb[10].mxu0 %vm467_vm1, %v2551_v48 }
 0x3aa   :  { %4034 = vmatpush1.bf16.msra.mxu1 %v4033_v18  ;;  %v2179_v18 = vld [vmem:[#allocation10 + $0x388] sm:$0xff]  ;;  %2856 = vmatprep.mubr.f32.mxu0 %v4768_v1 }
 0x3ab   :  { %4036 = vmatprep.subr.bf16.mxu1 %v4035_v39  ;;  %v2181_v39 = vld [vmem:[#allocation10 + $0x398] sm:$0xff] }
 0x3ac   :  { %v4075_v19 = vpack.c.bf16 %v2181_v39, %v2179_v18  ;;  %v2007_v18 = vld [vmem:[#allocation10 + $0x90] sm:$0xff]  ;;  %v2010_v39 = vld [vmem:[#allocation10 + $0xa8] sm:$0xff] }
 0x3ae   :  { %4038 = vmatpush1.bf16.msra.mxu1 %v4037_v30  ;;  %v2183_v30 = vld [vmem:[#allocation10 + $0x3a8] sm:$0xff] }
 0x3af   :  { %4040 = vmatprep.subr.bf16.mxu1 %v4039_v28  ;;  %v2185_v28 = vld [vmem:[#allocation10 + $0x3b8] sm:$0xff] }
 0x3b0   :  { %v4079_v34 = vpack.c.bf16 %v2185_v28, %v2183_v30  ;;  %v2011_v30 = vld [vmem:[#allocation10 + $0xb0] sm:$0xff]  ;;  %v2014_v28 = vld [vmem:[#allocation10 + $0xc8] sm:$0xff] }
 0x3b2   :  { %4042 = vmatpush1.bf16.msra.mxu1 %v4041_v38  ;;  %v2187_v38 = vld [vmem:[#allocation10 + $0x3c8] sm:$0xff] }
 0x3b3   :  { %4044 = vmatprep.subr.bf16.mxu1 %v4043_v33  ;;  %v2189_v33 = vld [vmem:[#allocation10 + $0x3d8] sm:$0xff] }
 0x3b4   :  { %v4083_v58 = vpack.c.bf16 %v2189_v33, %v2187_v38  ;;  %v2015_v38 = vld [vmem:[#allocation10 + $0xd0] sm:$0xff]  ;;  %v2018_v33 = vld [vmem:[#allocation10 + $0xe8] sm:$0xff] }
 0x3b6   :  { %4046 = vmatpush1.bf16.msra.mxu1 %v4045_v5  ;;  %v2191_v5 = vld [vmem:[#allocation10 + $0x3e8] sm:$0xff] }
 0x3b7   :  { %4048 = vmatprep.subr.bf16.mxu1 %v4047_v9  ;;  %v2193_v9 = vld [vmem:[#allocation10 + $0x3f8] sm:$0xff] }
 0x3b8   :  { %v4087_v15 = vpack.c.bf16 %v2193_v9, %v2191_v5  ;;  %v2019_v5 = vld [vmem:[#allocation10 + $0xf0] sm:$0xff]  ;;  %v2022_v9 = vld [vmem:[#allocation10 + $0x108] sm:$0xff] }
 0x3ba   :  { %4050 = vmatpush1.bf16.msra.mxu1 %v4049_v22  ;;  %v4089_v22 = vpack.c.bf16 %v2192_v21, %v2190_v16  ;;  %v2021_v21 = vld [vmem:[#allocation10 + $0x100] sm:$0xff] }
 0x3bb   :  { %4052 = vmatprep.subr.bf16.mxu1 %v4051_v25  ;;  %v1990_v25 = vld [vmem:[#allocation10 + $0x8] sm:$0xff] }
 0x3bc   :  { %v4091_v45 = vpack.c.bf16 %v1992_v26, %v1990_v25  ;;  %v2026_v25 = vld [vmem:[#allocation10 + $0x128] sm:$0xff]  ;;  %v2028_v26 = vld [vmem:[#allocation10 + $0x138] sm:$0xff] }
 0x3bd   :  { %v4127_v48 = vpack.c.bf16 %v2028_v26, %v2026_v25  ;;  %v2421_v26 = vld [vmem:[#allocation10 + $0x440] sm:$0xff] }
 0x3be   :  { %4054 = vmatpush1.bf16.msra.mxu1 %v4053_v52  ;;  %v1991_v52 = vld [vmem:[#allocation10 + $0x10] sm:$0xff] }
 0x3bf   :  { %4056 = vmatprep.subr.bf16.mxu1 %v4055_v20  ;;  %v1994_v20 = vld [vmem:[#allocation10 + $0x28] sm:$0xff]  ;;  %v4093_v41 = vpack.c.bf16 %v1991_v52, %v1989_v51  ;;  %v2025_v51 = vld [vmem:[#allocation10 + $0x120] sm:$0xff]  ;;  %v2027_v52 = vld [vmem:[#allocation10 + $0x130] sm:$0xff] }
 0x3c2   :  { %4058 = vmatpush1.bf16.msra.mxu1 %v4057_v61 }
 0x3c3   :  { %4060 = vmatprep.subr.bf16.mxu1 %v4059_v62  ;;  %v4095_v62 = vpack.c.bf16 %v1996_v43, %v1994_v20  ;;  %v2030_v20 = vld [vmem:[#allocation10 + $0x148] sm:$0xff]  ;;  %v2032_v43 = vld [vmem:[#allocation10 + $0x158] sm:$0xff] }
 0x3c6   :  { %4062 = vmatpush1.bf16.msra.mxu1 %v4061_v3  ;;  %v2000_v3 = vld [vmem:[#allocation10 + $0x58] sm:$0xff] }
 0x3c7   :  { %4064 = vmatprep.subr.bf16.mxu1 %v4063_v24  ;;  %v4097_v24 = vpack.c.bf16 %v1995_v27, %v1993_v0  ;;  %v4099_v6 = vpack.c.bf16 %v2000_v3, %v1998_v59  ;;  %v2034_v0 = vld [vmem:[#allocation10 + $0x168] sm:$0xff]  ;;  %v2036_v27 = vld [vmem:[#allocation10 + $0x178] sm:$0xff]  ;;  %v2033_v3 = vld [vmem:[#allocation10 + $0x160] sm:$0xff] }
 0x3c8   :  { %v4135_v59 = vpack.c.bf16 %v2036_v27, %v2034_v0  ;;  %v2431_v0 = vld [vmem:[#allocation10 + $0x490] sm:$0xff]  ;;  %v2434_v27 = vld [vmem:[#allocation10 + $0x4a8] sm:$0xff] }
 0x3ca   :  { %4066 = vmatpush1.bf16.msra.mxu1 %v4065_v63  ;;  %v2004_v63 = vld [vmem:[#allocation10 + $0x78] sm:$0xff] }
 0x3cb   :  { %4068 = vmatprep.subr.bf16.mxu1 %v4067_v35  ;;  %v4101_v35 = vpack.c.bf16 %v1999_v11, %v1997_v50  ;;  %v4103_v14 = vpack.c.bf16 %v2004_v63, %v2002_v12  ;;  %v2040_v50 = vld [vmem:[#allocation10 + $0x198] sm:$0xff]  ;;  %v2037_v63 = vld [vmem:[#allocation10 + $0x180] sm:$0xff] }
 0x3ce   :  { %4070 = vmatpush1.bf16.msra.mxu1 %v4069_v55  ;;  %v2008_v55 = vld [vmem:[#allocation10 + $0x98] sm:$0xff] }
 0x3cf   :  { %4072 = vmatprep.subr.bf16.mxu1 %v4071_v60  ;;  %v4105_v60 = vpack.c.bf16 %v2003_v23, %v2001_v31  ;;  %v4107_v54 = vpack.c.bf16 %v2008_v55, %v2006_v17  ;;  %v2044_v31 = vld [vmem:[#allocation10 + $0x1b8] sm:$0xff]  ;;  %v2041_v55 = vld [vmem:[#allocation10 + $0x1a0] sm:$0xff] }
 0x3d2   :  { %4074 = vmatpush1.bf16.msra.mxu1 %v4073_v37  ;;  %v2012_v37 = vld [vmem:[#allocation10 + $0xb8] sm:$0xff] }
 0x3d3   :  { %4076 = vmatprep.subr.bf16.mxu1 %v4075_v19  ;;  %v4109_v19 = vpack.c.bf16 %v2007_v18, %v2005_v53  ;;  %v4111_v13 = vpack.c.bf16 %v2012_v37, %v2010_v39  ;;  %v2048_v53 = vld [vmem:[#allocation10 + $0x1d8] sm:$0xff]  ;;  %v2045_v37 = vld [vmem:[#allocation10 + $0x1c0] sm:$0xff] }
 0x3d6   :  { %4078 = vmatpush1.bf16.msra.mxu1 %v4077_v32  ;;  %v2016_v32 = vld [vmem:[#allocation10 + $0xd8] sm:$0xff] }
 0x3d7   :  { %4080 = vmatprep.subr.bf16.mxu1 %v4079_v34  ;;  %v4113_v34 = vpack.c.bf16 %v2011_v30, %v2009_v29  ;;  %v4115_v4 = vpack.c.bf16 %v2016_v32, %v2014_v28  ;;  %v2052_v29 = vld [vmem:[#allocation10 + $0x1f8] sm:$0xff]  ;;  %v2049_v32 = vld [vmem:[#allocation10 + $0x1e0] sm:$0xff] }
 0x3da   :  { %4082 = vmatpush1.bf16.msra.mxu1 %v4081_v40  ;;  %v2020_v40 = vld [vmem:[#allocation10 + $0xf8] sm:$0xff] }
 0x3db   :  { %4084 = vmatprep.subr.bf16.mxu1 %v4083_v58  ;;  %v4117_v58 = vpack.c.bf16 %v2015_v38, %v2013_v36  ;;  %v4119_v42 = vpack.c.bf16 %v2020_v40, %v2018_v33  ;;  %v2414_v36 = vld [vmem:[#allocation10 + $0x408] sm:$0xff]  ;;  %v2416_v38 = vld [vmem:[#allocation10 + $0x418] sm:$0xff]  ;;  %v2413_v40 = vld [vmem:[#allocation10 + $0x400] sm:$0xff] }
 0x3dc   :  { %v4159_v33 = vpack.c.bf16 %v2416_v38, %v2414_v36  ;;  %v2454_v36 = vld [vmem:[#allocation10 + $0x548] sm:$0xff]  ;;  %v2456_v38 = vld [vmem:[#allocation10 + $0x558] sm:$0xff] }
 0x3de   :  { %4086 = vmatpush1.bf16.msra.mxu1 %v4085_v10  ;;  %v2024_v10 = vld [vmem:[#allocation10 + $0x118] sm:$0xff] }
 0x3df   :  { %4088 = vmatprep.subr.bf16.mxu1 %v4087_v15  ;;  %v4121_v15 = vpack.c.bf16 %v2019_v5, %v2017_v44  ;;  %v4123_v16 = vpack.c.bf16 %v2024_v10, %v2022_v9  ;;  %v2420_v44 = vld [vmem:[#allocation10 + $0x438] sm:$0xff]  ;;  %v2337_v5 = vld [vmem:[#allocation8 + $0x10] sm:$0x3f] }
 0x3e2   :  { %4090 = vmatpush1.bf16.msra.mxu1 %v4089_v22  ;;  %v2023_v22 = vld [vmem:[#allocation10 + $0x110] sm:$0xff] }
 0x3e3   :  { %4092 = vmatprep.subr.bf16.mxu1 %v4091_v45  ;;  %v4125_v45 = vpack.c.bf16 %v2023_v22, %v2021_v21  ;;  %v2422_v21 = vld [vmem:[#allocation10 + $0x448] sm:$0xff]  ;;  %v2424_v22 = vld [vmem:[#allocation10 + $0x458] sm:$0xff] }
 0x3e4   :  { %v4167_v25 = vpack.c.bf16 %v2424_v22, %v2422_v21  ;;  %v2462_v21 = vld [vmem:[#allocation10 + $0x588] sm:$0xff]  ;;  %v2464_v22 = vld [vmem:[#allocation10 + $0x598] sm:$0xff] }
 0x478   :  { %v2124_v56 = vpop.f32.mrb[28].mxu1  ;;  %v5319_v57 = vpop.f32.mrb[8].mxu0 }
 0x479   :  { %v2126_v61 = vpop.f32.mrb[29].mxu1  ;;  %v1986_v2 = vpop.f32.mrb[9].mxu0 }
 0x47a   :  { %2258 = vmatprep.mubr.f32.mxu1 %v2126_v61  ;;  %v2029_v61 = vld [vmem:[#allocation10 + $0x140] sm:$0xff] }
 0x47b   :  { %2259 = vmatmul.mubr.f32.vlgmr.msra.gmra.mrb[30].mxu1 %v2124_v56  ;;  %v4129_v56 = vpack.c.bf16 %v2027_v52, %v2025_v51  ;;  %v2425_v52 = vld [vmem:[#allocation10 + $0x460] sm:$0xff] }
 0x47c   :  { %4094 = vmatpush1.bf16.msra.mxu1 %v4093_v41  ;;  %2329 = vmatprep.mubr.f32.mxu1 %v1986_v2  ;;  %v4131_v41 = vpack.c.bf16 %v2032_v43, %v2030_v20  ;;  %v2427_v20 = vld [vmem:[#allocation10 + $0x470] sm:$0xff]  ;;  %v2430_v43 = vld [vmem:[#allocation10 + $0x488] sm:$0xff] }
 0x47d   :  { %4096 = vmatprep.subr.bf16.mxu1 %v4095_v62  ;;  %v2031_v62 = vld [vmem:[#allocation10 + $0x150] sm:$0xff] }
 0x47e   :  { %v4133_v2 = vpack.c.bf16 %v2031_v62, %v2029_v61  ;;  %v2429_v62 = vld [vmem:[#allocation10 + $0x480] sm:$0xff] }
 0x480   :  { %4098 = vmatpush1.bf16.msra.mxu1 %v4097_v24  ;;  %v2035_v24 = vld [vmem:[#allocation10 + $0x170] sm:$0xff] }
 0x481   :  { %4100 = vmatprep.subr.bf16.mxu1 %v4099_v6  ;;  %v2038_v6 = vld [vmem:[#allocation10 + $0x188] sm:$0xff]  ;;  %v4137_v11 = vpack.c.bf16 %v2035_v24, %v2033_v3  ;;  %v2433_v24 = vld [vmem:[#allocation10 + $0x4a0] sm:$0xff] }
 0x482   :  { %v4139_v12 = vpack.c.bf16 %v2040_v50, %v2038_v6  ;;  %v2435_v6 = vld [vmem:[#allocation10 + $0x4b0] sm:$0xff]  ;;  %v2438_v50 = vld [vmem:[#allocation10 + $0x4c8] sm:$0xff] }
 0x484   :  { %4102 = vmatpush1.bf16.msra.mxu1 %v4101_v35  ;;  %v2039_v35 = vld [vmem:[#allocation10 + $0x190] sm:$0xff] }
 0x485   :  { %4104 = vmatprep.subr.bf16.mxu1 %v4103_v14  ;;  %v2042_v14 = vld [vmem:[#allocation10 + $0x1a8] sm:$0xff]  ;;  %v4141_v23 = vpack.c.bf16 %v2039_v35, %v2037_v63  ;;  %v2437_v35 = vld [vmem:[#allocation10 + $0x4c0] sm:$0xff] }
 0x486   :  { %v4143_v17 = vpack.c.bf16 %v2044_v31, %v2042_v14  ;;  %v2439_v14 = vld [vmem:[#allocation10 + $0x4d0] sm:$0xff]  ;;  %v2442_v31 = vld [vmem:[#allocation10 + $0x4e8] sm:$0xff] }
 0x488   :  { %4106 = vmatpush1.bf16.msra.mxu1 %v4105_v60  ;;  %v2043_v60 = vld [vmem:[#allocation10 + $0x1b0] sm:$0xff] }
 0x489   :  { %4108 = vmatprep.subr.bf16.mxu1 %v4107_v54  ;;  %v2046_v54 = vld [vmem:[#allocation10 + $0x1c8] sm:$0xff]  ;;  %v4145_v18 = vpack.c.bf16 %v2043_v60, %v2041_v55  ;;  %v2441_v60 = vld [vmem:[#allocation10 + $0x4e0] sm:$0xff] }
 0x48a   :  { %v4147_v39 = vpack.c.bf16 %v2048_v53, %v2046_v54  ;;  %v2443_v54 = vld [vmem:[#allocation10 + $0x4f0] sm:$0xff]  ;;  %v2446_v53 = vld [vmem:[#allocation10 + $0x508] sm:$0xff] }
 0x48c   :  { %4110 = vmatpush1.bf16.msra.mxu1 %v4109_v19  ;;  %v2047_v19 = vld [vmem:[#allocation10 + $0x1d0] sm:$0xff] }
 0x48d   :  { %4112 = vmatprep.subr.bf16.mxu1 %v4111_v13  ;;  %v2050_v13 = vld [vmem:[#allocation10 + $0x1e8] sm:$0xff]  ;;  %v4149_v30 = vpack.c.bf16 %v2047_v19, %v2045_v37  ;;  %v2445_v19 = vld [vmem:[#allocation10 + $0x500] sm:$0xff] }
 0x48e   :  { %v4151_v28 = vpack.c.bf16 %v2052_v29, %v2050_v13  ;;  %v2447_v13 = vld [vmem:[#allocation10 + $0x510] sm:$0xff]  ;;  %v2450_v29 = vld [vmem:[#allocation10 + $0x528] sm:$0xff] }
 0x490   :  { %4114 = vmatpush1.bf16.msra.mxu1 %v4113_v34  ;;  %v2051_v34 = vld [vmem:[#allocation10 + $0x1f0] sm:$0xff] }
 0x491   :  { %4116 = vmatprep.subr.bf16.mxu1 %v4115_v4  ;;  %v4153_v4 = vpack.c.bf16 %v2051_v34, %v2049_v32  ;;  %v2449_v34 = vld [vmem:[#allocation10 + $0x520] sm:$0xff] }
 0x494   :  { %4118 = vmatpush1.bf16.msra.mxu1 %v4117_v58  ;;  %v2415_v58 = vld [vmem:[#allocation10 + $0x410] sm:$0xff] }
 0x495   :  { %4120 = vmatprep.subr.bf16.mxu1 %v4119_v42  ;;  %v2418_v42 = vld [vmem:[#allocation10 + $0x428] sm:$0xff]  ;;  %v4161_v9 = vpack.c.bf16 %v2415_v58, %v2413_v40  ;;  %v4199_v40 = vpack.c.bf16 %v2456_v38, %v2454_v36  ;;  %v2453_v58 = vld [vmem:[#allocation10 + $0x540] sm:$0xff] }
 0x496   :  { %v4163_v10 = vpack.c.bf16 %v2420_v44, %v2418_v42  ;;  %v2455_v42 = vld [vmem:[#allocation10 + $0x550] sm:$0xff]  ;;  %v2458_v44 = vld [vmem:[#allocation10 + $0x568] sm:$0xff] }
 0x498   :  { %4122 = vmatpush1.bf16.msra.mxu1 %v4121_v15  ;;  %v2417_v15 = vld [vmem:[#allocation10 + $0x420] sm:$0xff] }
 0x499   :  { %4124 = vmatprep.subr.bf16.mxu1 %v4123_v16  ;;  %v2419_v16 = vld [vmem:[#allocation10 + $0x430] sm:$0xff] }
 0x49c   :  { %4126 = vmatpush1.bf16.msra.mxu1 %v4125_v45  ;;  %v2426_v45 = vld [vmem:[#allocation10 + $0x468] sm:$0xff] }
 0x49d   :  { %4128 = vmatprep.subr.bf16.mxu1 %v4127_v48 }
 0x4a0   :  { %4130 = vmatpush1.bf16.msra.mxu1 %v4129_v56  ;;  %v2432_v56 = vld [vmem:[#allocation10 + $0x498] sm:$0xff] }
 0x4a1   :  { %4132 = vmatprep.subr.bf16.mxu1 %v4131_v41  ;;  %v4173_v41 = vpack.c.bf16 %v2427_v20, %v2425_v52  ;;  %v4175_v61 = vpack.c.bf16 %v2432_v56, %v2430_v43  ;;  %v2465_v52 = vld [vmem:[#allocation10 + $0x5a0] sm:$0xff]  ;;  %v2467_v20 = vld [vmem:[#allocation10 + $0x5b0] sm:$0xff]  ;;  %v2470_v43 = vld [vmem:[#allocation10 + $0x5c8] sm:$0xff] }
 0x4a2   :  { %v2472_v56 = vld [vmem:[#allocation10 + $0x5d8] sm:$0xff] }
 0x4a4   :  { %4134 = vmatpush1.bf16.msra.mxu1 %v4133_v2  ;;  %v2436_v2 = vld [vmem:[#allocation10 + $0x4b8] sm:$0xff] }
 0x4a5   :  { %4136 = vmatprep.subr.bf16.mxu1 %v4135_v59  ;;  %v4177_v59 = vpack.c.bf16 %v2431_v0, %v2429_v62  ;;  %v4179_v3 = vpack.c.bf16 %v2436_v2, %v2434_v27  ;;  %v2469_v62 = vld [vmem:[#allocation10 + $0x5c0] sm:$0xff]  ;;  %v2471_v0 = vld [vmem:[#allocation10 + $0x5d0] sm:$0xff]  ;;  %v2474_v27 = vld [vmem:[#allocation10 + $0x5e8] sm:$0xff] }
 0x4a6   :  { %v2476_v2 = vld [vmem:[#allocation10 + $0x5f8] sm:$0xff] }
 0x4a8   :  { %4138 = vmatpush1.bf16.msra.mxu1 %v4137_v11  ;;  %v2440_v11 = vld [vmem:[#allocation10 + $0x4d8] sm:$0xff] }
 0x4a9   :  { %4140 = vmatprep.subr.bf16.mxu1 %v4139_v12  ;;  %v4181_v12 = vpack.c.bf16 %v2435_v6, %v2433_v24  ;;  %v4183_v63 = vpack.c.bf16 %v2440_v11, %v2438_v50  ;;  %v2473_v24 = vld [vmem:[#allocation10 + $0x5e0] sm:$0xff]  ;;  %v2475_v6 = vld [vmem:[#allocation10 + $0x5f0] sm:$0xff]  ;;  %v2628_v11 = vld [vmem:[#allocation10 + $0x608] sm:$0xff] }
 0x4aa   :  { %v4221_v50 = vpack.c.bf16 %v2475_v6, %v2473_v24  ;;  %v2664_v24 = vld [vmem:[#allocation10 + $0x728] sm:$0xff]  ;;  %v2666_v6 = vld [vmem:[#allocation10 + $0x738] sm:$0xff] }
 0x4ac   :  { %4142 = vmatpush1.bf16.msra.mxu1 %v4141_v23  ;;  %v2444_v23 = vld [vmem:[#allocation10 + $0x4f8] sm:$0xff] }
 0x4ad   :  { %4144 = vmatprep.subr.bf16.mxu1 %v4143_v17  ;;  %v4185_v17 = vpack.c.bf16 %v2439_v14, %v2437_v35  ;;  %v4187_v55 = vpack.c.bf16 %v2444_v23, %v2442_v31  ;;  %v5326_v35 = vpop.f32.mrb[10].mxu0  ;;  %v2627_v31 = vld [vmem:[#allocation10 + $0x600] sm:$0xff]  ;;  %v2629_v23 = vld [vmem:[#allocation10 + $0x610] sm:$0xff] }
 0x4ae   :  { %v2623_v14 = vpop.f32.mrb[11].mxu0 }
 0x4b0   :  { %4146 = vmatpush1.bf16.msra.mxu1 %v4145_v18  ;;  %v2448_v18 = vld [vmem:[#allocation10 + $0x518] sm:$0xff] }
 0x4b1   :  { %4148 = vmatprep.subr.bf16.mxu1 %v4147_v39  ;;  %v4189_v39 = vpack.c.bf16 %v2443_v54, %v2441_v60  ;;  %v4191_v37 = vpack.c.bf16 %v2448_v18, %v2446_v53  ;;  %v4229_v54 = vpack.c.bf16 %v2629_v23, %v2627_v31  ;;  %v2670_v31 = vld [vmem:[#allocation10 + $0x758] sm:$0xff] }
 0x4b4   :  { %4150 = vmatpush1.bf16.msra.mxu1 %v4149_v30  ;;  %v2452_v30 = vld [vmem:[#allocation10 + $0x538] sm:$0xff] }
 0x4b5   :  { %4152 = vmatprep.subr.bf16.mxu1 %v4151_v28  ;;  %v4193_v28 = vpack.c.bf16 %v2447_v13, %v2445_v19  ;;  %v4195_v32 = vpack.c.bf16 %v2452_v30, %v2450_v29  ;;  %v2636_v19 = vld [vmem:[#allocation10 + $0x648] sm:$0xff]  ;;  %v2638_v13 = vld [vmem:[#allocation10 + $0x658] sm:$0xff] }
 0x4b6   :  { %v4235_v30 = vpack.c.bf16 %v2638_v13, %v2636_v19  ;;  %v2673_v19 = vld [vmem:[#allocation10 + $0x770] sm:$0xff]  ;;  %v2676_v13 = vld [vmem:[#allocation10 + $0x788] sm:$0xff] }
 0x4b8   :  { %4154 = vmatpush1.bf16.msra.mxu1 %v4153_v4  ;;  %v2451_v4 = vld [vmem:[#allocation10 + $0x530] sm:$0xff] }
 0x4b9   :  { %4156 = vmatprep.subr.bf16.mxu1 %v5306_v8  ;;  %v4165_v8 = vpack.c.bf16 %v2419_v16, %v2417_v15  ;;  %v2457_v15 = vld [vmem:[#allocation10 + $0x560] sm:$0xff]  ;;  %v2459_v16 = vld [vmem:[#allocation10 + $0x570] sm:$0xff] }
 0x4bb   :  { %2330 = vmatmul.mubr.f32.vlgmr.msra.gmra.mrb[30].mxu1 %v5319_v57  ;;  %v2423_v57 = vld [vmem:[#allocation10 + $0x450] sm:$0xff] }
 0x4bc   :  { %4158 = vmatpush1.bf16.msra.mxu1 %v5304_v7  ;;  %2405 = vmatprep.mubr.f32.mxu1 %v4768_v1  ;;  %v2428_v7 = vld [vmem:[#allocation10 + $0x478] sm:$0xff]  ;;  %v4169_v48 = vpack.c.bf16 %v2423_v57, %v2421_v26  ;;  %v2461_v26 = vld [vmem:[#allocation10 + $0x580] sm:$0xff]  ;;  %v2463_v57 = vld [vmem:[#allocation10 + $0x590] sm:$0xff] }
 0x4bd   :  { %4160 = vmatprep.subr.bf16.mxu1 %v4159_v33  ;;  %v4171_v51 = vpack.c.bf16 %v2428_v7, %v2426_v45  ;;  %v4197_v33 = vpack.c.bf16 %v2451_v4, %v2449_v34  ;;  %v2466_v45 = vld [vmem:[#allocation10 + $0x5a8] sm:$0xff]  ;;  %v2468_v7 = vld [vmem:[#allocation10 + $0x5b8] sm:$0xff] }
 0x4be   :  { %v2640_v34 = vld [vmem:[#allocation10 + $0x668] sm:$0xff]  ;;  %v2642_v4 = vld [vmem:[#allocation10 + $0x678] sm:$0xff] }
 0x4bf   :  { %3540 = vmatmul.mubr.msk.f32.vlgmr.msra.gmra.mrb[32].mxu1 %vm467_vm1, %v2337_v5  ;;  %v2460_v5 = vld [vmem:[#allocation10 + $0x578] sm:$0xff]  ;;  %v4239_v38 = vpack.c.bf16 %v2642_v4, %v2640_v34  ;;  %v2677_v34 = vld [vmem:[#allocation10 + $0x790] sm:$0xff]  ;;  %v2680_v4 = vld [vmem:[#allocation10 + $0x7a8] sm:$0xff] }
 0x4c0   :  { %4162 = vmatpush1.bf16.msra.mxu1 %v4161_v9  ;;  %v4201_v9 = vpack.c.bf16 %v2455_v42, %v2453_v58  ;;  %v2644_v58 = vld [vmem:[#allocation10 + $0x688] sm:$0xff]  ;;  %v2646_v42 = vld [vmem:[#allocation10 + $0x698] sm:$0xff] }
 0x4c1   :  { %4164 = vmatprep.subr.bf16.mxu1 %v4163_v10  ;;  %v4203_v10 = vpack.c.bf16 %v2460_v5, %v2458_v44  ;;  %v4243_v5 = vpack.c.bf16 %v2646_v42, %v2644_v58  ;;  %v2681_v58 = vld [vmem:[#allocation10 + $0x7b0] sm:$0xff]  ;;  %v2684_v42 = vld [vmem:[#allocation10 + $0x7c8] sm:$0xff] }
 0x4c4   :  { %4166 = vmatpush1.bf16.msra.mxu1 %v4165_v8  ;;  %v4205_v8 = vpack.c.bf16 %v2459_v16, %v2457_v15  ;;  %v2648_v15 = vld [vmem:[#allocation10 + $0x6a8] sm:$0xff]  ;;  %v2650_v16 = vld [vmem:[#allocation10 + $0x6b8] sm:$0xff] }
 0x4c5   :  { %4168 = vmatprep.subr.bf16.mxu1 %v4167_v25  ;;  %v4207_v25 = vpack.c.bf16 %v2464_v22, %v2462_v21  ;;  %v4247_v22 = vpack.c.bf16 %v2650_v16, %v2648_v15  ;;  %v2685_v15 = vld [vmem:[#allocation10 + $0x7d0] sm:$0xff]  ;;  %v2688_v16 = vld [vmem:[#allocation10 + $0x7e8] sm:$0xff] }
 0x4c8   :  { %4170 = vmatpush1.bf16.msra.mxu1 %v4169_v48  ;;  %v4209_v48 = vpack.c.bf16 %v2463_v57, %v2461_v26  ;;  %v2652_v26 = vld [vmem:[#allocation10 + $0x6c8] sm:$0xff]  ;;  %v2654_v57 = vld [vmem:[#allocation10 + $0x6d8] sm:$0xff] }
 0x4c9   :  { %4172 = vmatprep.subr.bf16.mxu1 %v4171_v51  ;;  %v4211_v51 = vpack.c.bf16 %v2468_v7, %v2466_v45  ;;  %v4251_v7 = vpack.c.bf16 %v2654_v57, %v2652_v26  ;;  %v2689_v26 = vld [vmem:[#allocation10 + $0x7f0] sm:$0xff] }
 0x4cc   :  { %4174 = vmatpush1.bf16.msra.mxu1 %v4173_v41  ;;  %v4213_v41 = vpack.c.bf16 %v2467_v20, %v2465_v52  ;;  %v2656_v52 = vld [vmem:[#allocation10 + $0x6e8] sm:$0xff]  ;;  %v2658_v20 = vld [vmem:[#allocation10 + $0x6f8] sm:$0xff] }
 0x4cd   :  { %4176 = vmatprep.subr.bf16.mxu1 %v4175_v61  ;;  %v4215_v61 = vpack.c.bf16 %v2472_v56, %v2470_v43  ;;  %v4255_v56 = vpack.c.bf16 %v2658_v20, %v2656_v52 }
 0x4d0   :  { %4178 = vmatpush1.bf16.msra.mxu1 %v4177_v59  ;;  %v4217_v59 = vpack.c.bf16 %v2471_v0, %v2469_v62  ;;  %v2660_v62 = vld [vmem:[#allocation10 + $0x708] sm:$0xff]  ;;  %v2662_v0 = vld [vmem:[#allocation10 + $0x718] sm:$0xff] }
 0x4d1   :  { %4180 = vmatprep.subr.bf16.mxu1 %v4179_v3  ;;  %v4219_v3 = vpack.c.bf16 %v2476_v2, %v2474_v27  ;;  %v4259_v2 = vpack.c.bf16 %v2662_v0, %v2660_v62  ;;  %v2965_v62 = vld [vmem:[#allocation14 + $0xc8] sm:$0xff]  ;;  %v3136_v0 = vld [vmem:[#allocation13 + $0x4] sm:$0x3] }
 0x4d4   :  { %4182 = vmatpush1.bf16.msra.mxu1 %v4181_v12  ;;  %v2630_v12 = vld [vmem:[#allocation10 + $0x618] sm:$0xff] }
 0x4d5   :  { %4184 = vmatprep.subr.bf16.mxu1 %v4183_v63  ;;  %v4227_v63 = vpack.c.bf16 %v2630_v12, %v2628_v11  ;;  %v4263_v11 = vpack.c.bf16 %v2666_v6, %v2664_v24  ;;  %v2663_v12 = vld [vmem:[#allocation10 + $0x720] sm:$0xff]  ;;  %v2969_v24 = vld [vmem:[#allocation14 + $0xe8] sm:$0xff] }
 0x4d8   :  { %4186 = vmatpush1.bf16.msra.mxu1 %v4185_v17  ;;  %v2632_v17 = vld [vmem:[#allocation10 + $0x628] sm:$0xff] }
 0x4d9   :  { %4188 = vmatprep.subr.bf16.mxu1 %v4187_v55  ;;  %v2634_v55 = vld [vmem:[#allocation10 + $0x638] sm:$0xff] }
 0x4da   :  { %v4231_v18 = vpack.c.bf16 %v2634_v55, %v2632_v17  ;;  %v2667_v55 = vld [vmem:[#allocation10 + $0x740] sm:$0xff] }
 0x4dc   :  { %4190 = vmatpush1.bf16.msra.mxu1 %v4189_v39  ;;  %v2631_v39 = vld [vmem:[#allocation10 + $0x620] sm:$0xff] }
 0x4dd   :  { %4192 = vmatprep.subr.bf16.mxu1 %v4191_v37  ;;  %v2633_v37 = vld [vmem:[#allocation10 + $0x630] sm:$0xff] }
 0x4de   :  { %v4233_v29 = vpack.c.bf16 %v2633_v37, %v2631_v39  ;;  %v2671_v37 = vld [vmem:[#allocation10 + $0x760] sm:$0xff] }
 0x4e0   :  { %4194 = vmatpush1.bf16.msra.mxu1 %v4193_v28  ;;  %v2635_v28 = vld [vmem:[#allocation10 + $0x640] sm:$0xff] }
 0x4e1   :  { %4196 = vmatprep.subr.bf16.mxu1 %v4195_v32  ;;  %v2637_v32 = vld [vmem:[#allocation10 + $0x650] sm:$0xff] }
 0x4e2   :  { %v4237_v36 = vpack.c.bf16 %v2637_v32, %v2635_v28  ;;  %v2675_v32 = vld [vmem:[#allocation10 + $0x780] sm:$0xff] }
 0x4e4   :  { %4198 = vmatpush1.bf16.msra.mxu1 %v4197_v33  ;;  %v2639_v33 = vld [vmem:[#allocation10 + $0x660] sm:$0xff] }
 0x4e5   :  { %4200 = vmatprep.subr.bf16.mxu1 %v4199_v40  ;;  %v2641_v40 = vld [vmem:[#allocation10 + $0x670] sm:$0xff] }
 0x4e6   :  { %v4241_v44 = vpack.c.bf16 %v2641_v40, %v2639_v33  ;;  %v2679_v40 = vld [vmem:[#allocation10 + $0x7a0] sm:$0xff] }
 0x4e8   :  { %4202 = vmatpush1.bf16.msra.mxu1 %v4201_v9  ;;  %v2643_v9 = vld [vmem:[#allocation10 + $0x680] sm:$0xff] }
 0x4e9   :  { %4204 = vmatprep.subr.bf16.mxu1 %v4203_v10  ;;  %v2645_v10 = vld [vmem:[#allocation10 + $0x690] sm:$0xff] }
 0x4ea   :  { %v4245_v21 = vpack.c.bf16 %v2645_v10, %v2643_v9  ;;  %v2683_v10 = vld [vmem:[#allocation10 + $0x7c0] sm:$0xff] }
 0x4ec   :  { %4206 = vmatpush1.bf16.msra.mxu1 %v4205_v8  ;;  %v2647_v8 = vld [vmem:[#allocation10 + $0x6a0] sm:$0xff] }
 0x4ed   :  { %4208 = vmatprep.subr.bf16.mxu1 %v4207_v25  ;;  %v2649_v25 = vld [vmem:[#allocation10 + $0x6b0] sm:$0xff] }
 0x4ee   :  { %v4249_v45 = vpack.c.bf16 %v2649_v25, %v2647_v8  ;;  %v2687_v25 = vld [vmem:[#allocation10 + $0x7e0] sm:$0xff] }
 0x4ef   :  { %v4289_v57 = vpack.c.bf16 %v2689_v26, %v2687_v25  ;;  %v3220_v26 = vld [vmem:[#allocation14 + $0x1c0] sm:$0xff] }
 0x4f0   :  { %4210 = vmatpush1.bf16.msra.mxu1 %v4209_v48  ;;  %v2651_v48 = vld [vmem:[#allocation10 + $0x6c0] sm:$0xff] }
 0x4f1   :  { %4212 = vmatprep.subr.bf16.mxu1 %v4211_v51  ;;  %v2653_v51 = vld [vmem:[#allocation10 + $0x6d0] sm:$0xff] }
 0x4f2   :  { %v4253_v43 = vpack.c.bf16 %v2653_v51, %v2651_v48 }
 0x4f4   :  { %4214 = vmatpush1.bf16.msra.mxu1 %v4213_v41  ;;  %v2655_v41 = vld [vmem:[#allocation10 + $0x6e0] sm:$0xff] }
 0x4f5   :  { %4216 = vmatprep.subr.bf16.mxu1 %v4215_v61  ;;  %v2657_v61 = vld [vmem:[#allocation10 + $0x6f0] sm:$0xff] }
 0x4f6   :  { %v4257_v27 = vpack.c.bf16 %v2657_v61, %v2655_v41  ;;  %v2780_v61 = vld [vmem:[#allocation13] sm:$0x3] }
 0x4f8   :  { %4218 = vmatpush1.bf16.msra.mxu1 %v4217_v59  ;;  %v2659_v59 = vld [vmem:[#allocation10 + $0x700] sm:$0xff] }
 0x4f9   :  { %4220 = vmatprep.subr.bf16.mxu1 %v4219_v3  ;;  %v2661_v3 = vld [vmem:[#allocation10 + $0x710] sm:$0xff] }
 0x4fc   :  { %4222 = vmatpush1.bf16.msra.mxu1 %v4221_v50  ;;  %v4261_v50 = vpack.c.bf16 %v2661_v3, %v2659_v59  ;;  %v2968_v3 = vld [vmem:[#allocation14 + $0xe0] sm:$0xff] }
 0x4fd   :  { %4228 = vmatprep.subr.bf16.mxu1 %v4227_v63  ;;  %v2665_v63 = vld [vmem:[#allocation10 + $0x730] sm:$0xff]  ;;  %v4298_v6 = vpack.c.bf16 %v2969_v24, %v2968_v3  ;;  %v3234_v24 = vld [vmem:[#allocation14 + $0x230] sm:$0xff] }
 0x4fe   :  { %v4265_v23 = vpack.c.bf16 %v2665_v63, %v2663_v12  ;;  %v2972_v63 = vld [vmem:[#allocation14 + $0x100] sm:$0xff] }
 0x592   :  { %v2407_v60 = vpop.f32.mrb[32].mxu1 }
 0x593   :  { %v2409_v53 = vpop.f32.mrb[33].mxu1 }
 0x594   :  { %2541 = vmatprep.mubr.f32.mxu1 %v2409_v53  ;;  %v2674_v53 = vld [vmem:[#allocation10 + $0x778] sm:$0xff] }
 0x595   :  { %2542 = vmatmul.mubr.f32.vlgmr.msra.gmra.mrb[30].mxu1 %v2407_v60  ;;  %v2669_v60 = vld [vmem:[#allocation10 + $0x750] sm:$0xff] }
 0x596   :  { %4230 = vmatpush1.bf16.msra.mxu1 %v4229_v54  ;;  %2755 = vmatprep.mubr.f32.mxu1 %v2623_v14  ;;  %v2668_v14 = vld [vmem:[#allocation10 + $0x748] sm:$0xff] }
 0x597   :  { %4232 = vmatprep.subr.bf16.mxu1 %v4231_v18  ;;  %v4267_v17 = vpack.c.bf16 %v2670_v31, %v2668_v14  ;;  %v2672_v54 = vld [vmem:[#allocation10 + $0x768] sm:$0xff]  ;;  %v4269_v18 = vpack.c.bf16 %v2669_v60, %v2667_v55  ;;  %v2973_v14 = vld [vmem:[#allocation14 + $0x108] sm:$0xff] }
 0x598   :  { %v4271_v39 = vpack.c.bf16 %v2674_v53, %v2672_v54  ;;  %v4304_v31 = vpack.c.bf16 %v2973_v14, %v2972_v63  ;;  %v2976_v60 = vld [vmem:[#allocation14 + $0x120] sm:$0xff]  ;;  %v2977_v54 = vld [vmem:[#allocation14 + $0x128] sm:$0xff] }
 0x599   :  { %v4310_v53 = vpack.c.bf16 %v2977_v54, %v2976_v60  ;;  %v2863_v63 = vld [vmem:[#allocation14] sm:$0xff]  ;;  %v2864_v14 = vld [vmem:[#allocation14 + $0x8] sm:$0xff]  ;;  %v2865_v54 = vld [vmem:[#allocation14 + $0x10] sm:$0xff] }
 0x59a   :  { %4234 = vmatpush1.bf16.msra.mxu1 %v4233_v29  ;;  %v2678_v29 = vld [vmem:[#allocation10 + $0x798] sm:$0xff] }
 0x59b   :  { %4236 = vmatprep.subr.bf16.mxu1 %v4235_v30  ;;  %v4273_v30 = vpack.c.bf16 %v2673_v19, %v2671_v37  ;;  %v4275_v28 = vpack.c.bf16 %v2678_v29, %v2676_v13  ;;  %v2980_v19 = vld [vmem:[#allocation14 + $0x140] sm:$0xff]  ;;  %v2981_v13 = vld [vmem:[#allocation14 + $0x148] sm:$0xff] }
 0x59c   :  { %v4316_v29 = vpack.c.bf16 %v2981_v13, %v2980_v19  ;;  %v2869_v13 = vld [vmem:[#allocation14 + $0x30] sm:$0xff] }
 0x59e   :  { %4238 = vmatpush1.bf16.msra.mxu1 %v4237_v36  ;;  %v2682_v36 = vld [vmem:[#allocation10 + $0x7b8] sm:$0xff] }
 0x59f   :  { %4240 = vmatprep.subr.bf16.mxu1 %v4239_v38  ;;  %v4277_v38 = vpack.c.bf16 %v2677_v34, %v2675_v32  ;;  %v4279_v33 = vpack.c.bf16 %v2682_v36, %v2680_v4  ;;  %v2984_v34 = vld [vmem:[#allocation14 + $0x160] sm:$0xff]  ;;  %v2985_v4 = vld [vmem:[#allocation14 + $0x168] sm:$0xff] }
 0x5a0   :  { %v4322_v36 = vpack.c.bf16 %v2985_v4, %v2984_v34  ;;  %v2873_v4 = vld [vmem:[#allocation14 + $0x50] sm:$0xff] }
 0x5a2   :  { %4242 = vmatpush1.bf16.msra.mxu1 %v4241_v44  ;;  %v2686_v44 = vld [vmem:[#allocation10 + $0x7d8] sm:$0xff] }
 0x5a3   :  { %4244 = vmatprep.subr.bf16.mxu1 %v4243_v5  ;;  %v4281_v5 = vpack.c.bf16 %v2681_v58, %v2679_v40  ;;  %v4283_v9 = vpack.c.bf16 %v2686_v44, %v2684_v42  ;;  %v3212_v58 = vld [vmem:[#allocation14 + $0x180] sm:$0xff]  ;;  %v3213_v42 = vld [vmem:[#allocation14 + $0x188] sm:$0xff] }
 0x5a4   :  { %v4364_v44 = vpack.c.bf16 %v3213_v42, %v3212_v58  ;;  %v2877_v42 = vld [vmem:[#allocation14 + $0x70] sm:$0xff] }
 0x5a6   :  { %4246 = vmatpush1.bf16.msra.mxu1 %v4245_v21  ;;  %v2690_v21 = vld [vmem:[#allocation10 + $0x7f8] sm:$0xff] }
 0x5a7   :  { %4248 = vmatprep.subr.bf16.mxu1 %v4247_v22  ;;  %v4285_v22 = vpack.c.bf16 %v2685_v15, %v2683_v10  ;;  %v4287_v8 = vpack.c.bf16 %v2690_v21, %v2688_v16  ;;  %v3216_v15 = vld [vmem:[#allocation14 + $0x1a0] sm:$0xff]  ;;  %v3217_v16 = vld [vmem:[#allocation14 + $0x1a8] sm:$0xff] }
 0x5a8   :  { %v4370_v21 = vpack.c.bf16 %v3217_v16, %v3216_v15  ;;  %v2881_v16 = vld [vmem:[#allocation14 + $0x90] sm:$0xff] }
 0x5aa   :  { %4250 = vmatpush1.bf16.msra.mxu1 %v4249_v45  ;;  %v2764_v45 = vld [vmem:[#allocation11] sm:$0x3] }
 0x5ab   :  { %4252 = vmatprep.subr.bf16.mxu1 %v4251_v7  ;;  %v2769_v7 = vrot.slane %v2764_v45, %v1898_v47  ;;  %v2773_v48 = vrot.slane %v2764_v45, %v1902_v49  ;;  %v4769_v49 = vmov 0.0|0.0  }
 0x5ae   :  { %4254 = vmatpush1.bf16.msra.mxu1 %v4253_v43 }
 0x5af   :  { %4256 = vmatprep.subr.bf16.mxu1 %v4255_v56 }
 0x5b2   :  { %4258 = vmatpush1.bf16.msra.mxu1 %v4257_v27  ;;  %v2966_v27 = vld [vmem:[#allocation14 + $0xd0] sm:$0xff] }
 0x5b3   :  { %4260 = vmatprep.subr.bf16.mxu1 %v4259_v2  ;;  %v2967_v2 = vld [vmem:[#allocation14 + $0xd8] sm:$0xff] }
 0x5b4   :  { %v4295_v59 = vpack.c.bf16 %v2967_v2, %v2966_v27  ;;  %v3232_v2 = vld [vmem:[#allocation14 + $0x220] sm:$0xff] }
 0x5b6   :  { %4262 = vmatpush1.bf16.msra.mxu1 %v4261_v50  ;;  %v2970_v50 = vld [vmem:[#allocation14 + $0xf0] sm:$0xff] }
 0x5b7   :  { %4264 = vmatprep.subr.bf16.mxu1 %v4263_v11  ;;  %v2971_v11 = vld [vmem:[#allocation14 + $0xf8] sm:$0xff] }
 0x5b8   :  { %v4301_v12 = vpack.c.bf16 %v2971_v11, %v2970_v50 }
 0x5ba   :  { %4266 = vmatpush1.bf16.msra.mxu1 %v4265_v23  ;;  %v2974_v23 = vld [vmem:[#allocation14 + $0x110] sm:$0xff] }
 0x5bb   :  { %4268 = vmatprep.subr.bf16.mxu1 %v4267_v17  ;;  %v2975_v17 = vld [vmem:[#allocation14 + $0x118] sm:$0xff] }
 0x5bc   :  { %v4307_v55 = vpack.c.bf16 %v2975_v17, %v2974_v23 }
 0x5be   :  { %4270 = vmatpush1.bf16.msra.mxu1 %v4269_v18  ;;  %v2978_v18 = vld [vmem:[#allocation14 + $0x130] sm:$0xff] }
 0x5bf   :  { %4272 = vmatprep.subr.bf16.mxu1 %v4271_v39  ;;  %v2979_v39 = vld [vmem:[#allocation14 + $0x138] sm:$0xff] }
 0x5c0   :  { %v4313_v37 = vpack.c.bf16 %v2979_v39, %v2978_v18  ;;  %v2867_v39 = vld [vmem:[#allocation14 + $0x20] sm:$0xff] }
 0x5c2   :  { %4274 = vmatpush1.bf16.msra.mxu1 %v4273_v30  ;;  %v2982_v30 = vld [vmem:[#allocation14 + $0x150] sm:$0xff] }
 0x5c3   :  { %4276 = vmatprep.subr.bf16.mxu1 %v4275_v28  ;;  %v2983_v28 = vld [vmem:[#allocation14 + $0x158] sm:$0xff] }
 0x5c4   :  { %v4319_v32 = vpack.c.bf16 %v2983_v28, %v2982_v30  ;;  %v2871_v28 = vld [vmem:[#allocation14 + $0x40] sm:$0xff] }
 0x5c6   :  { %4278 = vmatpush1.bf16.msra.mxu1 %v4277_v38  ;;  %v2986_v38 = vld [vmem:[#allocation14 + $0x170] sm:$0xff] }
 0x5c7   :  { %4280 = vmatprep.subr.bf16.mxu1 %v4279_v33  ;;  %v2987_v33 = vld [vmem:[#allocation14 + $0x178] sm:$0xff] }
 0x5c8   :  { %v4325_v40 = vpack.c.bf16 %v2987_v33, %v2986_v38  ;;  %v2875_v33 = vld [vmem:[#allocation14 + $0x60] sm:$0xff] }
 0x5ca   :  { %4282 = vmatpush1.bf16.msra.mxu1 %v4281_v5  ;;  %v3214_v5 = vld [vmem:[#allocation14 + $0x190] sm:$0xff] }
 0x5cb   :  { %4284 = vmatprep.subr.bf16.mxu1 %v4283_v9  ;;  %v3215_v9 = vld [vmem:[#allocation14 + $0x198] sm:$0xff] }
 0x5cc   :  { %v4367_v10 = vpack.c.bf16 %v3215_v9, %v3214_v5  ;;  %v2879_v9 = vld [vmem:[#allocation14 + $0x80] sm:$0xff] }
 0x5ce   :  { %4286 = vmatpush1.bf16.msra.mxu1 %v4285_v22  ;;  %v3218_v22 = vld [vmem:[#allocation14 + $0x1b0] sm:$0xff] }
 0x5cf   :  { %4288 = vmatprep.subr.bf16.mxu1 %v4287_v8  ;;  %v3219_v8 = vld [vmem:[#allocation14 + $0x1b8] sm:$0xff] }
 0x5d0   :  { %v4373_v25 = vpack.c.bf16 %v3219_v8, %v3218_v22  ;;  %v2883_v8 = vld [vmem:[#allocation14 + $0xa0] sm:$0xff] }
 0x5d2   :  { %4290 = vmatpush1.bf16.msra.mxu1 %v4289_v57  ;;  %v3221_v57 = vld [vmem:[#allocation14 + $0x1c8] sm:$0xff] }
 0x5d3   :  { %v4376_v45 = vpack.c.bf16 %v3221_v57, %v3220_v26  ;;  %v2885_v57 = vld [vmem:[#allocation14 + $0xb0] sm:$0xff] }
 0x5d5   :  { %2756 = vmatmul.mubr.f32.vlgmr.msra.gmra.mrb[30].mxu1 %v5326_v35  ;;  %v2964_v35 = vld [vmem:[#allocation14 + $0xc0] sm:$0xff] }
 0x5d6   :  { %3204 = vmatprep.mubr.f32.mxu1 %v4768_v1  ;;  %v4292_v47 = vpack.c.bf16 %v2965_v62, %v2964_v35  ;;  %v3228_v35 = vld [vmem:[#allocation14 + $0x200] sm:$0xff]  ;;  %v3229_v62 = vld [vmem:[#allocation14 + $0x208] sm:$0xff] }
 0x6a8   :  { %v2757_v51 = vpop.f32.mrb[30].mxu1 }
 0x6a9   :  { %v2776_v52 = vadd.f32 %v2769_v7, %v2757_v51  ;;  %v2759_v20 = vpop.f32.mrb[31].mxu1  ;;  %v3222_v7 = vld [vmem:[#allocation14 + $0x1d0] sm:$0xff] }
 0x6aa   :  { %v2777_v43 = vadd.f32 %v2773_v48, %v2759_v20  ;;  %v3223_v48 = vld [vmem:[#allocation14 + $0x1d8] sm:$0xff]  ;;  %v3225_v20 = vld [vmem:[#allocation14 + $0x1e8] sm:$0xff] }
 0x6ab   :  { %v2778_v41 = vmax.f32 %v2776_v52, 0.0  ;;  %v4379_v51 = vpack.c.bf16 %v3223_v48, %v3222_v7  ;;  %v3224_v52 = vld [vmem:[#allocation14 + $0x1e0] sm:$0xff] }
 0x6ac   :  { %v2779_v56 = vmax.f32 %v2777_v43, 0.0  ;;  %v4382_v43 = vpack.c.bf16 %v3225_v20, %v3224_v52  ;;  %v3319_v48 = vld [vmem:[#allocation17] sm:$0xff]  ;;  %v3321_v52 = vld [vmem:[#allocation17 + $0x10] sm:$0xff] }
 0x6ae   :  { %3542 = vmatprep.subr.msk.mxu0 %vm2785_vm2, %v2779_v56  ;;  %3550 = vmatprep.subr.msk.mxu1 %vm2785_vm2, %v2779_v56 }
 0x6af   :  { %3543 = vmatpush1.msk.msra.mxu0 %vm2785_vm2, %v2778_v41  ;;  %3551 = vmatpush1.msk.msra.mxu1 %vm2785_vm2, %v2778_v41 }
 0x6b0   :  { %3544 = vmatmul.mubr.msk.f32.vlgmr.msra.gmra.mrb[12].mxu0 %vm2781_vm3, %v2780_v61  ;;  %3545 = vmatprep.subr.msk.mxu0 %vm2785_vm2, %v2779_v56  ;;  %v3226_v56 = vld [vmem:[#allocation14 + $0x1f0] sm:$0xff] }
 0x6b1   :  { %3546 = vmatpush1.msk.msra.mxu0 %vm2785_vm2, %v2778_v41  ;;  %2956 = vmatprep.mubr.f32.mxu0 %v4768_v1  ;;  %v3227_v41 = vld [vmem:[#allocation14 + $0x1f8] sm:$0xff] }
 0x6b2   :  { %3552 = vmatmul.mubr.msk.f32.vlgmr.msra.gmra.mrb[34].mxu1 %vm2781_vm3, %v3136_v0  ;;  %4291 = vmatprep.subr.bf16.mxu0 %v4769_v49  ;;  %v4385_v61 = vpack.c.bf16 %v3227_v41, %v3226_v56  ;;  %v4388_v0 = vpack.c.bf16 %v3229_v62, %v3228_v35  ;;  %v3323_v41 = vld [vmem:[#allocation17 + $0x20] sm:$0xff]  ;;  %v3325_v62 = vld [vmem:[#allocation17 + $0x30] sm:$0xff] }
 0x6b3   :  { %4363 = vmatprep.subr.bf16.mxu1 %v4769_v49 }
 0x6b4   :  { %3547 = vmatmul.mubr.msk.f32.vlgmr.msra.gmra.mrb[14].mxu0 %vm2781_vm3, %v2888_v46  ;;  %4365 = vmatpush1.bf16.msra.mxu1 %v4364_v44  ;;  %v3230_v46 = vld [vmem:[#allocation14 + $0x210] sm:$0xff]  ;;  %v2878_v44 = vld [vmem:[#allocation14 + $0x78] sm:$0xff] }
 0x6b5   :  { %4293 = vmatpush1.bf16.msra.mxu0 %v4292_v47  ;;  %4366 = vmatprep.subr.bf16.mxu1 %v4769_v49  ;;  %v3231_v47 = vld [vmem:[#allocation14 + $0x218] sm:$0xff]  ;;  %v4349_v5 = vpack.c.bf16 %v2878_v44, %v2877_v42 }
 0x6b6   :  { %4294 = vmatprep.subr.bf16.mxu0 %v4769_v49  ;;  %v4391_v27 = vpack.c.bf16 %v3231_v47, %v3230_v46 }
 0x6b8   :  { %4368 = vmatpush1.bf16.msra.mxu1 %v4367_v10  ;;  %v2880_v10 = vld [vmem:[#allocation14 + $0x88] sm:$0xff] }
 0x6b9   :  { %4296 = vmatpush1.bf16.msra.mxu0 %v4295_v59  ;;  %4369 = vmatprep.subr.bf16.mxu1 %v4769_v49  ;;  %v3233_v59 = vld [vmem:[#allocation14 + $0x228] sm:$0xff]  ;;  %v4352_v15 = vpack.c.bf16 %v2880_v10, %v2879_v9 }
 0x6ba   :  { %4297 = vmatprep.subr.bf16.mxu0 %v4769_v49  ;;  %v4394_v3 = vpack.c.bf16 %v3233_v59, %v3232_v2 }
 0x6bc   :  { %4371 = vmatpush1.bf16.msra.mxu1 %v4370_v21  ;;  %v2882_v21 = vld [vmem:[#allocation14 + $0x98] sm:$0xff] }
 0x6bd   :  { %4299 = vmatpush1.bf16.msra.mxu0 %v4298_v6  ;;  %4372 = vmatprep.subr.bf16.mxu1 %v4769_v49  ;;  %v3235_v6 = vld [vmem:[#allocation14 + $0x238] sm:$0xff]  ;;  %v4355_v22 = vpack.c.bf16 %v2882_v21, %v2881_v16 }
 0x6be   :  { %4300 = vmatprep.subr.bf16.mxu0 %v4769_v49  ;;  %v4397_v50 = vpack.c.bf16 %v3235_v6, %v3234_v24 }
 0x6c0   :  { %4374 = vmatpush1.bf16.msra.mxu1 %v4373_v25  ;;  %v2884_v25 = vld [vmem:[#allocation14 + $0xa8] sm:$0xff] }
 0x6c1   :  { %4302 = vmatpush1.bf16.msra.mxu0 %v4301_v12  ;;  %4375 = vmatprep.subr.bf16.mxu1 %v4769_v49  ;;  %v4358_v26 = vpack.c.bf16 %v2884_v25, %v2883_v8 }
 0x6c2   :  { %4303 = vmatprep.subr.bf16.mxu0 %v4769_v49 }
 0x6c4   :  { %4377 = vmatpush1.bf16.msra.mxu1 %v4376_v45  ;;  %v2886_v45 = vld [vmem:[#allocation14 + $0xb8] sm:$0xff] }
 0x6c5   :  { %4305 = vmatpush1.bf16.msra.mxu0 %v4304_v31  ;;  %4378 = vmatprep.subr.bf16.mxu1 %v4769_v49  ;;  %v4361_v7 = vpack.c.bf16 %v2886_v45, %v2885_v57 }
 0x6c6   :  { %4306 = vmatprep.subr.bf16.mxu0 %v4769_v49 }
 0x6c8   :  { %4380 = vmatpush1.bf16.msra.mxu1 %v4379_v51  ;;  %v3320_v51 = vld [vmem:[#allocation17 + $0x8] sm:$0xff] }
 0x6c9   :  { %4308 = vmatpush1.bf16.msra.mxu0 %v4307_v55  ;;  %4381 = vmatprep.subr.bf16.mxu1 %v4769_v49  ;;  %v4328_v55 = vpack.c.bf16 %v2864_v14, %v2863_v63  ;;  %v4400_v20 = vpack.c.bf16 %v3320_v51, %v3319_v48  ;;  %v3409_v63 = vld [vmem:[#allocation20 + $0x8] sm:$0xff] }
 0x6ca   :  { %4309 = vmatprep.subr.bf16.mxu0 %v4769_v49 }
 0x6cc   :  { %4383 = vmatpush1.bf16.msra.mxu1 %v4382_v43  ;;  %v3322_v43 = vld [vmem:[#allocation17 + $0x18] sm:$0xff] }
 0x6cd   :  { %4311 = vmatpush1.bf16.msra.mxu0 %v4310_v53  ;;  %4384 = vmatprep.subr.bf16.mxu1 %v4769_v49  ;;  %v2866_v53 = vld [vmem:[#allocation14 + $0x18] sm:$0xff]  ;;  %v4403_v56 = vpack.c.bf16 %v3322_v43, %v3321_v52 }
 0x6ce   :  { %4312 = vmatprep.subr.bf16.mxu0 %v4769_v49  ;;  %v4331_v18 = vpack.c.bf16 %v2866_v53, %v2865_v54  ;;  %v3555_v54 = vld [vmem:[#allocation19] ss:$0 sm:$0xff] }
 0x6d0   :  { %4386 = vmatpush1.bf16.msra.mxu1 %v4385_v61  ;;  %v3324_v61 = vld [vmem:[#allocation17 + $0x28] sm:$0xff] }
 0x6d1   :  { %4314 = vmatpush1.bf16.msra.mxu0 %v4313_v37  ;;  %4387 = vmatprep.subr.bf16.mxu1 %v4769_v49  ;;  %v2868_v37 = vld [vmem:[#allocation14 + $0x28] sm:$0xff]  ;;  %v4406_v35 = vpack.c.bf16 %v3324_v61, %v3323_v41 }
 0x6d2   :  { %4315 = vmatprep.subr.bf16.mxu0 %v4769_v49  ;;  %v4334_v19 = vpack.c.bf16 %v2868_v37, %v2867_v39 }
 0x6d4   :  { %4389 = vmatpush1.bf16.msra.mxu1 %v4388_v0  ;;  %v3326_v0 = vld [vmem:[#allocation17 + $0x38] sm:$0xff] }
 0x6d5   :  { %4317 = vmatpush1.bf16.msra.mxu0 %v4316_v29  ;;  %4390 = vmatprep.subr.bf16.mxu1 %v4769_v49  ;;  %v2870_v29 = vld [vmem:[#allocation14 + $0x38] sm:$0xff]  ;;  %v4409_v46 = vpack.c.bf16 %v3326_v0, %v3325_v62 }
 0x6d6   :  { %4318 = vmatprep.subr.bf16.mxu0 %v4769_v49  ;;  %v4337_v30 = vpack.c.bf16 %v2870_v29, %v2869_v13 }
 0x6d8   :  { %4392 = vmatpush1.bf16.msra.mxu1 %v4391_v27 }
 0x6d9   :  { %4320 = vmatpush1.bf16.msra.mxu0 %v4319_v32  ;;  %4393 = vmatprep.subr.bf16.mxu1 %v4769_v49  ;;  %v2872_v32 = vld [vmem:[#allocation14 + $0x48] sm:$0xff] }
 0x6da   :  { %4321 = vmatprep.subr.bf16.mxu0 %v4769_v49  ;;  %v4340_v34 = vpack.c.bf16 %v2872_v32, %v2871_v28 }
 0x6dc   :  { %4395 = vmatpush1.bf16.msra.mxu1 %v4394_v3 }
 0x6dd   :  { %4323 = vmatpush1.bf16.msra.mxu0 %v4322_v36  ;;  %4396 = vmatprep.subr.bf16.mxu1 %v4769_v49  ;;  %v2874_v36 = vld [vmem:[#allocation14 + $0x58] sm:$0xff] }
 0x6de   :  { %4324 = vmatprep.subr.bf16.mxu0 %v4769_v49  ;;  %v4343_v38 = vpack.c.bf16 %v2874_v36, %v2873_v4 }
 0x6e0   :  { %4398 = vmatpush1.bf16.msra.mxu1 %v4397_v50  ;;  %v3554_v50 = vld [vmem:[#allocation16] ss:$0 sm:$0xff] }
 0x6e1   :  { %4326 = vmatpush1.bf16.msra.mxu0 %v4325_v40  ;;  %v2876_v40 = vld [vmem:[#allocation14 + $0x68] sm:$0xff] }
 0x6e2   :  { %4327 = vmatprep.subr.bf16.mxu0 %v4769_v49  ;;  %v4346_v58 = vpack.c.bf16 %v2876_v40, %v2875_v33 }
 0x783   :  { %v5363_v11 = vpop.f32.mrb[12].mxu0 }
 0x784   :  { %v2860_v12 = vpop.f32.mrb[13].mxu0 }
 0x785   :  { %v3206_v31 = vpop.f32.mrb[34].mxu1 }
 0x786   :  { %v3208_v23 = vpop.f32.mrb[35].mxu1 }
 0x787   :  { %v2958_v17 = vpop.f32.mrb[14].mxu0  ;;  %3553 = vmatprep.mubr.msk.f32.mxu1 %vm2988_vm4, %v3208_v23 }
 0x788   :  { %v2960_v60 = vpop.f32.mrb[15].mxu0  ;;  %3304 = vmatmul.mubr.f32.vlgmr.msra.gmra.mrb[36].mxu1 %v3206_v31 }
 0x789   :  { %3548 = vmatprep.mubr.msk.f32.mxu0 %vm2988_vm4, %v2960_v60 }
 0x78a   :  { %3057 = vmatmul.mubr.f32.vlgmr.msra.gmra.mrb[16].mxu0 %v2958_v17  ;;  %v3410_v17 = vld [vmem:[#allocation20 + $0x10] sm:$0xff] }
 0x78b   :  { %4329 = vmatpush1.bf16.msra.mxu0 %v4328_v55  ;;  %3549 = vmatprep.mubr.msk.f32.mxu0 %vm2988_vm4, %v2860_v12  ;;  %v3408_v12 = vld [vmem:[#allocation20] sm:$0xff]  ;;  %v3411_v55 = vld [vmem:[#allocation20 + $0x18] sm:$0xff] }
 0x78c   :  { %4330 = vmatprep.subr.bf16.mxu0 %v4769_v49  ;;  %v4412_v31 = vpack.c.bf16 %v3409_v63, %v3408_v12  ;;  %v4415_v60 = vpack.c.bf16 %v3411_v55, %v3410_v17 }
 0x78f   :  { %4332 = vmatpush1.bf16.msra.mxu0 %v4331_v18 }
 0x790   :  { %4333 = vmatprep.subr.bf16.mxu0 %v4769_v49 }
 0x793   :  { %4335 = vmatpush1.bf16.msra.mxu0 %v4334_v19  ;;  %v3557_v19 = vld [vmem:[#allocation2] ss:$0 sm:$0xff] }
 0x794   :  { %4336 = vmatprep.subr.bf16.mxu0 %v4769_v49 }
 0x797   :  { %4338 = vmatpush1.bf16.msra.mxu0 %v4337_v30 }
 0x798   :  { %4339 = vmatprep.subr.bf16.mxu0 %v4769_v49 }
 0x79b   :  { %4341 = vmatpush1.bf16.msra.mxu0 %v4340_v34 }
 0x79c   :  { %4342 = vmatprep.subr.bf16.mxu0 %v4769_v49 }
 0x79f   :  { %4344 = vmatpush1.bf16.msra.mxu0 %v4343_v38 }
 0x7a0   :  { %4345 = vmatprep.subr.bf16.mxu0 %v4769_v49 }
 0x7a3   :  { %4347 = vmatpush1.bf16.msra.mxu0 %v4346_v58 }
 0x7a4   :  { %4348 = vmatprep.subr.bf16.mxu0 %v4769_v49 }
 0x7a7   :  { %4350 = vmatpush1.bf16.msra.mxu0 %v4349_v5 }
 0x7a8   :  { %4351 = vmatprep.subr.bf16.mxu0 %v4769_v49 }
 0x7ab   :  { %4353 = vmatpush1.bf16.msra.mxu0 %v4352_v15 }
 0x7ac   :  { %4354 = vmatprep.subr.bf16.mxu0 %v4769_v49 }
 0x7af   :  { %4356 = vmatpush1.bf16.msra.mxu0 %v4355_v22 }
 0x7b0   :  { %4357 = vmatprep.subr.bf16.mxu0 %v4769_v49 }
 0x7b3   :  { %4359 = vmatpush1.bf16.msra.mxu0 %v4358_v26 }
 0x7b4   :  { %4360 = vmatprep.subr.bf16.mxu0 %v4769_v49 }
 0x7b7   :  { %4362 = vmatpush1.bf16.msra.mxu0 %v4361_v7 }
 0x7b8   :  { %4399 = vmatprep.subr.bf16.mxu0 %v4769_v49 }
 0x7ba   :  { %3130 = vmatmul.mubr.f32.vlgmr.msra.gmra.mrb[18].mxu0 %v5363_v11 }
 0x7bb   :  { %4401 = vmatpush3.bf16.msra.mxu0 %v4400_v20  ;;  %3589 = vmatprep.mubr.msk.f32.mxu0 %vm4770_vm5, %v4768_v1 }
 0x7bc   :  { %4402 = vmatprep.subr.bf16.mxu0 %v4769_v49 }
 0x7bf   :  { %4404 = vmatpush3.bf16.msra.mxu0 %v4403_v56 }
 0x7c0   :  { %4405 = vmatprep.subr.bf16.mxu0 %v4769_v49 }
 0x7c3   :  { %4407 = vmatpush3.bf16.msra.mxu0 %v4406_v35 }
 0x7c4   :  { %4408 = vmatprep.subr.bf16.mxu0 %v4769_v49 }
 0x7c7   :  { %4410 = vmatpush3.bf16.msra.mxu0 %v4409_v46 }
 0x7c8   :  { %4411 = vmatprep.subr.bf16.mxu0 %v4769_v49 }
 0x85b   :  { %v3305_v47 = vpop.f32.mrb[36].mxu1 }
 0x85c   :  { %v3307_v27 = vpop.f32.mrb[37].mxu1 }
 0x85d   :  { %v3058_v2 = vpop.f32.mrb[16].mxu0 }
 0x85e   :  { %v3060_v59 = vpop.f32.mrb[17].mxu0 }
 0x88d   :  { %v3131_v3 = vpop.f32.mrb[18].mxu0 }
 0x88e   :  { %v3132_v24 = vadd.f32 %v3131_v3, %v3058_v2  ;;  %v3133_v6 = vpop.f32.mrb[19].mxu0 }
 0x890   :  { %v3309_v11 = vadd.f32 %v3305_v47, %v3132_v24 }
 0x892   :  { %v3317_v14 = vadd.f32 %v3554_v50, %v3309_v11 }
 0x894   :  { %v3318_v23 = vmax.f32 %v3317_v14, 0.0 }
 0x896   :  { %3590 = vmatmul.mubr.msk.f32.vlgmr.msra.gmra.mrb[20].mxu0 %vm2988_vm4, %v3318_v23 }
 0x897   :  { %4413 = vmatpush3.bf16.msra.mxu0 %v4412_v31  ;;  %3600 = vmatprep.mubr.msk.f32.mxu0 %vm4770_vm5, %v4768_v1 }
 0x898   :  { %4414 = vmatprep.subr.bf16.mxu0 %v4769_v49 }
 0x89b   :  { %4416 = vmatpush3.bf16.msra.mxu0 %v4415_v60 }
 0x969   :  { %v3403_v53 = vpop.f32.mrb[20].mxu0 }
 0x96a   :  { %v3404_v18 = vadd.f32 %v3555_v54, %v3403_v53  ;;  %v3591_v39 = vpop.f32.mrb[21].mxu0 }
 0x96c   :  { %v3407_v37 = vmax.f32 %v3404_v18, 0.0 }
 0x96e   :  { %3601 = vmatmul.mubr.msk.f32.vlgmr.msra.gmra.mrb[22].mxu0 %vm3419_vm6, %v3407_v37 }
 0xa41   :  { %v3489_v13 = vpop.f32.mrb[22].mxu0 }
 0xa42   :  { %v3490_v29 = vadd.f32 %v3557_v19, %v3489_v13  ;;  %v3602_v30 = vpop.f32.mrb[23].mxu0 }
 0xa44   :  { %3494 = vst.msk [vmem:[%s5408_s14] sm:$0x3] %vm3493_vm7, %v3490_v29 }
 0xa45   :  { %3499 = vsyncpa [#allocation4], 1 }
 0xa46   :  { %3500 = vsyncpa [#allocation6], 1 }
 0xa47   :  { %3501 = vsyncpa [#allocation9], 1 }
 0xa48   :  { %3502 = vsyncpa [#allocation12], 1 }
 0xa49   :  { %3503 = vsyncpa [#allocation15], 1 }
 0xa4a   :  { %3504 = vsyncpa [#allocation18], 1 }
 0xa4b   :  { %3505 = vsyncpa [#allocation21], 1 }

</bundles_post_ra>
